<compile_context>
chip_gen: v7x
topology: tpu7x:2x2x1
jax: 0.10.0
libtpu: 0.0.40
codegen_flags: <defaults>
</compile_context>

<pallas_src>
import functools

import jax
import jax.numpy as jnp
from jax.experimental import pallas as pl
from jax.experimental.pallas import tpu as pltpu

LANE = 128  # lane width / channel padding target


def _round_up(x, m):
    return (x + m - 1) // m * m


# ----------------------------- Pallas kernels ------------------------------

def _conv_pool_kernel(p_ref, w_ref, b_ref, o_ref):
    """Fused conv(matmul over im2col) + bias + ReLU + 2x2 maxpool.

    p_ref: (4, TM, K) bf16  -- 4 pool-position slabs of im2col patches
    w_ref: (K, 128)  bf16   -- conv weight (lane-padded OC), VMEM resident
    b_ref: (1, 128)  f32    -- bias (lane-padded)
    o_ref: (TM, 128) bf16   -- pooled, ReLU'd activation (lane dense)
    """
    w = w_ref[...]
    d0 = jnp.dot(p_ref[0], w, preferred_element_type=jnp.float32)
    d1 = jnp.dot(p_ref[1], w, preferred_element_type=jnp.float32)
    d2 = jnp.dot(p_ref[2], w, preferred_element_type=jnp.float32)
    d3 = jnp.dot(p_ref[3], w, preferred_element_type=jnp.float32)
    m = jnp.maximum(jnp.maximum(d0, d1), jnp.maximum(d2, d3))   # 2x2 max pool
    o = jnp.maximum(m + b_ref[...], 0.0)                        # bias (added once) + ReLU
    o_ref[...] = o.astype(o_ref.dtype)


def _fc_fused_kernel(x_ref, w1_ref, b1_ref, w2_ref, b2_ref, o_ref):
    """Fused fc1 + ReLU + fc2, both (tiny) weights VMEM resident.

    x_ref : (TB, 6272) bf16   w1_ref: (6272, 128) bf16   b1_ref: (1, 128) f32
    w2_ref: (128, 128)  bf16  b2_ref: (1, 128) f32       o_ref : (TB, 128) f32
    """
    h = jnp.dot(x_ref[...], w1_ref[...], preferred_element_type=jnp.float32) + b1_ref[...]
    h = jnp.maximum(h, 0.0).astype(w2_ref.dtype)
    o = jnp.dot(h, w2_ref[...], preferred_element_type=jnp.float32) + b2_ref[...]
    o_ref[...] = o.astype(o_ref.dtype)


# ------------------------- conv + relu + pool wrapper -----------------------

def conv3x3_relu_pool(x_nhwc, w_oihw, b, *, tm_max=1024):
    """3x3 / stride-1 / pad-1 conv + bias + ReLU + 2x2 maxpool.

    Returns (B, H//2, W//2, 128) bf16 with real channels in [..., :OC] and the
    padded channels exactly zero (zero weight columns + zero bias + ReLU).
    """
    B, H, W, C = x_nhwc.shape
    OC = w_oihw.shape[0]
    Ho, Wo = H // 2, W // 2
    M = B * Ho * Wo
    K = 9 * C

    # 4-slab im2col: slab (dh, dw) = patches of conv output pixels (2ho+dh, 2wo+dw).
    xp = jnp.pad(x_nhwc, ((0, 0), (1, 1), (1, 1), (0, 0)))
    slabs = []
    for dh in range(2):
        for dw in range(2):
            cols = [xp[:, dh + kh:dh + kh + H:2, dw + kw:dw + kw + W:2, :]
                    for kh in range(3) for kw in range(3)]
            p = jnp.stack(cols, axis=3)                 # (B, Ho, Wo, 9, C), idx = kh*3+kw
            slabs.append(p.reshape(M, K))
    patches = jnp.stack(slabs, axis=0)                  # (4, M, 9*C)
    if patches.dtype != jnp.bfloat16:
        patches = patches.astype(jnp.bfloat16)

    # Tile over M (pooled output pixels); pad rows to a tile multiple.
    TM = min(tm_max, _round_up(M, 16))
    Mp = _round_up(M, TM)
    if Mp != M:
        patches = jnp.pad(patches, ((0, 0), (0, Mp - M), (0, 0)))

    # Weight: (kh*3+kw)*C + c rows, OC columns padded to 128 lanes.
    w2d = jnp.transpose(w_oihw, (2, 3, 1, 0)).reshape(K, OC)
    w2d = jnp.pad(w2d, ((0, 0), (0, LANE - OC))).astype(jnp.bfloat16)
    bp = jnp.pad(b.astype(jnp.float32), (0, LANE - OC)).reshape(1, LANE)

    out = pl.pallas_call(
        _conv_pool_kernel,
        out_shape=jax.ShapeDtypeStruct((Mp, LANE), jnp.bfloat16),
        grid=(Mp // TM,),
        in_specs=[
            pl.BlockSpec((4, TM, K), lambda i: (0, i, 0)),    # patches: tiled over M
            pl.BlockSpec((K, LANE), lambda i: (0, 0)),        # weight: VMEM resident
            pl.BlockSpec((1, LANE), lambda i: (0, 0)),        # bias:   VMEM resident
        ],
        out_specs=pl.BlockSpec((TM, LANE), lambda i: (i, 0)),  # lane-dense output
        compiler_params=pltpu.CompilerParams(dimension_semantics=("parallel",)),
    )(patches, w2d, bp)

    return out[:M].reshape(B, Ho, Wo, LANE)


# ------------------------------ fc1+fc2 wrapper ------------------------------

def fc1_relu_fc2(x2d, w1_big, b1_big, w2_big, b2_big, *, tb_max=256):
    """x2d: (B, 6272) -> (B, 62) f32. Weights are pre-padded lane-dense."""
    B, K = x2d.shape
    x = x2d if x2d.dtype == jnp.bfloat16 else x2d.astype(jnp.bfloat16)
    TB = min(tb_max, _round_up(B, 16))
    Bp = _round_up(B, TB)
    if Bp != B:
        x = jnp.pad(x, ((0, Bp - B), (0, 0)))

    out = pl.pallas_call(
        _fc_fused_kernel,
        out_shape=jax.ShapeDtypeStruct((Bp, LANE), jnp.float32),
        grid=(Bp // TB,),
        in_specs=[
            pl.BlockSpec((TB, K), lambda i: (i, 0)),
            pl.BlockSpec((K, LANE), lambda i: (0, 0)),
            pl.BlockSpec((1, LANE), lambda i: (0, 0)),
            pl.BlockSpec((LANE, LANE), lambda i: (0, 0)),
            pl.BlockSpec((1, LANE), lambda i: (0, 0)),
        ],
        out_specs=pl.BlockSpec((TB, LANE), lambda i: (i, 0)),
        compiler_params=pltpu.CompilerParams(dimension_semantics=("parallel",)),
    )(x, w1_big, b1_big, w2_big, b2_big)

    return out[:B, :62]


# ------------------------------- parameters --------------------------------

def init_params(key):
    ks = jax.random.split(key, 8)

    def u(k, shape, fan_in):
        bound = 1.0 / jnp.sqrt(float(fan_in))
        return jax.random.uniform(k, shape, jnp.float32, -bound, bound)

    return {
        "conv1_w": u(ks[0], (30, 1, 3, 3), 1 * 9),
        "conv1_b": u(ks[1], (30,), 1 * 9),
        "conv2_w": u(ks[2], (5, 30, 3, 3), 30 * 9),
        "conv2_b": u(ks[3], (5,), 30 * 9),
        "fc1_w":   u(ks[4], (100, 7 * 7 * 5), 7 * 7 * 5),   # torch Linear: (out, in)
        "fc1_b":   u(ks[5], (100,), 7 * 7 * 5),
        "fc2_w":   u(ks[6], (62, 100), 100),
        "fc2_b":   u(ks[7], (62,), 100),
    }


def _prepare_fc_weights(params):
    """Repack fc1/fc2 so the fc kernel consumes the NHWC, channel-padded conv2
    activation directly ((B, 7*7*128) feature index = (h*7+w)*128 + c), matching
    torch's NCHW .view(-1, 245) flatten (index c*49 + h*7 + w)."""
    w1 = params["fc1_w"].reshape(100, 5, 7, 7)            # (n, c, h, w)
    w1 = jnp.transpose(w1, (2, 3, 1, 0)).reshape(49, 5, 100)   # (h*7+w, c, n)
    w1_big = jnp.zeros((49, LANE, LANE), jnp.float32).at[:, :5, :100].set(w1)
    w1_big = w1_big.reshape(49 * LANE, LANE).astype(jnp.bfloat16)
    b1_big = jnp.zeros((1, LANE), jnp.float32).at[0, :100].set(params["fc1_b"])
    w2_big = jnp.zeros((LANE, LANE), jnp.float32).at[:100, :62].set(params["fc2_w"].T)
    w2_big = w2_big.astype(jnp.bfloat16)
    b2_big = jnp.zeros((1, LANE), jnp.float32).at[0, :62].set(params["fc2_b"])
    return w1_big, b1_big, w2_big, b2_big


# -------------------------------- forward ----------------------------------

def emnist_cnn_forward(params, inputs):
    x = inputs.reshape(-1, 1, 28, 28)                    # NCHW, like torch .view
    x = jnp.transpose(x, (0, 2, 3, 1))                   # -> NHWC (B, 28, 28, 1)

    # conv1 + ReLU + pool1 (one fused Pallas call)
    y1 = conv3x3_relu_pool(x, params["conv1_w"], params["conv1_b"])      # (B,14,14,128)
    # conv2 + ReLU + pool2 (one fused Pallas call); feed only the 30 real channels
    y2 = conv3x3_relu_pool(y1[..., :30], params["conv2_w"], params["conv2_b"])  # (B,7,7,128)

    # fc1 + ReLU + fc2 (one fused Pallas call); padded channels are exactly zero,
    # and the fc1 weight was repacked to the NHWC/channel-padded feature order.
    w1_big, b1_big, w2_big, b2_big = _prepare_fc_weights(params)
    B = y2.shape[0]
    x_fc = y2.reshape(B, 7 * 7 * LANE)                   # pure reshape, no transpose
    return fc1_relu_fc2(x_fc, w1_big, b1_big, w2_big, b2_big)            # (B, 62)


if __name__ == "__main__":
    key = jax.random.PRNGKey(0)
    pkey, xkey = jax.random.split(key)
    params = init_params(pkey)

    batch = 2
    x = jax.random.normal(xkey, (batch, 1, 28, 28), jnp.float32)

    forward = jax.jit(emnist_cnn_forward)
    out = forward(params, x)
    out = jax.block_until_ready(out)

    assert out.shape == (batch, 62), out.shape
    assert bool(jnp.all(jnp.isfinite(out)))
    print("KERNEL_OK")
</pallas_src>

<mosaic_0001>
module attributes {stable_mosaic.version = 11 : i64} {
  func.func @_conv_pool_kernel(%arg0: i32, %arg1: memref<4x400x9xbf16, #tpu.memory_space<vmem>>, %arg2: memref<9x128xbf16, #tpu.memory_space<vmem>>, %arg3: memref<1x128xf32, #tpu.memory_space<vmem>>, %arg4: memref<400x128xbf16, #tpu.memory_space<vmem>>) attributes {dimension_semantics = [#tpu.dimension_semantics<parallel>], iteration_bounds = array<i64: 1>, scalar_prefetch = 0 : i64, scratch_operands = 0 : i64, tpu.core_type = #tpu.core_type<tc>, window_params = [{transform_indices = @transform_0, window_bounds = array<i64: 4, 400, 9>}, {pipeline_mode = #tpu.pipeline_mode<synchronous>, transform_indices = @transform_1, window_bounds = array<i64: 9, 128>}, {pipeline_mode = #tpu.pipeline_mode<synchronous>, transform_indices = @transform_2, window_bounds = array<i64: 1, 128>}, {transform_indices = @transform_3, window_bounds = array<i64: 400, 128>}]} {
    %c0 = arith.constant 0 : index
    %c0_0 = arith.constant 0 : index
    %0 = vector.load %arg2[%c0, %c0_0] : memref<9x128xbf16, #tpu.memory_space<vmem>>, vector<9x128xbf16>
    %c0_1 = arith.constant 0 : index
    %c0_2 = arith.constant 0 : index
    %c0_3 = arith.constant 0 : index
    %1 = vector.load %arg1[%c0_1, %c0_2, %c0_3] : memref<4x400x9xbf16, #tpu.memory_space<vmem>>, vector<1x400x9xbf16>
    %2 = vector.shape_cast %1 : vector<1x400x9xbf16> to vector<400x9xbf16>
    %cst = arith.constant dense<0.000000e+00> : vector<400x128xf32>
    %3 = tpu.matmul %2, %0, %cst {dimension_numbers = #tpu.dot_dimension_numbers<[1], [0], [0], [1], [0, 0, 1, 1], [], []>} : vector<400x9xbf16>, vector<9x128xbf16>, vector<400x128xf32> -> vector<400x128xf32>
    %c1 = arith.constant 1 : index
    %c0_4 = arith.constant 0 : index
    %c0_5 = arith.constant 0 : index
    %4 = vector.load %arg1[%c1, %c0_4, %c0_5] : memref<4x400x9xbf16, #tpu.memory_space<vmem>>, vector<1x400x9xbf16>
    %5 = vector.shape_cast %4 : vector<1x400x9xbf16> to vector<400x9xbf16>
    %cst_6 = arith.constant dense<0.000000e+00> : vector<400x128xf32>
    %6 = tpu.matmul %5, %0, %cst_6 {dimension_numbers = #tpu.dot_dimension_numbers<[1], [0], [0], [1], [0, 0, 1, 1], [], []>} : vector<400x9xbf16>, vector<9x128xbf16>, vector<400x128xf32> -> vector<400x128xf32>
    %c2 = arith.constant 2 : index
    %c0_7 = arith.constant 0 : index
    %c0_8 = arith.constant 0 : index
    %7 = vector.load %arg1[%c2, %c0_7, %c0_8] : memref<4x400x9xbf16, #tpu.memory_space<vmem>>, vector<1x400x9xbf16>
    %8 = vector.shape_cast %7 : vector<1x400x9xbf16> to vector<400x9xbf16>
    %cst_9 = arith.constant dense<0.000000e+00> : vector<400x128xf32>
    %9 = tpu.matmul %8, %0, %cst_9 {dimension_numbers = #tpu.dot_dimension_numbers<[1], [0], [0], [1], [0, 0, 1, 1], [], []>} : vector<400x9xbf16>, vector<9x128xbf16>, vector<400x128xf32> -> vector<400x128xf32>
    %c3 = arith.constant 3 : index
    %c0_10 = arith.constant 0 : index
    %c0_11 = arith.constant 0 : index
    %10 = vector.load %arg1[%c3, %c0_10, %c0_11] : memref<4x400x9xbf16, #tpu.memory_space<vmem>>, vector<1x400x9xbf16>
    %11 = vector.shape_cast %10 : vector<1x400x9xbf16> to vector<400x9xbf16>
    %cst_12 = arith.constant dense<0.000000e+00> : vector<400x128xf32>
    %12 = tpu.matmul %11, %0, %cst_12 {dimension_numbers = #tpu.dot_dimension_numbers<[1], [0], [0], [1], [0, 0, 1, 1], [], []>} : vector<400x9xbf16>, vector<9x128xbf16>, vector<400x128xf32> -> vector<400x128xf32>
    %13 = arith.maximumf %3, %6 : vector<400x128xf32>
    %14 = arith.maximumf %9, %12 : vector<400x128xf32>
    %15 = arith.maximumf %13, %14 : vector<400x128xf32>
    %c0_13 = arith.constant 0 : index
    %c0_14 = arith.constant 0 : index
    %16 = vector.load %arg3[%c0_13, %c0_14] : memref<1x128xf32, #tpu.memory_space<vmem>>, vector<1x128xf32>
    %17 = vector.broadcast %16 : vector<1x128xf32> to vector<400x128xf32>
    %18 = arith.addf %15, %17 : vector<400x128xf32>
    %cst_15 = arith.constant 0.000000e+00 : f32
    %19 = vector.broadcast %cst_15 : f32 to vector<400x128xf32>
    %20 = arith.maximumf %18, %19 : vector<400x128xf32>
    %21 = arith.truncf %20 : vector<400x128xf32> to vector<400x128xbf16>
    %c0_16 = arith.constant 0 : index
    %c0_17 = arith.constant 0 : index
    %22 = vector.load %arg4[%c0_16, %c0_17] : memref<400x128xbf16, #tpu.memory_space<vmem>>, vector<400x128xbf16>
    tpu.vector_store %arg4[%c0_16, %c0_17], %21 {strides = array<i32>} : memref<400x128xbf16, #tpu.memory_space<vmem>>, vector<400x128xbf16>,
    return
  }
  func.func @transform_0(%arg0: i32) -> (i32, i32, i32) {
    %c0_i32 = arith.constant 0 : i32
    %c0_i32_0 = arith.constant 0 : i32
    %c0_i32_1 = arith.constant 0 : i32
    return %c0_i32, %arg0, %c0_i32_0 : i32, i32, i32
  }
  func.func @transform_1(%arg0: i32) -> (i32, i32) {
    %c0_i32 = arith.constant 0 : i32
    %c0_i32_0 = arith.constant 0 : i32
    %c0_i32_1 = arith.constant 0 : i32
    return %c0_i32, %c0_i32_0 : i32, i32
  }
  func.func @transform_2(%arg0: i32) -> (i32, i32) {
    %c0_i32 = arith.constant 0 : i32
    %c0_i32_0 = arith.constant 0 : i32
    %c0_i32_1 = arith.constant 0 : i32
    return %c0_i32, %c0_i32_0 : i32, i32
  }
  func.func @transform_3(%arg0: i32) -> (i32, i32) {
    %c0_i32 = arith.constant 0 : i32
    %c0_i32_0 = arith.constant 0 : i32
    return %arg0, %c0_i32 : i32, i32
  }
}

module attributes {stable_mosaic.version = 11 : i64} {
  func.func @_conv_pool_kernel(%arg0: i32, %arg1: memref<4x112x270xbf16, #tpu.memory_space<vmem>>, %arg2: memref<270x128xbf16, #tpu.memory_space<vmem>>, %arg3: memref<1x128xf32, #tpu.memory_space<vmem>>, %arg4: memref<112x128xbf16, #tpu.memory_space<vmem>>) attributes {dimension_semantics = [#tpu.dimension_semantics<parallel>], iteration_bounds = array<i64: 1>, scalar_prefetch = 0 : i64, scratch_operands = 0 : i64, tpu.core_type = #tpu.core_type<tc>, window_params = [{transform_indices = @transform_0, window_bounds = array<i64: 4, 112, 270>}, {pipeline_mode = #tpu.pipeline_mode<synchronous>, transform_indices = @transform_1, window_bounds = array<i64: 270, 128>}, {pipeline_mode = #tpu.pipeline_mode<synchronous>, transform_indices = @transform_2, window_bounds = array<i64: 1, 128>}, {transform_indices = @transform_3, window_bounds = array<i64: 112, 128>}]} {
    %c0 = arith.constant 0 : index
    %c0_0 = arith.constant 0 : index
    %0 = vector.load %arg2[%c0, %c0_0] : memref<270x128xbf16, #tpu.memory_space<vmem>>, vector<270x128xbf16>
    %c0_1 = arith.constant 0 : index
    %c0_2 = arith.constant 0 : index
    %c0_3 = arith.constant 0 : index
    %1 = vector.load %arg1[%c0_1, %c0_2, %c0_3] : memref<4x112x270xbf16, #tpu.memory_space<vmem>>, vector<1x112x270xbf16>
    %2 = vector.shape_cast %1 : vector<1x112x270xbf16> to vector<112x270xbf16>
    %cst = arith.constant dense<0.000000e+00> : vector<112x128xf32>
    %3 = tpu.matmul %2, %0, %cst {dimension_numbers = #tpu.dot_dimension_numbers<[1], [0], [0], [1], [0, 0, 1, 1], [], []>} : vector<112x270xbf16>, vector<270x128xbf16>, vector<112x128xf32> -> vector<112x128xf32>
    %c1 = arith.constant 1 : index
    %c0_4 = arith.constant 0 : index
    %c0_5 = arith.constant 0 : index
    %4 = vector.load %arg1[%c1, %c0_4, %c0_5] : memref<4x112x270xbf16, #tpu.memory_space<vmem>>, vector<1x112x270xbf16>
    %5 = vector.shape_cast %4 : vector<1x112x270xbf16> to vector<112x270xbf16>
    %cst_6 = arith.constant dense<0.000000e+00> : vector<112x128xf32>
    %6 = tpu.matmul %5, %0, %cst_6 {dimension_numbers = #tpu.dot_dimension_numbers<[1], [0], [0], [1], [0, 0, 1, 1], [], []>} : vector<112x270xbf16>, vector<270x128xbf16>, vector<112x128xf32> -> vector<112x128xf32>
    %c2 = arith.constant 2 : index
    %c0_7 = arith.constant 0 : index
    %c0_8 = arith.constant 0 : index
    %7 = vector.load %arg1[%c2, %c0_7, %c0_8] : memref<4x112x270xbf16, #tpu.memory_space<vmem>>, vector<1x112x270xbf16>
    %8 = vector.shape_cast %7 : vector<1x112x270xbf16> to vector<112x270xbf16>
    %cst_9 = arith.constant dense<0.000000e+00> : vector<112x128xf32>
    %9 = tpu.matmul %8, %0, %cst_9 {dimension_numbers = #tpu.dot_dimension_numbers<[1], [0], [0], [1], [0, 0, 1, 1], [], []>} : vector<112x270xbf16>, vector<270x128xbf16>, vector<112x128xf32> -> vector<112x128xf32>
    %c3 = arith.constant 3 : index
    %c0_10 = arith.constant 0 : index
    %c0_11 = arith.constant 0 : index
    %10 = vector.load %arg1[%c3, %c0_10, %c0_11] : memref<4x112x270xbf16, #tpu.memory_space<vmem>>, vector<1x112x270xbf16>
    %11 = vector.shape_cast %10 : vector<1x112x270xbf16> to vector<112x270xbf16>
    %cst_12 = arith.constant dense<0.000000e+00> : vector<112x128xf32>
    %12 = tpu.matmul %11, %0, %cst_12 {dimension_numbers = #tpu.dot_dimension_numbers<[1], [0], [0], [1], [0, 0, 1, 1], [], []>} : vector<112x270xbf16>, vector<270x128xbf16>, vector<112x128xf32> -> vector<112x128xf32>
    %13 = arith.maximumf %3, %6 : vector<112x128xf32>
    %14 = arith.maximumf %9, %12 : vector<112x128xf32>
    %15 = arith.maximumf %13, %14 : vector<112x128xf32>
    %c0_13 = arith.constant 0 : index
    %c0_14 = arith.constant 0 : index
    %16 = vector.load %arg3[%c0_13, %c0_14] : memref<1x128xf32, #tpu.memory_space<vmem>>, vector<1x128xf32>
    %17 = vector.broadcast %16 : vector<1x128xf32> to vector<112x128xf32>
    %18 = arith.addf %15, %17 : vector<112x128xf32>
    %cst_15 = arith.constant 0.000000e+00 : f32
    %19 = vector.broadcast %cst_15 : f32 to vector<112x128xf32>
    %20 = arith.maximumf %18, %19 : vector<112x128xf32>
    %21 = arith.truncf %20 : vector<112x128xf32> to vector<112x128xbf16>
    %c0_16 = arith.constant 0 : index
    %c0_17 = arith.constant 0 : index
    %22 = vector.load %arg4[%c0_16, %c0_17] : memref<112x128xbf16, #tpu.memory_space<vmem>>, vector<112x128xbf16>
    tpu.vector_store %arg4[%c0_16, %c0_17], %21 {strides = array<i32>} : memref<112x128xbf16, #tpu.memory_space<vmem>>, vector<112x128xbf16>,
    return
  }
  func.func @transform_0(%arg0: i32) -> (i32, i32, i32) {
    %c0_i32 = arith.constant 0 : i32
    %c0_i32_0 = arith.constant 0 : i32
    %c0_i32_1 = arith.constant 0 : i32
    return %c0_i32, %arg0, %c0_i32_0 : i32, i32, i32
  }
  func.func @transform_1(%arg0: i32) -> (i32, i32) {
    %c0_i32 = arith.constant 0 : i32
    %c0_i32_0 = arith.constant 0 : i32
    %c0_i32_1 = arith.constant 0 : i32
    return %c0_i32, %c0_i32_0 : i32, i32
  }
  func.func @transform_2(%arg0: i32) -> (i32, i32) {
    %c0_i32 = arith.constant 0 : i32
    %c0_i32_0 = arith.constant 0 : i32
    %c0_i32_1 = arith.constant 0 : i32
    return %c0_i32, %c0_i32_0 : i32, i32
  }
  func.func @transform_3(%arg0: i32) -> (i32, i32) {
    %c0_i32 = arith.constant 0 : i32
    %c0_i32_0 = arith.constant 0 : i32
    return %arg0, %c0_i32 : i32, i32
  }
}

module attributes {stable_mosaic.version = 11 : i64} {
  func.func @_fc_fused_kernel(%arg0: i32, %arg1: memref<16x6272xbf16, #tpu.memory_space<vmem>>, %arg2: memref<6272x128xbf16, #tpu.memory_space<vmem>>, %arg3: memref<1x128xf32, #tpu.memory_space<vmem>>, %arg4: memref<128x128xbf16, #tpu.memory_space<vmem>>, %arg5: memref<1x128xf32, #tpu.memory_space<vmem>>, %arg6: memref<16x128xf32, #tpu.memory_space<vmem>>) attributes {dimension_semantics = [#tpu.dimension_semantics<parallel>], iteration_bounds = array<i64: 1>, scalar_prefetch = 0 : i64, scratch_operands = 0 : i64, tpu.core_type = #tpu.core_type<tc>, window_params = [{transform_indices = @transform_0, window_bounds = array<i64: 16, 6272>}, {pipeline_mode = #tpu.pipeline_mode<synchronous>, transform_indices = @transform_1, window_bounds = array<i64: 6272, 128>}, {pipeline_mode = #tpu.pipeline_mode<synchronous>, transform_indices = @transform_2, window_bounds = array<i64: 1, 128>}, {pipeline_mode = #tpu.pipeline_mode<synchronous>, transform_indices = @transform_3, window_bounds = array<i64: 128, 128>}, {pipeline_mode = #tpu.pipeline_mode<synchronous>, transform_indices = @transform_4, window_bounds = array<i64: 1, 128>}, {transform_indices = @transform_5, window_bounds = array<i64: 16, 128>}]} {
    %c0 = arith.constant 0 : index
    %c0_0 = arith.constant 0 : index
    %0 = vector.load %arg1[%c0, %c0_0] : memref<16x6272xbf16, #tpu.memory_space<vmem>>, vector<16x6272xbf16>
    %c0_1 = arith.constant 0 : index
    %c0_2 = arith.constant 0 : index
    %1 = vector.load %arg2[%c0_1, %c0_2] : memref<6272x128xbf16, #tpu.memory_space<vmem>>, vector<6272x128xbf16>
    %cst = arith.constant dense<0.000000e+00> : vector<16x128xf32>
    %2 = tpu.matmul %0, %1, %cst {dimension_numbers = #tpu.dot_dimension_numbers<[1], [0], [0], [1], [0, 0, 1, 1], [], []>} : vector<16x6272xbf16>, vector<6272x128xbf16>, vector<16x128xf32> -> vector<16x128xf32>
    %c0_3 = arith.constant 0 : index
    %c0_4 = arith.constant 0 : index
    %3 = vector.load %arg3[%c0_3, %c0_4] : memref<1x128xf32, #tpu.memory_space<vmem>>, vector<1x128xf32>
    %4 = vector.broadcast %3 : vector<1x128xf32> to vector<16x128xf32>
    %5 = arith.addf %2, %4 : vector<16x128xf32>
    %cst_5 = arith.constant 0.000000e+00 : f32
    %6 = vector.broadcast %cst_5 : f32 to vector<16x128xf32>
    %7 = arith.maximumf %5, %6 : vector<16x128xf32>
    %8 = arith.truncf %7 : vector<16x128xf32> to vector<16x128xbf16>
    %c0_6 = arith.constant 0 : index
    %c0_7 = arith.constant 0 : index
    %9 = vector.load %arg4[%c0_6, %c0_7] : memref<128x128xbf16, #tpu.memory_space<vmem>>, vector<128x128xbf16>
    %cst_8 = arith.constant dense<0.000000e+00> : vector<16x128xf32>
    %10 = tpu.matmul %8, %9, %cst_8 {dimension_numbers = #tpu.dot_dimension_numbers<[1], [0], [0], [1], [0, 0, 1, 1], [], []>} : vector<16x128xbf16>, vector<128x128xbf16>, vector<16x128xf32> -> vector<16x128xf32>
    %c0_9 = arith.constant 0 : index
    %c0_10 = arith.constant 0 : index
    %11 = vector.load %arg5[%c0_9, %c0_10] : memref<1x128xf32, #tpu.memory_space<vmem>>, vector<1x128xf32>
    %12 = vector.broadcast %11 : vector<1x128xf32> to vector<16x128xf32>
    %13 = arith.addf %10, %12 : vector<16x128xf32>
    %c0_11 = arith.constant 0 : index
    %c0_12 = arith.constant 0 : index
    %14 = vector.load %arg6[%c0_11, %c0_12] : memref<16x128xf32, #tpu.memory_space<vmem>>, vector<16x128xf32>
    tpu.vector_store %arg6[%c0_11, %c0_12], %13 {strides = array<i32>} : memref<16x128xf32, #tpu.memory_space<vmem>>, vector<16x128xf32>,
    return
  }
  func.func @transform_0(%arg0: i32) -> (i32, i32) {
    %c0_i32 = arith.constant 0 : i32
    %c0_i32_0 = arith.constant 0 : i32
    return %arg0, %c0_i32 : i32, i32
  }
  func.func @transform_1(%arg0: i32) -> (i32, i32) {
    %c0_i32 = arith.constant 0 : i32
    %c0_i32_0 = arith.constant 0 : i32
    %c0_i32_1 = arith.constant 0 : i32
    return %c0_i32, %c0_i32_0 : i32, i32
  }
  func.func @transform_2(%arg0: i32) -> (i32, i32) {
    %c0_i32 = arith.constant 0 : i32
    %c0_i32_0 = arith.constant 0 : i32
    %c0_i32_1 = arith.constant 0 : i32
    return %c0_i32, %c0_i32_0 : i32, i32
  }
  func.func @transform_3(%arg0: i32) -> (i32, i32) {
    %c0_i32 = arith.constant 0 : i32
    %c0_i32_0 = arith.constant 0 : i32
    %c0_i32_1 = arith.constant 0 : i32
    return %c0_i32, %c0_i32_0 : i32, i32
  }
  func.func @transform_4(%arg0: i32) -> (i32, i32) {
    %c0_i32 = arith.constant 0 : i32
    %c0_i32_0 = arith.constant 0 : i32
    %c0_i32_1 = arith.constant 0 : i32
    return %c0_i32, %c0_i32_0 : i32, i32
  }
  func.func @transform_5(%arg0: i32) -> (i32, i32) {
    %c0_i32 = arith.constant 0 : i32
    %c0_i32_0 = arith.constant 0 : i32
    return %arg0, %c0_i32 : i32, i32
  }
}

</mosaic_0001>

<bundles_post_ra>
// kernel: emnist_cnn_forward.3
= control target key start
LH: loop header
LB: loop body
LE: loop exit
PB: predicated region body
PF: predicated region fallthrough
CT: control target
= control target key end

     0   :  { %vm273_vm0 = vcmask 1043456   ;;  %vm274_vm1 = vcmask 1044480   ;;  %v4907_v0 = vmov 0.0   ;;  %v3694_v2 = vmov 65535   ;;  %s4903_s1 = inlined_call_operand.vmem [shape: bf16[9,128], index: 1, kind: input, shape index: {}]   ;;  %s4904_s0 = inlined_call_operand.vmem [shape: bf16[4,400,9], index: 0, kind: input, shape index: {}]   ;;  %s4905_s2 = inlined_call_operand.vmem [shape: f32[1,128], index: 2, kind: input, shape index: {}]   ;;  %s4906_s3 = inlined_call_operand.vmem [shape: bf16[400,128], index: 3, kind: output, shape index: {}]  }
   0x1   :  { %3181 = vmatprep.subr.bf16.mxu0 %v4907_v0  ;;  %3283 = vmatprep.subr.bf16.mxu1 %v4907_v0  ;;  %v3592_v1 = vld [vmem:[%s4903_s1] sm:$0x1f]   ;;  %v275_v3 = vsel %vm273_vm0, 4294967295, %v3694_v2  ;;  %vm3695_vm2 = vmmov 0   ;;  %v3594_v7 = vld [vmem:[%s4904_s0 + $0xc8] sm:$0xff]   ;;  %vm197_vm3 = vcmask 72704  }
   0x2   :  { %v276_v4 = vsel %vm274_vm1, %v275_v3, 0  ;;  %3183 = vmatprep.mubr.msk.bf16.mxu0 %vm3695_vm2, %v4907_v0  ;;  %3285 = vmatprep.mubr.msk.bf16.mxu1 %vm3695_vm2, %v4907_v0  ;;  %v3593_v5 = vld [vmem:[%s4904_s0] sm:$0xff]   ;;  %v3595_v8 = vld [vmem:[%s4904_s0 + $0x8] sm:$0xff]   ;;  %v3596_v9 = vld [vmem:[%s4904_s0 + $0xd0] sm:$0xff]  }
   0x3   :  { %v278_v6 = vand.u32 %v3592_v1, %v276_v4  ;;  %v3597_v10 = vld [vmem:[%s4904_s0 + $0x10] sm:$0xff]   ;;  %v3598_v11 = vld [vmem:[%s4904_s0 + $0xd8] sm:$0xff]   ;;  %v3600_v13 = vld [vmem:[%s4904_s0 + $0xe0] sm:$0xff]  }
   0x4   :  { %v3599_v12 = vld [vmem:[%s4904_s0 + $0x18] sm:$0xff]   ;;  %v3601_v14 = vld [vmem:[%s4904_s0 + $0x20] sm:$0xff]   ;;  %v3602_v15 = vld [vmem:[%s4904_s0 + $0xe8] sm:$0xff]  }
   0x5   :  { %3182 = vmatpush3.bf16.msra.mxu0 %v278_v6  ;;  %3284 = vmatpush3.bf16.msra.mxu1 %v278_v6  ;;  %v3603_v16 = vld [vmem:[%s4904_s0 + $0x28] sm:$0xff]   ;;  %v3604_v17 = vld [vmem:[%s4904_s0 + $0xf0] sm:$0xff]   ;;  %v3606_v19 = vld [vmem:[%s4904_s0 + $0xf8] sm:$0xff]  }
   0x6   :  { %3385 = vmatprep.subr.bf16.mxu0 %v4907_v0  ;;  %3487 = vmatprep.subr.bf16.mxu1 %v4907_v0  ;;  %v3605_v18 = vld [vmem:[%s4904_s0 + $0x30] sm:$0xff]   ;;  %v3607_v20 = vld [vmem:[%s4904_s0 + $0x38] sm:$0xff]   ;;  %v3608_v21 = vld [vmem:[%s4904_s0 + $0x100] sm:$0xff]  }
   0x7   :  { %v3609_v22 = vld [vmem:[%s4904_s0 + $0x40] sm:$0xff]   ;;  %v3610_v23 = vld [vmem:[%s4904_s0 + $0x108] sm:$0xff]   ;;  %v3612_v25 = vld [vmem:[%s4904_s0 + $0x110] sm:$0xff]  }
   0x8   :  { %3184 = vmatmul.mubr.msk.bf16.vlgmr.msra.gmra.mrb[0].mxu0 %vm197_vm3, %v3593_v5  ;;  %3286 = vmatmul.mubr.msk.bf16.vlgmr.msra.gmra.mrb[0].mxu1 %vm197_vm3, %v3594_v7  ;;  %v3611_v24 = vld [vmem:[%s4904_s0 + $0x48] sm:$0xff]   ;;  %v3613_v26 = vld [vmem:[%s4904_s0 + $0x50] sm:$0xff]   ;;  %v3614_v27 = vld [vmem:[%s4904_s0 + $0x118] sm:$0xff]  }
   0x9   :  { %3386 = vmatpush3.bf16.msra.mxu0 %v278_v6  ;;  %3488 = vmatpush3.bf16.msra.mxu1 %v278_v6  ;;  %v3615_v28 = vld [vmem:[%s4904_s0 + $0x58] sm:$0xff]   ;;  %v3616_v29 = vld [vmem:[%s4904_s0 + $0x120] sm:$0xff]   ;;  %v3618_v31 = vld [vmem:[%s4904_s0 + $0x128] sm:$0xff]  }
   0xa   :  { %3187 = vmatprep.mubr.msk.bf16.mxu0 %vm3695_vm2, %v4907_v0  ;;  %3289 = vmatprep.mubr.msk.bf16.mxu1 %vm3695_vm2, %v4907_v0  ;;  %v3617_v30 = vld [vmem:[%s4904_s0 + $0x60] sm:$0xff]   ;;  %v3619_v32 = vld [vmem:[%s4904_s0 + $0x68] sm:$0xff]   ;;  %v3620_v33 = vld [vmem:[%s4904_s0 + $0x130] sm:$0xff]  }
   0xb   :  { %v3621_v34 = vld [vmem:[%s4904_s0 + $0x70] sm:$0xff]   ;;  %v3622_v35 = vld [vmem:[%s4904_s0 + $0x138] sm:$0xff]   ;;  %v3624_v37 = vld [vmem:[%s4904_s0 + $0x140] sm:$0xff]  }
   0xc   :  { %v3623_v36 = vld [vmem:[%s4904_s0 + $0x78] sm:$0xff]   ;;  %v3625_v38 = vld [vmem:[%s4904_s0 + $0x80] sm:$0xff]   ;;  %v3626_v39 = vld [vmem:[%s4904_s0 + $0x148] sm:$0xff]  }
   0xd   :  { %v3627_v40 = vld [vmem:[%s4904_s0 + $0x88] sm:$0xff]   ;;  %v3628_v41 = vld [vmem:[%s4904_s0 + $0x150] sm:$0xff]   ;;  %v3630_v43 = vld [vmem:[%s4904_s0 + $0x158] sm:$0xff]  }
   0xe   :  { %v3629_v42 = vld [vmem:[%s4904_s0 + $0x90] sm:$0xff]   ;;  %v3631_v44 = vld [vmem:[%s4904_s0 + $0x98] sm:$0xff]   ;;  %v3632_v45 = vld [vmem:[%s4904_s0 + $0x160] sm:$0xff]  }
   0xf   :  { %v3633_v46 = vld [vmem:[%s4904_s0 + $0xa0] sm:$0xff]   ;;  %v3634_v47 = vld [vmem:[%s4904_s0 + $0x168] sm:$0xff]   ;;  %v3636_v49 = vld [vmem:[%s4904_s0 + $0x170] sm:$0xff]  }
  0x10   :  { %3188 = vmatmul.mubr.msk.bf16.gmra.mrb[4].mxu0 %vm197_vm3, %v3595_v8  ;;  %3290 = vmatmul.mubr.msk.bf16.gmra.mrb[4].mxu1 %vm197_vm3, %v3596_v9  ;;  %v3635_v48 = vld [vmem:[%s4904_s0 + $0xa8] sm:$0xff]   ;;  %v3637_v50 = vld [vmem:[%s4904_s0 + $0xb0] sm:$0xff]   ;;  %v3638_v51 = vld [vmem:[%s4904_s0 + $0x178] sm:$0xff]  }
  0x11   :  { %3191 = vmatprep.mubr.msk.bf16.mxu0 %vm3695_vm2, %v4907_v0  ;;  %3293 = vmatprep.mubr.msk.bf16.mxu1 %vm3695_vm2, %v4907_v0  ;;  %v3639_v52 = vld [vmem:[%s4904_s0 + $0xb8] sm:$0xff]   ;;  %v3640_v53 = vld [vmem:[%s4904_s0 + $0x180] sm:$0xff]   ;;  %v3642_v55 = vld [vmem:[%s4904_s0 + $0x188] sm:$0xff]  }
  0x12   :  { %v3641_v54 = vld [vmem:[%s4904_s0 + $0xc0] sm:$0xff]   ;;  %v3643_v56 = vld [vmem:[%s4904_s0 + $0x190] sm:$0xff]   ;;  %v3644_v57 = vld [vmem:[%s4904_s0 + $0x258] sm:$0xff]  }
  0x13   :  { %v3645_v58 = vld [vmem:[%s4904_s0 + $0x198] sm:$0xff]   ;;  %v3646_v59 = vld [vmem:[%s4904_s0 + $0x260] sm:$0xff]   ;;  %v3648_v3 = vld [vmem:[%s4904_s0 + $0x268] sm:$0xff]  }
  0x14   :  { %v3647_v2 = vld [vmem:[%s4904_s0 + $0x1a0] sm:$0xff]  }
  0x18   :  { %3192 = vmatmul.mubr.msk.bf16.gmra.mrb[8].mxu0 %vm197_vm3, %v3597_v10  ;;  %3294 = vmatmul.mubr.msk.bf16.gmra.mrb[8].mxu1 %vm197_vm3, %v3598_v11 }
  0x19   :  { %3195 = vmatprep.mubr.msk.bf16.mxu0 %vm3695_vm2, %v4907_v0  ;;  %3297 = vmatprep.mubr.msk.bf16.mxu1 %vm3695_vm2, %v4907_v0 }
  0x20   :  { %3196 = vmatmul.mubr.msk.bf16.gmra.mrb[12].mxu0 %vm197_vm3, %v3599_v12  ;;  %3298 = vmatmul.mubr.msk.bf16.gmra.mrb[12].mxu1 %vm197_vm3, %v3600_v13 }
  0x21   :  { %3199 = vmatprep.mubr.msk.bf16.mxu0 %vm3695_vm2, %v4907_v0  ;;  %3301 = vmatprep.mubr.msk.bf16.mxu1 %vm3695_vm2, %v4907_v0 }
  0x28   :  { %3200 = vmatmul.mubr.msk.bf16.gmra.mrb[16].mxu0 %vm197_vm3, %v3601_v14  ;;  %3302 = vmatmul.mubr.msk.bf16.gmra.mrb[16].mxu1 %vm197_vm3, %v3602_v15  ;;  %v3649_v14 = vld [vmem:[%s4904_s0 + $0x1a8] sm:$0xff]   ;;  %v3650_v15 = vld [vmem:[%s4904_s0 + $0x270] sm:$0xff]  }
  0x29   :  { %3203 = vmatprep.mubr.msk.bf16.mxu0 %vm3695_vm2, %v4907_v0  ;;  %3305 = vmatprep.mubr.msk.bf16.mxu1 %vm3695_vm2, %v4907_v0 }
  0x30   :  { %3204 = vmatmul.mubr.msk.bf16.gmra.mrb[20].mxu0 %vm197_vm3, %v3603_v16  ;;  %3306 = vmatmul.mubr.msk.bf16.gmra.mrb[20].mxu1 %vm197_vm3, %v3604_v17 }
  0x31   :  { %3207 = vmatprep.mubr.msk.bf16.mxu0 %vm3695_vm2, %v4907_v0  ;;  %3309 = vmatprep.mubr.msk.bf16.mxu1 %vm3695_vm2, %v4907_v0 }
  0x38   :  { %3208 = vmatmul.mubr.msk.bf16.gmra.mrb[24].mxu0 %vm197_vm3, %v3605_v18  ;;  %3310 = vmatmul.mubr.msk.bf16.gmra.mrb[24].mxu1 %vm197_vm3, %v3606_v19 }
  0x39   :  { %3211 = vmatprep.mubr.msk.bf16.mxu0 %vm3695_vm2, %v4907_v0  ;;  %3313 = vmatprep.mubr.msk.bf16.mxu1 %vm3695_vm2, %v4907_v0 }
  0x40   :  { %3212 = vmatmul.mubr.msk.bf16.gmra.mrb[28].mxu0 %vm197_vm3, %v3607_v20  ;;  %3314 = vmatmul.mubr.msk.bf16.gmra.mrb[28].mxu1 %vm197_vm3, %v3608_v21 }
  0x41   :  { %3215 = vmatprep.mubr.msk.bf16.mxu0 %vm3695_vm2, %v4907_v0  ;;  %3317 = vmatprep.mubr.msk.bf16.mxu1 %vm3695_vm2, %v4907_v0 }
  0x48   :  { %3216 = vmatmul.mubr.msk.bf16.gmra.mrb[32].mxu0 %vm197_vm3, %v3609_v22  ;;  %3318 = vmatmul.mubr.msk.bf16.gmra.mrb[32].mxu1 %vm197_vm3, %v3610_v23 }
  0x49   :  { %3219 = vmatprep.mubr.msk.bf16.mxu0 %vm3695_vm2, %v4907_v0  ;;  %3321 = vmatprep.mubr.msk.bf16.mxu1 %vm3695_vm2, %v4907_v0 }
  0x50   :  { %3220 = vmatmul.mubr.msk.bf16.gmra.mrb[36].mxu0 %vm197_vm3, %v3611_v24  ;;  %3322 = vmatmul.mubr.msk.bf16.gmra.mrb[36].mxu1 %vm197_vm3, %v3612_v25 }
  0x51   :  { %3223 = vmatprep.mubr.msk.bf16.mxu0 %vm3695_vm2, %v4907_v0  ;;  %3325 = vmatprep.mubr.msk.bf16.mxu1 %vm3695_vm2, %v4907_v0 }
  0x58   :  { %3224 = vmatmul.mubr.msk.bf16.gmra.mrb[40].mxu0 %vm197_vm3, %v3613_v26  ;;  %3326 = vmatmul.mubr.msk.bf16.gmra.mrb[40].mxu1 %vm197_vm3, %v3614_v27  ;;  %v3651_v26 = vld [vmem:[%s4904_s0 + $0x1b0] sm:$0xff]   ;;  %v3652_v27 = vld [vmem:[%s4904_s0 + $0x278] sm:$0xff]  }
  0x59   :  { %3227 = vmatprep.mubr.msk.bf16.mxu0 %vm3695_vm2, %v4907_v0  ;;  %3329 = vmatprep.mubr.msk.bf16.mxu1 %vm3695_vm2, %v4907_v0 }
  0x60   :  { %3228 = vmatmul.mubr.msk.bf16.gmra.mrb[44].mxu0 %vm197_vm3, %v3615_v28  ;;  %3330 = vmatmul.mubr.msk.bf16.gmra.mrb[44].mxu1 %vm197_vm3, %v3616_v29 }
  0x61   :  { %3231 = vmatprep.mubr.msk.bf16.mxu0 %vm3695_vm2, %v4907_v0  ;;  %3333 = vmatprep.mubr.msk.bf16.mxu1 %vm3695_vm2, %v4907_v0 }
  0x68   :  { %3232 = vmatmul.mubr.msk.bf16.gmra.mrb[48].mxu0 %vm197_vm3, %v3617_v30  ;;  %3334 = vmatmul.mubr.msk.bf16.gmra.mrb[48].mxu1 %vm197_vm3, %v3618_v31 }
  0x69   :  { %3235 = vmatprep.mubr.msk.bf16.mxu0 %vm3695_vm2, %v4907_v0  ;;  %3337 = vmatprep.mubr.msk.bf16.mxu1 %vm3695_vm2, %v4907_v0 }
  0x70   :  { %3236 = vmatmul.mubr.msk.bf16.gmra.mrb[52].mxu0 %vm197_vm3, %v3619_v32  ;;  %3338 = vmatmul.mubr.msk.bf16.gmra.mrb[52].mxu1 %vm197_vm3, %v3620_v33 }
  0x71   :  { %3239 = vmatprep.mubr.msk.bf16.mxu0 %vm3695_vm2, %v4907_v0  ;;  %3341 = vmatprep.mubr.msk.bf16.mxu1 %vm3695_vm2, %v4907_v0 }
  0x78   :  { %3240 = vmatmul.mubr.msk.bf16.gmra.mrb[56].mxu0 %vm197_vm3, %v3621_v34  ;;  %3342 = vmatmul.mubr.msk.bf16.gmra.mrb[56].mxu1 %vm197_vm3, %v3622_v35 }
  0x79   :  { %3243 = vmatprep.mubr.msk.bf16.mxu0 %vm3695_vm2, %v4907_v0  ;;  %3345 = vmatprep.mubr.msk.bf16.mxu1 %vm3695_vm2, %v4907_v0 }
  0x80   :  { %3244 = vmatmul.mubr.msk.bf16.gmra.mrb[60].mxu0 %vm197_vm3, %v3623_v36  ;;  %3346 = vmatmul.mubr.msk.bf16.gmra.mrb[60].mxu1 %vm197_vm3, %v3624_v37 }
  0x81   :  { %3247 = vmatprep.mubr.msk.bf16.mxu0 %vm3695_vm2, %v4907_v0  ;;  %3349 = vmatprep.mubr.msk.bf16.mxu1 %vm3695_vm2, %v4907_v0 }
  0x88   :  { %3248 = vmatmul.mubr.msk.bf16.gmra.mrb[64].mxu0 %vm197_vm3, %v3625_v38  ;;  %3350 = vmatmul.mubr.msk.bf16.gmra.mrb[64].mxu1 %vm197_vm3, %v3626_v39  ;;  %v3653_v38 = vld [vmem:[%s4904_s0 + $0x1b8] sm:$0xff]   ;;  %v3654_v39 = vld [vmem:[%s4904_s0 + $0x280] sm:$0xff]  }
  0x89   :  { %3251 = vmatprep.mubr.msk.bf16.mxu0 %vm3695_vm2, %v4907_v0  ;;  %3353 = vmatprep.mubr.msk.bf16.mxu1 %vm3695_vm2, %v4907_v0 }
  0x90   :  { %3252 = vmatmul.mubr.msk.bf16.gmra.mrb[68].mxu0 %vm197_vm3, %v3627_v40  ;;  %3354 = vmatmul.mubr.msk.bf16.gmra.mrb[68].mxu1 %vm197_vm3, %v3628_v41 }
  0x91   :  { %3255 = vmatprep.mubr.msk.bf16.mxu0 %vm3695_vm2, %v4907_v0  ;;  %3357 = vmatprep.mubr.msk.bf16.mxu1 %vm3695_vm2, %v4907_v0 }
  0x98   :  { %3256 = vmatmul.mubr.msk.bf16.gmra.mrb[72].mxu0 %vm197_vm3, %v3629_v42  ;;  %3358 = vmatmul.mubr.msk.bf16.gmra.mrb[72].mxu1 %vm197_vm3, %v3630_v43 }
  0x99   :  { %3259 = vmatprep.mubr.msk.bf16.mxu0 %vm3695_vm2, %v4907_v0  ;;  %3361 = vmatprep.mubr.msk.bf16.mxu1 %vm3695_vm2, %v4907_v0 }
  0xa0   :  { %3260 = vmatmul.mubr.msk.bf16.gmra.mrb[76].mxu0 %vm197_vm3, %v3631_v44  ;;  %3362 = vmatmul.mubr.msk.bf16.gmra.mrb[76].mxu1 %vm197_vm3, %v3632_v45 }
  0xa1   :  { %3263 = vmatprep.mubr.msk.bf16.mxu0 %vm3695_vm2, %v4907_v0  ;;  %3365 = vmatprep.mubr.msk.bf16.mxu1 %vm3695_vm2, %v4907_v0 }
  0xa8   :  { %3264 = vmatmul.mubr.msk.bf16.gmra.mrb[80].mxu0 %vm197_vm3, %v3633_v46  ;;  %3366 = vmatmul.mubr.msk.bf16.gmra.mrb[80].mxu1 %vm197_vm3, %v3634_v47 }
  0xa9   :  { %3267 = vmatprep.mubr.msk.bf16.mxu0 %vm3695_vm2, %v4907_v0  ;;  %3369 = vmatprep.mubr.msk.bf16.mxu1 %vm3695_vm2, %v4907_v0 }
  0xb0   :  { %3268 = vmatmul.mubr.msk.bf16.gmra.mrb[84].mxu0 %vm197_vm3, %v3635_v48  ;;  %3370 = vmatmul.mubr.msk.bf16.gmra.mrb[84].mxu1 %vm197_vm3, %v3636_v49 }
  0xb1   :  { %3271 = vmatprep.mubr.msk.bf16.mxu0 %vm3695_vm2, %v4907_v0  ;;  %3373 = vmatprep.mubr.msk.bf16.mxu1 %vm3695_vm2, %v4907_v0 }
  0xb8   :  { %3272 = vmatmul.mubr.msk.bf16.gmra.mrb[88].mxu0 %vm197_vm3, %v3637_v50  ;;  %3374 = vmatmul.mubr.msk.bf16.gmra.mrb[88].mxu1 %vm197_vm3, %v3638_v51  ;;  %v3655_v50 = vld [vmem:[%s4904_s0 + $0x1c0] sm:$0xff]   ;;  %v3656_v51 = vld [vmem:[%s4904_s0 + $0x288] sm:$0xff]  }
  0xb9   :  { %3275 = vmatprep.mubr.msk.bf16.mxu0 %vm3695_vm2, %v4907_v0  ;;  %3377 = vmatprep.mubr.msk.bf16.mxu1 %vm3695_vm2, %v4907_v0 }
  0xc0   :  { %3276 = vmatmul.mubr.msk.bf16.gmra.mrb[92].mxu0 %vm197_vm3, %v3639_v52  ;;  %3378 = vmatmul.mubr.msk.bf16.gmra.mrb[92].mxu1 %vm197_vm3, %v3640_v53 }
  0xc1   :  { %3279 = vmatprep.mubr.msk.bf16.mxu0 %vm3695_vm2, %v4907_v0  ;;  %3381 = vmatprep.mubr.msk.bf16.mxu1 %vm3695_vm2, %v4907_v0 }
  0xc8   :  { %3280 = vmatmul.mubr.msk.bf16.gmra.mrb[96].mxu0 %vm197_vm3, %v3641_v54  ;;  %3382 = vmatmul.mubr.msk.bf16.gmra.mrb[96].mxu1 %vm197_vm3, %v3642_v55 }
  0xc9   :  { %3387 = vmatprep.mubr.msk.bf16.mxu0 %vm3695_vm2, %v4907_v0  ;;  %3489 = vmatprep.mubr.msk.bf16.mxu1 %vm3695_vm2, %v4907_v0 }
  0xd0   :  { %3388 = vmatmul.mubr.msk.bf16.vlgmr.msra.gmra.mrb[100].mxu0 %vm197_vm3, %v3643_v56  ;;  %3490 = vmatmul.mubr.msk.bf16.vlgmr.msra.gmra.mrb[100].mxu1 %vm197_vm3, %v3644_v57 }
  0xd1   :  { %3391 = vmatprep.mubr.msk.bf16.mxu0 %vm3695_vm2, %v4907_v0  ;;  %3493 = vmatprep.mubr.msk.bf16.mxu1 %vm3695_vm2, %v4907_v0 }
  0xd8   :  { %3392 = vmatmul.mubr.msk.bf16.gmra.mrb[104].mxu0 %vm197_vm3, %v3645_v58  ;;  %3494 = vmatmul.mubr.msk.bf16.gmra.mrb[104].mxu1 %vm197_vm3, %v3646_v59 }
  0xd9   :  { %3395 = vmatprep.mubr.msk.bf16.mxu0 %vm3695_vm2, %v4907_v0  ;;  %3497 = vmatprep.mubr.msk.bf16.mxu1 %vm3695_vm2, %v4907_v0 }
  0xdb   :  { %v4051_v60 = vpop.f32.mrb[0].mxu0  ;;  %v4053_v61 = vpop.f32.mrb[0].mxu1 }
  0xdc   :  { %v3185_v63 = vpop.f32.mrb[1].mxu0  ;;  %v3287_v1 = vpop.f32.mrb[1].mxu1 }
  0xdd   :  { %v4063_v4 = vpop.f32.mrb[2].mxu0  ;;  %v4065_v5 = vpop.f32.mrb[2].mxu1 }
  0xde   :  { %v3186_v7 = vpop.f32.mrb[3].mxu0  ;;  %v3288_v8 = vpop.f32.mrb[3].mxu1 }
  0xe0   :  { %3396 = vmatmul.mubr.msk.bf16.gmra.mrb[108].mxu0 %vm197_vm3, %v3647_v2  ;;  %3498 = vmatmul.mubr.msk.bf16.gmra.mrb[108].mxu1 %vm197_vm3, %v3648_v3  ;;  %v3657_v2 = vld [vmem:[%s4904_s0 + $0x1c8] sm:$0xff]   ;;  %v3658_v3 = vld [vmem:[%s4904_s0 + $0x290] sm:$0xff]  }
  0xe1   :  { %3399 = vmatprep.mubr.msk.bf16.mxu0 %vm3695_vm2, %v4907_v0  ;;  %3501 = vmatprep.mubr.msk.bf16.mxu1 %vm3695_vm2, %v4907_v0 }
  0xe3   :  { %v4075_v9 = vpop.f32.mrb[4].mxu0  ;;  %v4077_v10 = vpop.f32.mrb[4].mxu1 }
  0xe4   :  { %v3189_v12 = vpop.f32.mrb[5].mxu0  ;;  %v3291_v13 = vpop.f32.mrb[5].mxu1 }
  0xe5   :  { %v4087_v16 = vpop.f32.mrb[6].mxu0  ;;  %v4089_v17 = vpop.f32.mrb[6].mxu1 }
  0xe6   :  { %v3190_v19 = vpop.f32.mrb[7].mxu0  ;;  %v3292_v20 = vpop.f32.mrb[7].mxu1 }
  0xe8   :  { %3400 = vmatmul.mubr.msk.bf16.gmra.mrb[112].mxu0 %vm197_vm3, %v3649_v14  ;;  %3502 = vmatmul.mubr.msk.bf16.gmra.mrb[112].mxu1 %vm197_vm3, %v3650_v15 }
  0xe9   :  { %3403 = vmatprep.mubr.msk.bf16.mxu0 %vm3695_vm2, %v4907_v0  ;;  %3505 = vmatprep.mubr.msk.bf16.mxu1 %vm3695_vm2, %v4907_v0 }
  0xeb   :  { %v4099_v21 = vpop.f32.mrb[8].mxu0  ;;  %v4101_v22 = vpop.f32.mrb[8].mxu1 }
  0xec   :  { %v3193_v24 = vpop.f32.mrb[9].mxu0  ;;  %v3295_v25 = vpop.f32.mrb[9].mxu1 }
  0xed   :  { %v4111_v28 = vpop.f32.mrb[10].mxu0  ;;  %v4113_v29 = vpop.f32.mrb[10].mxu1 }
  0xee   :  { %v3194_v31 = vpop.f32.mrb[11].mxu0  ;;  %v3296_v32 = vpop.f32.mrb[11].mxu1 }
  0xf0   :  { %3404 = vmatmul.mubr.msk.bf16.gmra.mrb[116].mxu0 %vm197_vm3, %v3651_v26  ;;  %3506 = vmatmul.mubr.msk.bf16.gmra.mrb[116].mxu1 %vm197_vm3, %v3652_v27  ;;  %v3659_v26 = vld [vmem:[%s4904_s0 + $0x1d0] sm:$0xff]   ;;  %v3660_v27 = vld [vmem:[%s4904_s0 + $0x298] sm:$0xff]  }
  0xf1   :  { %3407 = vmatprep.mubr.msk.bf16.mxu0 %vm3695_vm2, %v4907_v0  ;;  %3509 = vmatprep.mubr.msk.bf16.mxu1 %vm3695_vm2, %v4907_v0 }
  0xf3   :  { %v4123_v33 = vpop.f32.mrb[12].mxu0  ;;  %v4125_v34 = vpop.f32.mrb[12].mxu1 }
  0xf4   :  { %v3197_v36 = vpop.f32.mrb[13].mxu0  ;;  %v3299_v37 = vpop.f32.mrb[13].mxu1 }
  0xf5   :  { %v4135_v40 = vpop.f32.mrb[14].mxu0  ;;  %v4137_v41 = vpop.f32.mrb[14].mxu1 }
  0xf6   :  { %v3198_v43 = vpop.f32.mrb[15].mxu0  ;;  %v3300_v44 = vpop.f32.mrb[15].mxu1 }
  0xf8   :  { %3408 = vmatmul.mubr.msk.bf16.gmra.mrb[120].mxu0 %vm197_vm3, %v3653_v38  ;;  %3510 = vmatmul.mubr.msk.bf16.gmra.mrb[120].mxu1 %vm197_vm3, %v3654_v39 }
  0xf9   :  { %3411 = vmatprep.mubr.msk.bf16.mxu0 %vm3695_vm2, %v4907_v0  ;;  %3513 = vmatprep.mubr.msk.bf16.mxu1 %vm3695_vm2, %v4907_v0 }
  0xfb   :  { %v4147_v45 = vpop.f32.mrb[16].mxu0  ;;  %v4149_v46 = vpop.f32.mrb[16].mxu1 }
  0xfc   :  { %v3201_v48 = vpop.f32.mrb[17].mxu0  ;;  %v3303_v49 = vpop.f32.mrb[17].mxu1 }
  0xfd   :  { %v4159_v52 = vpop.f32.mrb[18].mxu0  ;;  %v4161_v53 = vpop.f32.mrb[18].mxu1 }
  0xfe   :  { %v3202_v55 = vpop.f32.mrb[19].mxu0  ;;  %v3304_v56 = vpop.f32.mrb[19].mxu1 }
 0x100   :  { %3412 = vmatmul.mubr.msk.bf16.gmra.mrb[124].mxu0 %vm197_vm3, %v3655_v50  ;;  %3514 = vmatmul.mubr.msk.bf16.gmra.mrb[124].mxu1 %vm197_vm3, %v3656_v51  ;;  %v3661_v50 = vld [vmem:[%s4904_s0 + $0x1d8] sm:$0xff]   ;;  %v3662_v51 = vld [vmem:[%s4904_s0 + $0x2a0] sm:$0xff]  }
 0x101   :  { %3415 = vmatprep.mubr.msk.bf16.mxu0 %vm3695_vm2, %v4907_v0  ;;  %3517 = vmatprep.mubr.msk.bf16.mxu1 %vm3695_vm2, %v4907_v0 }
 0x103   :  { %v4171_v57 = vpop.f32.mrb[20].mxu0  ;;  %v4173_v58 = vpop.f32.mrb[20].mxu1 }
 0x104   :  { %v3205_v63 = vpop.f32.mrb[21].mxu0  ;;  %v3307_v1 = vpop.f32.mrb[21].mxu1 }
 0x105   :  { %v4183_v7 = vpop.f32.mrb[22].mxu0  ;;  %v4185_v8 = vpop.f32.mrb[22].mxu1 }
 0x106   :  { %v3206_v13 = vpop.f32.mrb[23].mxu0  ;;  %v3308_v14 = vpop.f32.mrb[23].mxu1 }
 0x108   :  { %3416 = vmatmul.mubr.msk.bf16.gmra.mrb[128].mxu0 %vm197_vm3, %v3657_v2  ;;  %3518 = vmatmul.mubr.msk.bf16.gmra.mrb[128].mxu1 %vm197_vm3, %v3658_v3 }
 0x109   :  { %3419 = vmatprep.mubr.msk.bf16.mxu0 %vm3695_vm2, %v4907_v0  ;;  %3521 = vmatprep.mubr.msk.bf16.mxu1 %vm3695_vm2, %v4907_v0 }
 0x10b   :  { %v4195_v15 = vpop.f32.mrb[24].mxu0  ;;  %v4197_v19 = vpop.f32.mrb[24].mxu1 }
 0x10c   :  { %v3209_v24 = vpop.f32.mrb[25].mxu0  ;;  %v3311_v25 = vpop.f32.mrb[25].mxu1 }
 0x10d   :  { %v4207_v31 = vpop.f32.mrb[26].mxu0  ;;  %v4209_v32 = vpop.f32.mrb[26].mxu1 }
 0x10e   :  { %v3210_v37 = vpop.f32.mrb[27].mxu0  ;;  %v3312_v38 = vpop.f32.mrb[27].mxu1 }
 0x110   :  { %3420 = vmatmul.mubr.msk.bf16.gmra.mrb[132].mxu0 %vm197_vm3, %v3659_v26  ;;  %3522 = vmatmul.mubr.msk.bf16.gmra.mrb[132].mxu1 %vm197_vm3, %v3660_v27  ;;  %v3663_v26 = vld [vmem:[%s4904_s0 + $0x1e0] sm:$0xff]   ;;  %v3664_v27 = vld [vmem:[%s4904_s0 + $0x2a8] sm:$0xff]  }
 0x111   :  { %3423 = vmatprep.mubr.msk.bf16.mxu0 %vm3695_vm2, %v4907_v0  ;;  %3525 = vmatprep.mubr.msk.bf16.mxu1 %vm3695_vm2, %v4907_v0 }
 0x113   :  { %v4219_v39 = vpop.f32.mrb[28].mxu0  ;;  %v4221_v43 = vpop.f32.mrb[28].mxu1 }
 0x114   :  { %v3213_v48 = vpop.f32.mrb[29].mxu0  ;;  %v3315_v49 = vpop.f32.mrb[29].mxu1 }
 0x115   :  { %v4231_v55 = vpop.f32.mrb[30].mxu0  ;;  %v4233_v56 = vpop.f32.mrb[30].mxu1 }
 0x116   :  { %v3214_v1 = vpop.f32.mrb[31].mxu0  ;;  %v3316_v2 = vpop.f32.mrb[31].mxu1 }
 0x118   :  { %3424 = vmatmul.mubr.msk.bf16.gmra.mrb[136].mxu0 %vm197_vm3, %v3661_v50  ;;  %3526 = vmatmul.mubr.msk.bf16.gmra.mrb[136].mxu1 %vm197_vm3, %v3662_v51 }
 0x119   :  { %3427 = vmatprep.mubr.msk.bf16.mxu0 %vm3695_vm2, %v4907_v0  ;;  %3529 = vmatprep.mubr.msk.bf16.mxu1 %vm3695_vm2, %v4907_v0 }
 0x11b   :  { %v4243_v3 = vpop.f32.mrb[32].mxu0  ;;  %v4245_v13 = vpop.f32.mrb[32].mxu1 }
 0x11c   :  { %v3217_v24 = vpop.f32.mrb[33].mxu0  ;;  %v3319_v25 = vpop.f32.mrb[33].mxu1 }
 0x11d   :  { %v4255_v37 = vpop.f32.mrb[34].mxu0  ;;  %v4257_v38 = vpop.f32.mrb[34].mxu1 }
 0x11e   :  { %v3218_v49 = vpop.f32.mrb[35].mxu0  ;;  %v3320_v50 = vpop.f32.mrb[35].mxu1 }
 0x120   :  { %3428 = vmatmul.mubr.msk.bf16.gmra.mrb[140].mxu0 %vm197_vm3, %v3663_v26  ;;  %3530 = vmatmul.mubr.msk.bf16.gmra.mrb[140].mxu1 %vm197_vm3, %v3664_v27  ;;  %v3665_v26 = vld [vmem:[%s4904_s0 + $0x1e8] sm:$0xff]   ;;  %v3666_v27 = vld [vmem:[%s4904_s0 + $0x2b0] sm:$0xff]  }
 0x121   :  { %3431 = vmatprep.mubr.msk.bf16.mxu0 %vm3695_vm2, %v4907_v0  ;;  %3533 = vmatprep.mubr.msk.bf16.mxu1 %vm3695_vm2, %v4907_v0 }
 0x123   :  { %v4267_v51 = vpop.f32.mrb[36].mxu0  ;;  %v4269_v1 = vpop.f32.mrb[36].mxu1 }
 0x124   :  { %v3221_v24 = vpop.f32.mrb[37].mxu0  ;;  %v3323_v25 = vpop.f32.mrb[37].mxu1 }
 0x125   :  { %v4279_v49 = vpop.f32.mrb[38].mxu0  ;;  %v4281_v50 = vpop.f32.mrb[38].mxu1 }
 0x126   :  { %v3222_v14 = vpop.f32.mrb[39].mxu0  ;;  %v3324_v63 = vpop.f32.mrb[39].mxu1 }
 0x127   :  { %v3667_v63 = vld [vmem:[%s4904_s0 + $0x1f0] sm:$0xff]  }
 0x128   :  { %3432 = vmatmul.mubr.msk.bf16.gmra.mrb[144].mxu0 %vm197_vm3, %v3665_v26  ;;  %3534 = vmatmul.mubr.msk.bf16.gmra.mrb[144].mxu1 %vm197_vm3, %v3666_v27  ;;  %v3668_v26 = vld [vmem:[%s4904_s0 + $0x2b8] sm:$0xff]  }
 0x129   :  { %3435 = vmatprep.mubr.msk.bf16.mxu0 %vm3695_vm2, %v4907_v0  ;;  %3537 = vmatprep.mubr.msk.bf16.mxu1 %vm3695_vm2, %v4907_v0 }
 0x12b   :  { %v4291_v24 = vpop.f32.mrb[40].mxu0  ;;  %v4293_v25 = vpop.f32.mrb[40].mxu1 }
 0x12c   :  { %v3225_v48 = vpop.f32.mrb[41].mxu0  ;;  %v3327_v14 = vpop.f32.mrb[41].mxu1 }
 0x12d   :  { %v4303_v27 = vpop.f32.mrb[42].mxu0  ;;  %v4305_v44 = vpop.f32.mrb[42].mxu1 }
 0x12e   :  { %v3226_v20 = vpop.f32.mrb[43].mxu0  ;;  %v3328_v12 = vpop.f32.mrb[43].mxu1 }
 0x12f   :  { %v3669_v12 = vld [vmem:[%s4904_s0 + $0x1f8] sm:$0xff]  }
 0x130   :  { %3436 = vmatmul.mubr.msk.bf16.gmra.mrb[148].mxu0 %vm197_vm3, %v3667_v63  ;;  %3538 = vmatmul.mubr.msk.bf16.gmra.mrb[148].mxu1 %vm197_vm3, %v3668_v26  ;;  %v3670_v63 = vld [vmem:[%s4904_s0 + $0x2c0] sm:$0xff]  }
 0x131   :  { %3439 = vmatprep.mubr.msk.bf16.mxu0 %vm3695_vm2, %v4907_v0  ;;  %3541 = vmatprep.mubr.msk.bf16.mxu1 %vm3695_vm2, %v4907_v0 }
 0x133   :  { %v4315_v48 = vpop.f32.mrb[44].mxu0  ;;  %v4317_v14 = vpop.f32.mrb[44].mxu1 }
 0x134   :  { %4965 = vst [vmem:[#allocation2_spill] sm:$0xff] %v4315_v48  ;;  %4966 = vst [vmem:[#allocation3_spill] sm:$0xff] %v4317_v14  ;;  %v3229_v36 = vpop.f32.mrb[45].mxu0  ;;  %v3331_v20 = vpop.f32.mrb[45].mxu1 }
 0x135   :  { %v4327_v26 = vpop.f32.mrb[46].mxu0  ;;  %v4329_v59 = vpop.f32.mrb[46].mxu1 }
 0x136   :  { %4967 = vst [vmem:[#allocation4_spill] sm:$0xff] %v4327_v26  ;;  %4968 = vst [vmem:[#allocation5_spill] sm:$0xff] %v4329_v59  ;;  %v3230_v47 = vpop.f32.mrb[47].mxu0  ;;  %v3332_v42 = vpop.f32.mrb[47].mxu1 }
 0x137   :  { %v3671_v42 = vld [vmem:[%s4904_s0 + $0x200] sm:$0xff]  }
 0x138   :  { %3440 = vmatmul.mubr.msk.bf16.gmra.mrb[152].mxu0 %vm197_vm3, %v3669_v12  ;;  %3542 = vmatmul.mubr.msk.bf16.gmra.mrb[152].mxu1 %vm197_vm3, %v3670_v63  ;;  %v3672_v12 = vld [vmem:[%s4904_s0 + $0x2c8] sm:$0xff]  }
 0x139   :  { %3443 = vmatprep.mubr.msk.bf16.mxu0 %vm3695_vm2, %v4907_v0  ;;  %3545 = vmatprep.mubr.msk.bf16.mxu1 %vm3695_vm2, %v4907_v0 }
 0x13b   :  { %v4339_v36 = vpop.f32.mrb[48].mxu0  ;;  %v4341_v20 = vpop.f32.mrb[48].mxu1 }
 0x13c   :  { %4969 = vst [vmem:[#allocation6_spill] sm:$0xff] %v4339_v36  ;;  %4970 = vst [vmem:[#allocation7_spill] sm:$0xff] %v4341_v20  ;;  %v3233_v54 = vpop.f32.mrb[49].mxu0  ;;  %v3335_v47 = vpop.f32.mrb[49].mxu1 }
 0x13d   :  { %v4351_v63 = vpop.f32.mrb[50].mxu0  ;;  %v4353_v35 = vpop.f32.mrb[50].mxu1 }
 0x13e   :  { %4971 = vst [vmem:[#allocation8_spill] sm:$0xff] %v4351_v63  ;;  %4972 = vst [vmem:[#allocation9_spill] sm:$0xff] %v4353_v35  ;;  %v3234_v23 = vpop.f32.mrb[51].mxu0  ;;  %v3336_v18 = vpop.f32.mrb[51].mxu1 }
 0x13f   :  { %v3673_v18 = vld [vmem:[%s4904_s0 + $0x208] sm:$0xff]  }
 0x140   :  { %3444 = vmatmul.mubr.msk.bf16.gmra.mrb[156].mxu0 %vm197_vm3, %v3671_v42  ;;  %3546 = vmatmul.mubr.msk.bf16.gmra.mrb[156].mxu1 %vm197_vm3, %v3672_v12  ;;  %v3674_v42 = vld [vmem:[%s4904_s0 + $0x2d0] sm:$0xff]  }
 0x141   :  { %3447 = vmatprep.mubr.msk.bf16.mxu0 %vm3695_vm2, %v4907_v0  ;;  %3549 = vmatprep.mubr.msk.bf16.mxu1 %vm3695_vm2, %v4907_v0 }
 0x143   :  { %v4363_v54 = vpop.f32.mrb[52].mxu0  ;;  %v4365_v47 = vpop.f32.mrb[52].mxu1 }
 0x144   :  { %4973 = vst [vmem:[#allocation10_spill] sm:$0xff] %v4363_v54  ;;  %4974 = vst [vmem:[#allocation11_spill] sm:$0xff] %v4365_v47  ;;  %v3237_v30 = vpop.f32.mrb[53].mxu0  ;;  %v3339_v23 = vpop.f32.mrb[53].mxu1 }
 0x145   :  { %v4375_v12 = vpop.f32.mrb[54].mxu0  ;;  %v4377_v11 = vpop.f32.mrb[54].mxu1  ;;  %v4977_v30 = vmov 0.0  }
 0x146   :  { %4975 = vst [vmem:[#allocation12_spill] sm:$0xff] %v4375_v12  ;;  %4976 = vst [vmem:[#allocation13_spill] sm:$0xff] %v4377_v11  ;;  %v3238_v62 = vpop.f32.mrb[55].mxu0  ;;  %v3340_v0 = vpop.f32.mrb[55].mxu1 }
 0x147   :  { %v3675_v0 = vld [vmem:[%s4904_s0 + $0x210] sm:$0xff]  }
 0x148   :  { %3448 = vmatmul.mubr.msk.bf16.gmra.mrb[160].mxu0 %vm197_vm3, %v3673_v18  ;;  %3550 = vmatmul.mubr.msk.bf16.gmra.mrb[160].mxu1 %vm197_vm3, %v3674_v42  ;;  %v3676_v18 = vld [vmem:[%s4904_s0 + $0x2d8] sm:$0xff]  }
 0x149   :  { %3451 = vmatprep.mubr.msk.bf16.mxu0 %vm3695_vm2, %v4977_v30  ;;  %3553 = vmatprep.mubr.msk.bf16.mxu1 %vm3695_vm2, %v4977_v30 }
 0x14b   :  { %v4387_v23 = vpop.f32.mrb[56].mxu0  ;;  %v4389_v2 = vpop.f32.mrb[56].mxu1 }
 0x14c   :  { %4978 = vst [vmem:[#allocation14_spill] sm:$0xff] %v4387_v23  ;;  %4979 = vst [vmem:[#allocation15_spill] sm:$0xff] %v4389_v2  ;;  %v3241_v6 = vpop.f32.mrb[57].mxu0  ;;  %v3343_v62 = vpop.f32.mrb[57].mxu1 }
 0x14d   :  { %v4399_v42 = vpop.f32.mrb[58].mxu0  ;;  %v4401_v11 = vpop.f32.mrb[58].mxu1 }
 0x14e   :  { %4980 = vst [vmem:[#allocation16_spill] sm:$0xff] %v4399_v42  ;;  %4981 = vst [vmem:[#allocation17_spill] sm:$0xff] %v4401_v11  ;;  %v3242_v54 = vpop.f32.mrb[59].mxu0  ;;  %v3344_v35 = vpop.f32.mrb[59].mxu1 }
 0x14f   :  { %v3677_v35 = vld [vmem:[%s4904_s0 + $0x218] sm:$0xff]  }
 0x150   :  { %3452 = vmatmul.mubr.msk.bf16.gmra.mrb[164].mxu0 %vm197_vm3, %v3675_v0  ;;  %3554 = vmatmul.mubr.msk.bf16.gmra.mrb[164].mxu1 %vm197_vm3, %v3676_v18  ;;  %v3678_v0 = vld [vmem:[%s4904_s0 + $0x2e0] sm:$0xff]  }
 0x151   :  { %3455 = vmatprep.mubr.msk.bf16.mxu0 %vm3695_vm2, %v4977_v30  ;;  %3557 = vmatprep.mubr.msk.bf16.mxu1 %vm3695_vm2, %v4977_v30 }
 0x153   :  { %v4411_v6 = vpop.f32.mrb[60].mxu0  ;;  %v4413_v62 = vpop.f32.mrb[60].mxu1 }
 0x154   :  { %4982 = vst [vmem:[#allocation18_spill] sm:$0xff] %v4411_v6  ;;  %4983 = vst [vmem:[#allocation19_spill] sm:$0xff] %v4413_v62  ;;  %v3245_v12 = vpop.f32.mrb[61].mxu0  ;;  %v3347_v54 = vpop.f32.mrb[61].mxu1 }
 0x155   :  { %v4423_v18 = vpop.f32.mrb[62].mxu0  ;;  %v4425_v11 = vpop.f32.mrb[62].mxu1 }
 0x156   :  { %4984 = vst [vmem:[#allocation20_spill] sm:$0xff] %v4423_v18  ;;  %4985 = vst [vmem:[#allocation21_spill] sm:$0xff] %v4425_v11  ;;  %v3246_v2 = vpop.f32.mrb[63].mxu0  ;;  %v3348_v23 = vpop.f32.mrb[63].mxu1 }
 0x157   :  { %v3679_v23 = vld [vmem:[%s4904_s0 + $0x220] sm:$0xff]  }
 0x158   :  { %3456 = vmatmul.mubr.msk.bf16.gmra.mrb[168].mxu0 %vm197_vm3, %v3677_v35  ;;  %3558 = vmatmul.mubr.msk.bf16.gmra.mrb[168].mxu1 %vm197_vm3, %v3678_v0  ;;  %v3680_v35 = vld [vmem:[%s4904_s0 + $0x2e8] sm:$0xff]  }
 0x159   :  { %3459 = vmatprep.mubr.msk.bf16.mxu0 %vm3695_vm2, %v4977_v30  ;;  %3561 = vmatprep.mubr.msk.bf16.mxu1 %vm3695_vm2, %v4977_v30 }
 0x15b   :  { %v4435_v12 = vpop.f32.mrb[64].mxu0  ;;  %v4437_v54 = vpop.f32.mrb[64].mxu1 }
 0x15c   :  { %4986 = vst [vmem:[#allocation22_spill] sm:$0xff] %v4435_v12  ;;  %4987 = vst [vmem:[#allocation23_spill] sm:$0xff] %v4437_v54  ;;  %v3249_v42 = vpop.f32.mrb[65].mxu0  ;;  %v3351_v2 = vpop.f32.mrb[65].mxu1 }
 0x15d   :  { %v4447_v0 = vpop.f32.mrb[66].mxu0  ;;  %v4449_v11 = vpop.f32.mrb[66].mxu1 }
 0x15e   :  { %4988 = vst [vmem:[#allocation24_spill] sm:$0xff] %v4447_v0  ;;  %4989 = vst [vmem:[#allocation25_spill] sm:$0xff] %v4449_v11  ;;  %v3250_v62 = vpop.f32.mrb[67].mxu0  ;;  %v3352_v6 = vpop.f32.mrb[67].mxu1 }
 0x15f   :  { %v3681_v6 = vld [vmem:[%s4904_s0 + $0x228] sm:$0xff]  }
 0x160   :  { %3460 = vmatmul.mubr.msk.bf16.gmra.mrb[172].mxu0 %vm197_vm3, %v3679_v23  ;;  %3562 = vmatmul.mubr.msk.bf16.gmra.mrb[172].mxu1 %vm197_vm3, %v3680_v35  ;;  %v3682_v23 = vld [vmem:[%s4904_s0 + $0x2f0] sm:$0xff]  }
 0x161   :  { %3463 = vmatprep.mubr.msk.bf16.mxu0 %vm3695_vm2, %v4977_v30  ;;  %3565 = vmatprep.mubr.msk.bf16.mxu1 %vm3695_vm2, %v4977_v30 }
 0x163   :  { %v4459_v42 = vpop.f32.mrb[68].mxu0  ;;  %v4461_v2 = vpop.f32.mrb[68].mxu1 }
 0x164   :  { %4990 = vst [vmem:[#allocation26_spill] sm:$0xff] %v4459_v42  ;;  %4991 = vst [vmem:[#allocation27_spill] sm:$0xff] %v4461_v2  ;;  %v3253_v18 = vpop.f32.mrb[69].mxu0  ;;  %v3355_v62 = vpop.f32.mrb[69].mxu1 }
 0x165   :  { %v4471_v35 = vpop.f32.mrb[70].mxu0  ;;  %v4473_v11 = vpop.f32.mrb[70].mxu1 }
 0x166   :  { %4992 = vst [vmem:[#allocation28_spill] sm:$0xff] %v4471_v35  ;;  %4993 = vst [vmem:[#allocation29_spill] sm:$0xff] %v4473_v11  ;;  %v3254_v54 = vpop.f32.mrb[71].mxu0  ;;  %v3356_v12 = vpop.f32.mrb[71].mxu1 }
 0x167   :  { %v3683_v12 = vld [vmem:[%s4904_s0 + $0x230] sm:$0xff]  }
 0x168   :  { %3464 = vmatmul.mubr.msk.bf16.gmra.mrb[176].mxu0 %vm197_vm3, %v3681_v6  ;;  %3566 = vmatmul.mubr.msk.bf16.gmra.mrb[176].mxu1 %vm197_vm3, %v3682_v23  ;;  %v3684_v6 = vld [vmem:[%s4904_s0 + $0x2f8] sm:$0xff]  }
 0x169   :  { %3467 = vmatprep.mubr.msk.bf16.mxu0 %vm3695_vm2, %v4977_v30  ;;  %3569 = vmatprep.mubr.msk.bf16.mxu1 %vm3695_vm2, %v4977_v30 }
 0x16b   :  { %v4483_v18 = vpop.f32.mrb[72].mxu0  ;;  %v4485_v62 = vpop.f32.mrb[72].mxu1 }
 0x16c   :  { %4994 = vst [vmem:[#allocation30_spill] sm:$0xff] %v4483_v18  ;;  %4995 = vst [vmem:[#allocation31_spill] sm:$0xff] %v4485_v62  ;;  %v3257_v0 = vpop.f32.mrb[73].mxu0  ;;  %v3359_v54 = vpop.f32.mrb[73].mxu1 }
 0x16d   :  { %v4495_v23 = vpop.f32.mrb[74].mxu0  ;;  %v4497_v11 = vpop.f32.mrb[74].mxu1 }
 0x16e   :  { %4996 = vst [vmem:[#allocation32_spill] sm:$0xff] %v4495_v23  ;;  %4997 = vst [vmem:[#allocation33_spill] sm:$0xff] %v4497_v11  ;;  %v3258_v2 = vpop.f32.mrb[75].mxu0  ;;  %v3360_v42 = vpop.f32.mrb[75].mxu1 }
 0x16f   :  { %v3685_v42 = vld [vmem:[%s4904_s0 + $0x238] sm:$0xff]  }
 0x170   :  { %3468 = vmatmul.mubr.msk.bf16.gmra.mrb[180].mxu0 %vm197_vm3, %v3683_v12  ;;  %3570 = vmatmul.mubr.msk.bf16.gmra.mrb[180].mxu1 %vm197_vm3, %v3684_v6  ;;  %v3686_v12 = vld [vmem:[%s4904_s0 + $0x300] sm:$0xff]  }
 0x171   :  { %3471 = vmatprep.mubr.msk.bf16.mxu0 %vm3695_vm2, %v4977_v30  ;;  %3573 = vmatprep.mubr.msk.bf16.mxu1 %vm3695_vm2, %v4977_v30 }
 0x173   :  { %v4507_v0 = vpop.f32.mrb[76].mxu0  ;;  %v4509_v54 = vpop.f32.mrb[76].mxu1 }
 0x174   :  { %4998 = vst [vmem:[#allocation34_spill] sm:$0xff] %v4507_v0  ;;  %4999 = vst [vmem:[#allocation35_spill] sm:$0xff] %v4509_v54  ;;  %v3261_v35 = vpop.f32.mrb[77].mxu0  ;;  %v3363_v2 = vpop.f32.mrb[77].mxu1 }
 0x175   :  { %v4519_v6 = vpop.f32.mrb[78].mxu0  ;;  %v4521_v11 = vpop.f32.mrb[78].mxu1 }
 0x176   :  { %5000 = vst [vmem:[#allocation36_spill] sm:$0xff] %v4519_v6  ;;  %5001 = vst [vmem:[#allocation37_spill] sm:$0xff] %v4521_v11  ;;  %v3262_v62 = vpop.f32.mrb[79].mxu0  ;;  %v3364_v18 = vpop.f32.mrb[79].mxu1 }
 0x177   :  { %v3687_v18 = vld [vmem:[%s4904_s0 + $0x240] sm:$0xff]  }
 0x178   :  { %3472 = vmatmul.mubr.msk.bf16.gmra.mrb[184].mxu0 %vm197_vm3, %v3685_v42  ;;  %3574 = vmatmul.mubr.msk.bf16.gmra.mrb[184].mxu1 %vm197_vm3, %v3686_v12  ;;  %v3688_v42 = vld [vmem:[%s4904_s0 + $0x308] sm:$0xff]  }
 0x179   :  { %3475 = vmatprep.mubr.msk.bf16.mxu0 %vm3695_vm2, %v4977_v30  ;;  %3577 = vmatprep.mubr.msk.bf16.mxu1 %vm3695_vm2, %v4977_v30 }
 0x17b   :  { %v4531_v35 = vpop.f32.mrb[80].mxu0  ;;  %v4533_v2 = vpop.f32.mrb[80].mxu1 }
 0x17c   :  { %5002 = vst [vmem:[#allocation38_spill] sm:$0xff] %v4531_v35  ;;  %5003 = vst [vmem:[#allocation39_spill] sm:$0xff] %v4533_v2  ;;  %v3265_v23 = vpop.f32.mrb[81].mxu0  ;;  %v3367_v62 = vpop.f32.mrb[81].mxu1 }
 0x17d   :  { %v4543_v12 = vpop.f32.mrb[82].mxu0  ;;  %v4545_v11 = vpop.f32.mrb[82].mxu1 }
 0x17e   :  { %5004 = vst [vmem:[#allocation40_spill] sm:$0xff] %v4543_v12  ;;  %5005 = vst [vmem:[#allocation41_spill] sm:$0xff] %v4545_v11  ;;  %v3266_v54 = vpop.f32.mrb[83].mxu0  ;;  %v3368_v0 = vpop.f32.mrb[83].mxu1 }
 0x17f   :  { %v3689_v0 = vld [vmem:[%s4904_s0 + $0x248] sm:$0xff]  }
 0x180   :  { %3476 = vmatmul.mubr.msk.bf16.gmra.mrb[188].mxu0 %vm197_vm3, %v3687_v18  ;;  %3578 = vmatmul.mubr.msk.bf16.gmra.mrb[188].mxu1 %vm197_vm3, %v3688_v42  ;;  %v3690_v18 = vld [vmem:[%s4904_s0 + $0x310] sm:$0xff]  }
 0x181   :  { %3479 = vmatprep.mubr.msk.bf16.mxu0 %vm3695_vm2, %v4977_v30  ;;  %3581 = vmatprep.mubr.msk.bf16.mxu1 %vm3695_vm2, %v4977_v30 }
 0x183   :  { %v4555_v23 = vpop.f32.mrb[84].mxu0  ;;  %v4557_v62 = vpop.f32.mrb[84].mxu1 }
 0x184   :  { %5006 = vst [vmem:[#allocation42_spill] sm:$0xff] %v4555_v23  ;;  %5007 = vst [vmem:[#allocation43_spill] sm:$0xff] %v4557_v62  ;;  %v3269_v6 = vpop.f32.mrb[85].mxu0  ;;  %v3371_v54 = vpop.f32.mrb[85].mxu1 }
 0x185   :  { %v4567_v42 = vpop.f32.mrb[86].mxu0  ;;  %v4569_v11 = vpop.f32.mrb[86].mxu1 }
 0x186   :  { %5008 = vst [vmem:[#allocation44_spill] sm:$0xff] %v4567_v42  ;;  %5009 = vst [vmem:[#allocation45_spill] sm:$0xff] %v4569_v11  ;;  %v3270_v2 = vpop.f32.mrb[87].mxu0  ;;  %v3372_v35 = vpop.f32.mrb[87].mxu1 }
 0x187   :  { %v3691_v35 = vld [vmem:[%s4904_s0 + $0x250] sm:$0xff]  }
 0x188   :  { %3480 = vmatmul.mubr.msk.bf16.gmra.mrb[192].mxu0 %vm197_vm3, %v3689_v0  ;;  %3582 = vmatmul.mubr.msk.bf16.gmra.mrb[192].mxu1 %vm197_vm3, %v3690_v18  ;;  %v3692_v0 = vld [vmem:[%s4904_s0 + $0x318] sm:$0xff]  }
 0x189   :  { %3483 = vmatprep.mubr.msk.bf16.mxu0 %vm3695_vm2, %v4977_v30  ;;  %3585 = vmatprep.mubr.msk.bf16.mxu1 %vm3695_vm2, %v4977_v30 }
 0x18b   :  { %v4579_v6 = vpop.f32.mrb[88].mxu0  ;;  %v4581_v54 = vpop.f32.mrb[88].mxu1 }
 0x18c   :  { %5010 = vst [vmem:[#allocation46_spill] sm:$0xff] %v4579_v6  ;;  %5011 = vst [vmem:[#allocation47_spill] sm:$0xff] %v4581_v54  ;;  %v3273_v12 = vpop.f32.mrb[89].mxu0  ;;  %v3375_v2 = vpop.f32.mrb[89].mxu1 }
 0x18d   :  { %v4591_v18 = vpop.f32.mrb[90].mxu0  ;;  %v4593_v30 = vpop.f32.mrb[90].mxu1 }
 0x18e   :  { %5012 = vst [vmem:[#allocation48_spill] sm:$0xff] %v4591_v18  ;;  %5013 = vst [vmem:[#allocation49_spill] sm:$0xff] %v4593_v30  ;;  %v3274_v42 = vpop.f32.mrb[91].mxu0  ;;  %v3376_v62 = vpop.f32.mrb[91].mxu1  ;;  %v4626_v30 = vld [vmem:[%s4905_s2] ss:$0 sm:$0xff] }
 0x190   :  { %3484 = vmatmul.mubr.msk.bf16.gmra.mrb[196].mxu0 %vm197_vm3, %v3691_v35  ;;  %3586 = vmatmul.mubr.msk.bf16.gmra.mrb[196].mxu1 %vm197_vm3, %v3692_v0 }
 0x193   :  { %v4599_v12 = vpop.f32.mrb[92].mxu0  ;;  %v4601_v2 = vpop.f32.mrb[92].mxu1 }
 0x194   :  { %5014 = vst [vmem:[#allocation50_spill] sm:$0xff] %v4599_v12  ;;  %5015 = vst [vmem:[#allocation51_spill] sm:$0xff] %v4601_v2  ;;  %v3277_v54 = vpop.f32.mrb[93].mxu0  ;;  %v3379_v6 = vpop.f32.mrb[93].mxu1 }
 0x195   :  { %v4605_v23 = vpop.f32.mrb[94].mxu0  ;;  %v4607_v63 = vpop.f32.mrb[94].mxu1 }
 0x196   :  { %5016 = vst [vmem:[#allocation52_spill] sm:$0xff] %v4605_v23  ;;  %5017 = vst [vmem:[#allocation53_spill] sm:$0xff] %v4607_v63  ;;  %v3278_v42 = vpop.f32.mrb[95].mxu0  ;;  %v3380_v35 = vpop.f32.mrb[95].mxu1 }
 0x19b   :  { %v4611_v11 = vpop.f32.mrb[96].mxu0  ;;  %v4613_v0 = vpop.f32.mrb[96].mxu1 }
 0x19c   :  { %5018 = vst [vmem:[#allocation54_spill] sm:$0xff] %v4611_v11  ;;  %5019 = vst [vmem:[#allocation55_spill] sm:$0xff] %v4613_v0  ;;  %v3281_v18 = vpop.f32.mrb[97].mxu0  ;;  %v3383_v47 = vpop.f32.mrb[97].mxu1  ;;  %v5022_v0 = vmax.f32 %v4051_v60, %v4053_v61 }
 0x19d   :  { %v4617_v54 = vpop.f32.mrb[98].mxu0  ;;  %v4619_v6 = vpop.f32.mrb[98].mxu1 }
 0x19e   :  { %5020 = vst [vmem:[#allocation56_spill] sm:$0xff] %v4617_v54  ;;  %5021 = vst [vmem:[#allocation57_spill] sm:$0xff] %v4619_v6  ;;  %v3282_v12 = vpop.f32.mrb[99].mxu0  ;;  %v3384_v62 = vpop.f32.mrb[99].mxu1 }
 0x1a3   :  { %v1282_v42 = vpop.f32.mrb[100].mxu0  ;;  %v1766_v35 = vpop.f32.mrb[100].mxu1 }
 0x1a4   :  { %v2015_v63 = vmax.f32 %v1282_v42, %v1766_v35  ;;  %v3389_v23 = vpop.f32.mrb[101].mxu0  ;;  %v3491_v20 = vpop.f32.mrb[101].mxu1 }
 0x1a5   :  { %v1285_v47 = vpop.f32.mrb[102].mxu0  ;;  %v1769_v18 = vpop.f32.mrb[102].mxu1  ;;  %v5023_v23 = vmax.f32 %v4063_v4, %v4065_v5 }
 0x1a6   :  { %v2065_v11 = vmax.f32 %v5022_v0, %v2015_v63  ;;  %v2016_v36 = vmax.f32 %v1285_v47, %v1769_v18  ;;  %v3390_v2 = vpop.f32.mrb[103].mxu0  ;;  %v3492_v12 = vpop.f32.mrb[103].mxu1 }
 0x1a7   :  { %v5024_v2 = vmax.f32 %v4075_v9, %v4077_v10 }
 0x1a8   :  { %v2122_v62 = vadd.f32 %v4626_v30, %v2065_v11  ;;  %v2066_v20 = vmax.f32 %v5023_v23, %v2016_v36 }
 0x1aa   :  { %v2123_v42 = vadd.f32 %v4626_v30, %v2066_v20  ;;  %v2172_v54 = vmax.f32 %v2122_v62, 0.0  ;;  %v5026_v20 = vmax.f32 %v4099_v21, %v4101_v22 }
 0x1ab   :  { %v1290_v35 = vpop.f32.mrb[104].mxu0  ;;  %v1774_v6 = vpop.f32.mrb[104].mxu1 }
 0x1ac   :  { %v2173_v59 = vmax.f32 %v2123_v42, 0.0  ;;  %v2017_v26 = vmax.f32 %v1290_v35, %v1774_v6  ;;  %v3393_v14 = vpop.f32.mrb[105].mxu0  ;;  %v3495_v48 = vpop.f32.mrb[105].mxu1 }
 0x1ad   :  { %v1293_v60 = vpop.f32.mrb[106].mxu0  ;;  %v1777_v61 = vpop.f32.mrb[106].mxu1  ;;  %v5025_v14 = vmax.f32 %v4087_v16, %v4089_v17 }
 0x1ae   :  { %v2931_v63 = vpack.c.bf16 %v2173_v59, %v2172_v54  ;;  %v2067_v11 = vmax.f32 %v5024_v2, %v2017_v26  ;;  %v2018_v0 = vmax.f32 %v1293_v60, %v1777_v61  ;;  %v3394_v47 = vpop.f32.mrb[107].mxu0  ;;  %v3496_v4 = vpop.f32.mrb[107].mxu1  ;;  %v5027_v61 = vmax.f32 %v4111_v28, %v4113_v29 }
 0x1b0   :  { %2932 = vst [vmem:[%s4906_s3] sm:$0xff] %v2931_v63   ;;  %v2124_v5 = vadd.f32 %v4626_v30, %v2067_v11  ;;  %v2068_v48 = vmax.f32 %v5025_v14, %v2018_v0 }
 0x1b2   :  { %v2125_v36 = vadd.f32 %v4626_v30, %v2068_v48  ;;  %v2174_v6 = vmax.f32 %v2124_v5, 0.0 }
 0x1b3   :  { %v1298_v59 = vpop.f32.mrb[108].mxu0  ;;  %v1782_v54 = vpop.f32.mrb[108].mxu1 }
 0x1b4   :  { %v2175_v9 = vmax.f32 %v2125_v36, 0.0  ;;  %v2019_v10 = vmax.f32 %v1298_v59, %v1782_v54  ;;  %v3397_v26 = vpop.f32.mrb[109].mxu0  ;;  %v3499_v18 = vpop.f32.mrb[109].mxu1  ;;  %v5028_v59 = vmax.f32 %v4123_v33, %v4125_v34 }
 0x1b5   :  { %v1301_v12 = vpop.f32.mrb[110].mxu0  ;;  %v1785_v62 = vpop.f32.mrb[110].mxu1 }
 0x1b6   :  { %v2936_v23 = vpack.c.bf16 %v2175_v9, %v2174_v6  ;;  %v2069_v42 = vmax.f32 %v5026_v20, %v2019_v10  ;;  %v2020_v35 = vmax.f32 %v1301_v12, %v1785_v62  ;;  %v3398_v60 = vpop.f32.mrb[111].mxu0  ;;  %v3500_v16 = vpop.f32.mrb[111].mxu1  ;;  %v5029_v10 = vmax.f32 %v4135_v40, %v4137_v41 }
 0x1b8   :  { %3053 = vst [vmem:[%s4906_s3 + $0x8] sm:$0xff] %v2936_v23   ;;  %v2126_v17 = vadd.f32 %v4626_v30, %v2069_v42  ;;  %v2070_v63 = vmax.f32 %v5027_v61, %v2020_v35 }
 0x1ba   :  { %v2127_v2 = vadd.f32 %v4626_v30, %v2070_v63  ;;  %v2176_v47 = vmax.f32 %v2126_v17, 0.0  ;;  %v5030_v17 = vmax.f32 %v4147_v45, %v4149_v46 }
 0x1bb   :  { %v1306_v11 = vpop.f32.mrb[112].mxu0  ;;  %v1790_v0 = vpop.f32.mrb[112].mxu1 }
 0x1bc   :  { %v2177_v21 = vmax.f32 %v2127_v2, 0.0  ;;  %v2021_v22 = vmax.f32 %v1306_v11, %v1790_v0  ;;  %v3401_v4 = vpop.f32.mrb[113].mxu0  ;;  %v3503_v5 = vpop.f32.mrb[113].mxu1  ;;  %v5031_v11 = vmax.f32 %v4159_v52, %v4161_v53 }
 0x1bd   :  { %v1309_v14 = vpop.f32.mrb[114].mxu0  ;;  %v1793_v48 = vpop.f32.mrb[114].mxu1 }
 0x1be   :  { %v2941_v36 = vpack.c.bf16 %v2177_v21, %v2176_v47  ;;  %v2071_v54 = vmax.f32 %v5028_v59, %v2021_v22  ;;  %v2022_v6 = vmax.f32 %v1309_v14, %v1793_v48  ;;  %v3402_v9 = vpop.f32.mrb[115].mxu0  ;;  %v3504_v28 = vpop.f32.mrb[115].mxu1 }
 0x1c0   :  { %3054 = vst [vmem:[%s4906_s3 + $0x10] sm:$0xff] %v2941_v36   ;;  %v2128_v29 = vadd.f32 %v4626_v30, %v2071_v54  ;;  %v2072_v26 = vmax.f32 %v5029_v10, %v2022_v6  ;;  %v5032_v54 = vmax.f32 %v4171_v57, %v4173_v58 }
 0x1c2   :  { %v2129_v18 = vadd.f32 %v4626_v30, %v2072_v26  ;;  %v2178_v23 = vmax.f32 %v2128_v29, 0.0  ;;  %v5033_v29 = vmax.f32 %v4183_v7, %v4185_v8 }
 0x1c3   :  { %v1314_v12 = vpop.f32.mrb[116].mxu0  ;;  %v1798_v62 = vpop.f32.mrb[116].mxu1 }
 0x1c4   :  { %v2179_v33 = vmax.f32 %v2129_v18, 0.0  ;;  %v2023_v34 = vmax.f32 %v1314_v12, %v1798_v62  ;;  %v3405_v20 = vpop.f32.mrb[117].mxu0  ;;  %v3507_v42 = vpop.f32.mrb[117].mxu1 }
 0x1c5   :  { %v1317_v35 = vpop.f32.mrb[118].mxu0  ;;  %v1801_v60 = vpop.f32.mrb[118].mxu1 }
 0x1c6   :  { %v2946_v16 = vpack.c.bf16 %v2179_v33, %v2178_v23  ;;  %v2073_v61 = vmax.f32 %v5030_v17, %v2023_v34  ;;  %v2024_v63 = vmax.f32 %v1317_v35, %v1801_v60  ;;  %v3406_v2 = vpop.f32.mrb[119].mxu0  ;;  %v3508_v40 = vpop.f32.mrb[119].mxu1  ;;  %v5034_v35 = vmax.f32 %v4195_v15, %v4197_v19 }
 0x1c8   :  { %3055 = vst [vmem:[%s4906_s3 + $0x18] sm:$0xff] %v2946_v16   ;;  %v2130_v41 = vadd.f32 %v4626_v30, %v2073_v61  ;;  %v2074_v0 = vmax.f32 %v5031_v11, %v2024_v63  ;;  %v5035_v61 = vmax.f32 %v4207_v31, %v4209_v32 }
 0x1ca   :  { %v2131_v47 = vadd.f32 %v4626_v30, %v2074_v0  ;;  %v2180_v4 = vmax.f32 %v2130_v41, 0.0 }
 0x1cb   :  { %v1322_v21 = vpop.f32.mrb[120].mxu0  ;;  %v1806_v22 = vpop.f32.mrb[120].mxu1 }
 0x1cc   :  { %v2181_v45 = vmax.f32 %v2131_v47, 0.0  ;;  %v2025_v46 = vmax.f32 %v1322_v21, %v1806_v22  ;;  %v3409_v5 = vpop.f32.mrb[121].mxu0  ;;  %v3511_v14 = vpop.f32.mrb[121].mxu1 }
 0x1cd   :  { %v1325_v48 = vpop.f32.mrb[122].mxu0  ;;  %v1809_v36 = vpop.f32.mrb[122].mxu1 }
 0x1ce   :  { %v2951_v59 = vpack.c.bf16 %v2181_v45, %v2180_v4  ;;  %v2075_v6 = vmax.f32 %v5032_v54, %v2025_v46  ;;  %v2026_v9 = vmax.f32 %v1325_v48, %v1809_v36  ;;  %v3410_v28 = vpop.f32.mrb[123].mxu0  ;;  %v3512_v52 = vpop.f32.mrb[123].mxu1  ;;  %v5036_v45 = vmax.f32 %v4219_v39, %v4221_v43 }
 0x1cf   :  { %v5037_v48 = vmax.f32 %v4231_v55, %v4233_v56 }
 0x1d0   :  { %3056 = vst [vmem:[%s4906_s3 + $0x20] sm:$0xff] %v2951_v59   ;;  %v2132_v53 = vadd.f32 %v4626_v30, %v2075_v6  ;;  %v2076_v10 = vmax.f32 %v5033_v29, %v2026_v9 }
 0x1d2   :  { %v2133_v26 = vadd.f32 %v4626_v30, %v2076_v10  ;;  %v2182_v62 = vmax.f32 %v2132_v53, 0.0 }
 0x1d3   :  { %v1330_v18 = vpop.f32.mrb[124].mxu0  ;;  %v1814_v12 = vpop.f32.mrb[124].mxu1 }
 0x1d4   :  { %v2183_v57 = vmax.f32 %v2133_v26, 0.0  ;;  %v2027_v58 = vmax.f32 %v1330_v18, %v1814_v12  ;;  %v3413_v23 = vpop.f32.mrb[125].mxu0  ;;  %v3515_v33 = vpop.f32.mrb[125].mxu1  ;;  %v5038_v26 = vmax.f32 %v4243_v3, %v4245_v13 }
 0x1d5   :  { %v1333_v34 = vpop.f32.mrb[126].mxu0  ;;  %v1817_v20 = vpop.f32.mrb[126].mxu1 }
 0x1d6   :  { %v2956_v42 = vpack.c.bf16 %v2183_v57, %v2182_v62  ;;  %v2077_v60 = vmax.f32 %v5034_v35, %v2027_v58  ;;  %v2028_v16 = vmax.f32 %v1333_v34, %v1817_v20  ;;  %v3414_v17 = vpop.f32.mrb[127].mxu0  ;;  %v3516_v7 = vpop.f32.mrb[127].mxu1  ;;  %v5039_v57 = vmax.f32 %v4255_v37, %v4257_v38 }
 0x1d7   :  { %v5040_v7 = vmax.f32 %v4267_v51, %v4269_v1 }
 0x1d8   :  { %3057 = vst [vmem:[%s4906_s3 + $0x28] sm:$0xff] %v2956_v42   ;;  %v2134_v8 = vadd.f32 %v4626_v30, %v2077_v60  ;;  %v2078_v63 = vmax.f32 %v5035_v61, %v2028_v16 }
 0x1da   :  { %v2135_v2 = vadd.f32 %v4626_v30, %v2078_v63  ;;  %v2184_v11 = vmax.f32 %v2134_v8, 0.0 }
 0x1db   :  { %v1338_v40 = vpop.f32.mrb[128].mxu0  ;;  %v1822_v41 = vpop.f32.mrb[128].mxu1 }
 0x1dc   :  { %v2185_v15 = vmax.f32 %v2135_v2, 0.0  ;;  %v2029_v19 = vmax.f32 %v1338_v40, %v1822_v41  ;;  %v3417_v0 = vpop.f32.mrb[129].mxu0  ;;  %v3519_v47 = vpop.f32.mrb[129].mxu1  ;;  %v5041_v2 = vmax.f32 %v4279_v49, %v4281_v50 }
 0x1dd   :  { %v1341_v21 = vpop.f32.mrb[130].mxu0  ;;  %v1825_v22 = vpop.f32.mrb[130].mxu1 }
 0x1de   :  { %v2961_v4 = vpack.c.bf16 %v2185_v15, %v2184_v11  ;;  %v2079_v46 = vmax.f32 %v5036_v45, %v2029_v19  ;;  %v2030_v5 = vmax.f32 %v1341_v21, %v1825_v22  ;;  %v3418_v14 = vpop.f32.mrb[131].mxu0  ;;  %v3520_v31 = vpop.f32.mrb[131].mxu1  ;;  %v5042_v45 = vmax.f32 %v4291_v24, %v4293_v25 }
 0x1df   :  { %v5043_v31 = vmax.f32 %v4303_v27, %v4305_v44 }
 0x1e0   :  { %3058 = vst [vmem:[%s4906_s3 + $0x30] sm:$0xff] %v2961_v4   ;;  %v2136_v32 = vadd.f32 %v4626_v30, %v2079_v46  ;;  %v2080_v36 = vmax.f32 %v5037_v48, %v2030_v5 }
 0x1e2   :  { %v2137_v59 = vadd.f32 %v4626_v30, %v2080_v36  ;;  %v2186_v9 = vmax.f32 %v2136_v32, 0.0 }
 0x1e3   :  { %v1346_v54 = vpop.f32.mrb[132].mxu0  ;;  %v1830_v6 = vpop.f32.mrb[132].mxu1 }
 0x1e4   :  { %v2187_v39 = vmax.f32 %v2137_v59, 0.0  ;;  %v2031_v43 = vmax.f32 %v1346_v54, %v1830_v6  ;;  %v3421_v28 = vpop.f32.mrb[133].mxu0  ;;  %v3523_v52 = vpop.f32.mrb[133].mxu1 }
 0x1e5   :  { %v1349_v53 = vpop.f32.mrb[134].mxu0  ;;  %v1833_v29 = vpop.f32.mrb[134].mxu1  ;;  %v5044_v52 = vld [vmem:[#allocation2_spill] sm:$0xff] }
 0x1e6   :  { %v2966_v10 = vpack.c.bf16 %v2187_v39, %v2186_v9  ;;  %v2081_v18 = vmax.f32 %v5038_v26, %v2031_v43  ;;  %v2032_v12 = vmax.f32 %v1349_v53, %v1833_v29  ;;  %v3422_v62 = vpop.f32.mrb[135].mxu0  ;;  %v3524_v55 = vpop.f32.mrb[135].mxu1  ;;  %v5045_v53 = vld [vmem:[#allocation3_spill] sm:$0xff] }
 0x1e7   :  { %v5046_v29 = vmax.f32 %v5044_v52, %v5045_v53  ;;  %v5048_v62 = vld [vmem:[#allocation5_spill] sm:$0xff] }
 0x1e8   :  { %3059 = vst [vmem:[%s4906_s3 + $0x38] sm:$0xff] %v2966_v10   ;;  %v2138_v56 = vadd.f32 %v4626_v30, %v2081_v18  ;;  %v2082_v58 = vmax.f32 %v5039_v57, %v2032_v12  ;;  %v5047_v12 = vld [vmem:[#allocation4_spill] sm:$0xff] }
 0x1e9   :  { %v5049_v55 = vmax.f32 %v5047_v12, %v5048_v62 }
 0x1ea   :  { %v2139_v23 = vadd.f32 %v4626_v30, %v2082_v58  ;;  %v2188_v20 = vmax.f32 %v2138_v56, 0.0 }
 0x1eb   :  { %v1354_v33 = vpop.f32.mrb[136].mxu0  ;;  %v1838_v34 = vpop.f32.mrb[136].mxu1 }
 0x1ec   :  { %v2189_v3 = vmax.f32 %v2139_v23, 0.0  ;;  %v2033_v13 = vmax.f32 %v1354_v33, %v1838_v34  ;;  %v3425_v42 = vpop.f32.mrb[137].mxu0  ;;  %v3527_v35 = vpop.f32.mrb[137].mxu1 }
 0x1ed   :  { %v1357_v60 = vpop.f32.mrb[138].mxu0  ;;  %v1841_v16 = vpop.f32.mrb[138].mxu1 }
 0x1ee   :  { %v2971_v17 = vpack.c.bf16 %v2189_v3, %v2188_v20  ;;  %v2083_v8 = vmax.f32 %v5040_v7, %v2033_v13  ;;  %v2034_v61 = vmax.f32 %v1357_v60, %v1841_v16  ;;  %v3426_v63 = vpop.f32.mrb[139].mxu0  ;;  %v3528_v37 = vpop.f32.mrb[139].mxu1  ;;  %v5050_v16 = vld [vmem:[#allocation6_spill] sm:$0xff] }
 0x1f0   :  { %3060 = vst [vmem:[%s4906_s3 + $0x40] sm:$0xff] %v2971_v17   ;;  %v2140_v38 = vadd.f32 %v4626_v30, %v2083_v8  ;;  %v2084_v40 = vmax.f32 %v5041_v2, %v2034_v61  ;;  %v5051_v17 = vld [vmem:[#allocation7_spill] sm:$0xff]  ;;  %v5053_v2 = vld [vmem:[#allocation8_spill] sm:$0xff] }
 0x1f1   :  { %v5052_v7 = vmax.f32 %v5050_v16, %v5051_v17 }
 0x1f2   :  { %v2141_v41 = vadd.f32 %v4626_v30, %v2084_v40  ;;  %v2190_v19 = vmax.f32 %v2140_v38, 0.0  ;;  %v5054_v40 = vld [vmem:[#allocation9_spill] sm:$0xff] }
 0x1f3   :  { %v1362_v11 = vpop.f32.mrb[140].mxu0  ;;  %v1846_v15 = vpop.f32.mrb[140].mxu1 }
 0x1f4   :  { %v2191_v51 = vmax.f32 %v2141_v41, 0.0  ;;  %v2035_v1 = vmax.f32 %v1362_v11, %v1846_v15  ;;  %v3429_v0 = vpop.f32.mrb[141].mxu0  ;;  %v3531_v47 = vpop.f32.mrb[141].mxu1  ;;  %v5055_v41 = vmax.f32 %v5053_v2, %v5054_v40 }
 0x1f5   :  { %v1365_v21 = vpop.f32.mrb[142].mxu0  ;;  %v1849_v22 = vpop.f32.mrb[142].mxu1 }
 0x1f6   :  { %v2976_v4 = vpack.c.bf16 %v2191_v51, %v2190_v19  ;;  %v2085_v46 = vmax.f32 %v5042_v45, %v2035_v1  ;;  %v2036_v5 = vmax.f32 %v1365_v21, %v1849_v22  ;;  %v3430_v14 = vpop.f32.mrb[143].mxu0  ;;  %v3532_v49 = vpop.f32.mrb[143].mxu1 }
 0x1f7   :  { %v5057_v14 = vld [vmem:[#allocation11_spill] sm:$0xff] }
 0x1f8   :  { %3061 = vst [vmem:[%s4906_s3 + $0x48] sm:$0xff] %v2976_v4   ;;  %v2142_v50 = vadd.f32 %v4626_v30, %v2085_v46  ;;  %v2086_v32 = vmax.f32 %v5043_v31, %v2036_v5  ;;  %v5056_v5 = vld [vmem:[#allocation10_spill] sm:$0xff] }
 0x1f9   :  { %v5058_v49 = vmax.f32 %v5056_v5, %v5057_v14 }
 0x1fa   :  { %v2143_v48 = vadd.f32 %v4626_v30, %v2086_v32  ;;  %v2192_v54 = vmax.f32 %v2142_v50, 0.0 }
 0x1fb   :  { %v1370_v36 = vpop.f32.mrb[144].mxu0  ;;  %v1854_v59 = vpop.f32.mrb[144].mxu1 }
 0x1fc   :  { %v2193_v24 = vmax.f32 %v2143_v48, 0.0  ;;  %v2037_v25 = vmax.f32 %v1370_v36, %v1854_v59  ;;  %v3433_v6 = vpop.f32.mrb[145].mxu0  ;;  %v3535_v9 = vpop.f32.mrb[145].mxu1  ;;  %v5059_v59 = vld [vmem:[#allocation12_spill] sm:$0xff] }
 0x1fd   :  { %v1373_v39 = vpop.f32.mrb[146].mxu0  ;;  %v1857_v43 = vpop.f32.mrb[146].mxu1 }
 0x1fe   :  { %v2981_v28 = vpack.c.bf16 %v2193_v24, %v2192_v54  ;;  %v2087_v10 = vmax.f32 %v5046_v29, %v2037_v25  ;;  %v2038_v26 = vmax.f32 %v1373_v39, %v1857_v43  ;;  %v3434_v18 = vpop.f32.mrb[147].mxu0  ;;  %v3536_v44 = vpop.f32.mrb[147].mxu1  ;;  %v5060_v54 = vld [vmem:[#allocation13_spill] sm:$0xff] }
 0x1ff   :  { %v5061_v24 = vmax.f32 %v5059_v59, %v5060_v54  ;;  %v5062_v44 = vld [vmem:[#allocation14_spill] sm:$0xff] }
 0x200   :  { %3062 = vst [vmem:[%s4906_s3 + $0x50] sm:$0xff] %v2981_v28   ;;  %v2144_v27 = vadd.f32 %v4626_v30, %v2087_v10  ;;  %v2088_v56 = vmax.f32 %v5049_v55, %v2038_v26 }
 0x202   :  { %v2145_v57 = vadd.f32 %v4626_v30, %v2088_v56  ;;  %v2194_v33 = vmax.f32 %v2144_v27, 0.0  ;;  %v5063_v27 = vld [vmem:[#allocation15_spill] sm:$0xff] }
 0x203   :  { %v1378_v58 = vpop.f32.mrb[148].mxu0  ;;  %v1862_v23 = vpop.f32.mrb[148].mxu1  ;;  %v5064_v12 = vmax.f32 %v5062_v44, %v5063_v27 }
 0x204   :  { %v2195_v34 = vmax.f32 %v2145_v57, 0.0  ;;  %v2039_v20 = vmax.f32 %v1378_v58, %v1862_v23  ;;  %v3437_v3 = vpop.f32.mrb[149].mxu0  ;;  %v3539_v13 = vpop.f32.mrb[149].mxu1  ;;  %v5065_v23 = vld [vmem:[#allocation16_spill] sm:$0xff] }
 0x205   :  { %v1381_v42 = vpop.f32.mrb[150].mxu0  ;;  %v1865_v35 = vpop.f32.mrb[150].mxu1 }
 0x206   :  { %v2986_v60 = vpack.c.bf16 %v2195_v34, %v2194_v33  ;;  %v2089_v8 = vmax.f32 %v5052_v7, %v2039_v20  ;;  %v2040_v61 = vmax.f32 %v1381_v42, %v1865_v35  ;;  %v3438_v63 = vpop.f32.mrb[151].mxu0  ;;  %v3540_v37 = vpop.f32.mrb[151].mxu1  ;;  %v5066_v33 = vld [vmem:[#allocation17_spill] sm:$0xff] }
 0x207   :  { %v5067_v34 = vmax.f32 %v5065_v23, %v5066_v33  ;;  %v5068_v37 = vld [vmem:[#allocation18_spill] sm:$0xff] }
 0x208   :  { %3063 = vst [vmem:[%s4906_s3 + $0x58] sm:$0xff] %v2986_v60   ;;  %v2146_v38 = vadd.f32 %v4626_v30, %v2089_v8  ;;  %v2090_v11 = vmax.f32 %v5055_v41, %v2040_v61 }
 0x20a   :  { %v2147_v15 = vadd.f32 %v4626_v30, %v2090_v11  ;;  %v2196_v1 = vmax.f32 %v2146_v38, 0.0  ;;  %v5069_v38 = vld [vmem:[#allocation19_spill] sm:$0xff] }
 0x20b   :  { %v1386_v19 = vpop.f32.mrb[152].mxu0  ;;  %v1870_v51 = vpop.f32.mrb[152].mxu1  ;;  %v5070_v2 = vmax.f32 %v5068_v37, %v5069_v38 }
 0x20c   :  { %v2197_v0 = vmax.f32 %v2147_v15, 0.0  ;;  %v2041_v47 = vmax.f32 %v1386_v19, %v1870_v51  ;;  %v3441_v21 = vpop.f32.mrb[153].mxu0  ;;  %v3543_v22 = vpop.f32.mrb[153].mxu1  ;;  %v5071_v51 = vld [vmem:[#allocation20_spill] sm:$0xff] }
 0x20d   :  { %v1389_v4 = vpop.f32.mrb[154].mxu0  ;;  %v1873_v45 = vpop.f32.mrb[154].mxu1 }
 0x20e   :  { %v2991_v46 = vpack.c.bf16 %v2197_v0, %v2196_v1  ;;  %v2091_v50 = vmax.f32 %v5058_v49, %v2041_v47  ;;  %v2042_v31 = vmax.f32 %v1389_v4, %v1873_v45  ;;  %v3442_v32 = vpop.f32.mrb[155].mxu0  ;;  %v3544_v48 = vpop.f32.mrb[155].mxu1  ;;  %v5072_v1 = vld [vmem:[#allocation21_spill] sm:$0xff] }
 0x20f   :  { %v5073_v0 = vmax.f32 %v5071_v51, %v5072_v1  ;;  %v5074_v48 = vld [vmem:[#allocation22_spill] sm:$0xff] }
 0x210   :  { %3064 = vst [vmem:[%s4906_s3 + $0x60] sm:$0xff] %v2991_v46   ;;  %v2148_v36 = vadd.f32 %v4626_v30, %v2091_v50  ;;  %v2092_v25 = vmax.f32 %v5061_v24, %v2042_v31 }
 0x212   :  { %v2149_v6 = vadd.f32 %v4626_v30, %v2092_v25  ;;  %v2198_v43 = vmax.f32 %v2148_v36, 0.0  ;;  %v5075_v36 = vld [vmem:[#allocation23_spill] sm:$0xff] }
 0x213   :  { %v1394_v9 = vpop.f32.mrb[156].mxu0  ;;  %v1878_v39 = vpop.f32.mrb[156].mxu1  ;;  %v5076_v59 = vmax.f32 %v5074_v48, %v5075_v36 }
 0x214   :  { %v2199_v28 = vmax.f32 %v2149_v6, 0.0  ;;  %v2043_v52 = vmax.f32 %v1394_v9, %v1878_v39  ;;  %v3445_v53 = vpop.f32.mrb[157].mxu0  ;;  %v3547_v29 = vpop.f32.mrb[157].mxu1  ;;  %v5077_v39 = vld [vmem:[#allocation24_spill] sm:$0xff] }
 0x215   :  { %v1397_v10 = vpop.f32.mrb[158].mxu0  ;;  %v1881_v26 = vpop.f32.mrb[158].mxu1 }
 0x216   :  { %v2996_v18 = vpack.c.bf16 %v2199_v28, %v2198_v43  ;;  %v2093_v62 = vmax.f32 %v5064_v12, %v2043_v52  ;;  %v2044_v55 = vmax.f32 %v1397_v10, %v1881_v26  ;;  %v3446_v56 = vpop.f32.mrb[159].mxu0  ;;  %v3548_v57 = vpop.f32.mrb[159].mxu1  ;;  %v5078_v43 = vld [vmem:[#allocation25_spill] sm:$0xff] }
 0x217   :  { %v5079_v28 = vmax.f32 %v5077_v39, %v5078_v43  ;;  %v5080_v57 = vld [vmem:[#allocation26_spill] sm:$0xff] }
 0x218   :  { %3065 = vst [vmem:[%s4906_s3 + $0x68] sm:$0xff] %v2996_v18   ;;  %v2150_v58 = vadd.f32 %v4626_v30, %v2093_v62  ;;  %v2094_v20 = vmax.f32 %v5067_v34, %v2044_v55 }
 0x21a   :  { %v2151_v3 = vadd.f32 %v4626_v30, %v2094_v20  ;;  %v2200_v35 = vmax.f32 %v2150_v58, 0.0  ;;  %v5081_v58 = vld [vmem:[#allocation27_spill] sm:$0xff] }
 0x21b   :  { %v1402_v13 = vpop.f32.mrb[160].mxu0  ;;  %v1886_v42 = vpop.f32.mrb[160].mxu1  ;;  %v5082_v23 = vmax.f32 %v5080_v57, %v5081_v58 }
 0x21c   :  { %v2201_v60 = vmax.f32 %v2151_v3, 0.0  ;;  %v2045_v16 = vmax.f32 %v1402_v13, %v1886_v42  ;;  %v3449_v17 = vpop.f32.mrb[161].mxu0  ;;  %v3551_v7 = vpop.f32.mrb[161].mxu1  ;;  %v5083_v42 = vld [vmem:[#allocation28_spill] sm:$0xff] }
 0x21d   :  { %v1405_v8 = vpop.f32.mrb[162].mxu0  ;;  %v1889_v61 = vpop.f32.mrb[162].mxu1 }
 0x21e   :  { %v3001_v63 = vpack.c.bf16 %v2201_v60, %v2200_v35  ;;  %v2095_v40 = vmax.f32 %v5070_v2, %v2045_v16  ;;  %v2046_v41 = vmax.f32 %v1405_v8, %v1889_v61  ;;  %v3450_v11 = vpop.f32.mrb[163].mxu0  ;;  %v3552_v15 = vpop.f32.mrb[163].mxu1  ;;  %v5084_v35 = vld [vmem:[#allocation29_spill] sm:$0xff] }
 0x21f   :  { %v5085_v60 = vmax.f32 %v5083_v42, %v5084_v35  ;;  %v5086_v15 = vld [vmem:[#allocation30_spill] sm:$0xff] }
 0x220   :  { %3066 = vst [vmem:[%s4906_s3 + $0x70] sm:$0xff] %v3001_v63   ;;  %v2152_v19 = vadd.f32 %v4626_v30, %v2095_v40  ;;  %v2096_v47 = vmax.f32 %v5073_v0, %v2046_v41 }
 0x222   :  { %v2153_v21 = vadd.f32 %v4626_v30, %v2096_v47  ;;  %v2202_v45 = vmax.f32 %v2152_v19, 0.0  ;;  %v5087_v19 = vld [vmem:[#allocation31_spill] sm:$0xff] }
 0x223   :  { %v1410_v22 = vpop.f32.mrb[164].mxu0  ;;  %v1894_v4 = vpop.f32.mrb[164].mxu1  ;;  %v5088_v51 = vmax.f32 %v5086_v15, %v5087_v19 }
 0x224   :  { %v2203_v46 = vmax.f32 %v2153_v21, 0.0  ;;  %v2047_v5 = vmax.f32 %v1410_v22, %v1894_v4  ;;  %v3453_v14 = vpop.f32.mrb[165].mxu0  ;;  %v3555_v49 = vpop.f32.mrb[165].mxu1  ;;  %v5089_v4 = vld [vmem:[#allocation32_spill] sm:$0xff] }
 0x225   :  { %v1413_v50 = vpop.f32.mrb[166].mxu0  ;;  %v1897_v31 = vpop.f32.mrb[166].mxu1 }
 0x226   :  { %v3006_v32 = vpack.c.bf16 %v2203_v46, %v2202_v45  ;;  %v2097_v54 = vmax.f32 %v5076_v59, %v2047_v5  ;;  %v2048_v24 = vmax.f32 %v1413_v50, %v1897_v31  ;;  %v3454_v25 = vpop.f32.mrb[167].mxu0  ;;  %v3556_v6 = vpop.f32.mrb[167].mxu1  ;;  %v5090_v45 = vld [vmem:[#allocation33_spill] sm:$0xff] }
 0x227   :  { %v5091_v46 = vmax.f32 %v5089_v4, %v5090_v45  ;;  %v5092_v6 = vld [vmem:[#allocation34_spill] sm:$0xff] }
 0x228   :  { %3067 = vst [vmem:[%s4906_s3 + $0x78] sm:$0xff] %v3006_v32   ;;  %v2154_v9 = vadd.f32 %v4626_v30, %v2097_v54  ;;  %v2098_v52 = vmax.f32 %v5079_v28, %v2048_v24 }
 0x22a   :  { %v2155_v53 = vadd.f32 %v4626_v30, %v2098_v52  ;;  %v2204_v26 = vmax.f32 %v2154_v9, 0.0  ;;  %v5093_v9 = vld [vmem:[#allocation35_spill] sm:$0xff] }
 0x22b   :  { %v1418_v29 = vpop.f32.mrb[168].mxu0  ;;  %v1902_v10 = vpop.f32.mrb[168].mxu1  ;;  %v5094_v39 = vmax.f32 %v5092_v6, %v5093_v9 }
 0x22c   :  { %v2205_v18 = vmax.f32 %v2155_v53, 0.0  ;;  %v2049_v44 = vmax.f32 %v1418_v29, %v1902_v10  ;;  %v3457_v27 = vpop.f32.mrb[169].mxu0  ;;  %v3559_v12 = vpop.f32.mrb[169].mxu1  ;;  %v5095_v10 = vld [vmem:[#allocation36_spill] sm:$0xff] }
 0x22d   :  { %v1421_v62 = vpop.f32.mrb[170].mxu0  ;;  %v1905_v55 = vpop.f32.mrb[170].mxu1 }
 0x22e   :  { %v3011_v56 = vpack.c.bf16 %v2205_v18, %v2204_v26  ;;  %v2099_v33 = vmax.f32 %v5082_v23, %v2049_v44  ;;  %v2050_v34 = vmax.f32 %v1421_v62, %v1905_v55  ;;  %v3458_v20 = vpop.f32.mrb[171].mxu0  ;;  %v3560_v3 = vpop.f32.mrb[171].mxu1  ;;  %v5096_v26 = vld [vmem:[#allocation37_spill] sm:$0xff] }
 0x22f   :  { %v5097_v18 = vmax.f32 %v5095_v10, %v5096_v26  ;;  %v5098_v3 = vld [vmem:[#allocation38_spill] sm:$0xff] }
 0x230   :  { %3068 = vst [vmem:[%s4906_s3 + $0x80] sm:$0xff] %v3011_v56   ;;  %v2156_v13 = vadd.f32 %v4626_v30, %v2099_v33  ;;  %v2100_v16 = vmax.f32 %v5085_v60, %v2050_v34 }
 0x232   :  { %v2157_v17 = vadd.f32 %v4626_v30, %v2100_v16  ;;  %v2206_v61 = vmax.f32 %v2156_v13, 0.0  ;;  %v5099_v13 = vld [vmem:[#allocation39_spill] sm:$0xff] }
 0x233   :  { %v1426_v7 = vpop.f32.mrb[172].mxu0  ;;  %v1910_v8 = vpop.f32.mrb[172].mxu1  ;;  %v5100_v42 = vmax.f32 %v5098_v3, %v5099_v13 }
 0x234   :  { %v2207_v63 = vmax.f32 %v2157_v17, 0.0  ;;  %v2051_v37 = vmax.f32 %v1426_v7, %v1910_v8  ;;  %v3461_v38 = vpop.f32.mrb[173].mxu0  ;;  %v3563_v2 = vpop.f32.mrb[173].mxu1  ;;  %v5101_v8 = vld [vmem:[#allocation40_spill] sm:$0xff] }
 0x235   :  { %v1429_v40 = vpop.f32.mrb[174].mxu0  ;;  %v1913_v41 = vpop.f32.mrb[174].mxu1 }
 0x236   :  { %v3016_v11 = vpack.c.bf16 %v2207_v63, %v2206_v61  ;;  %v2101_v1 = vmax.f32 %v5088_v51, %v2051_v37  ;;  %v2052_v0 = vmax.f32 %v1429_v40, %v1913_v41  ;;  %v3462_v47 = vpop.f32.mrb[175].mxu0  ;;  %v3564_v21 = vpop.f32.mrb[175].mxu1  ;;  %v5102_v61 = vld [vmem:[#allocation41_spill] sm:$0xff] }
 0x237   :  { %v5103_v63 = vmax.f32 %v5101_v8, %v5102_v61  ;;  %v5104_v21 = vld [vmem:[#allocation42_spill] sm:$0xff] }
 0x238   :  { %3069 = vst [vmem:[%s4906_s3 + $0x88] sm:$0xff] %v3016_v11   ;;  %v2158_v22 = vadd.f32 %v4626_v30, %v2101_v1  ;;  %v2102_v5 = vmax.f32 %v5091_v46, %v2052_v0 }
 0x23a   :  { %v2159_v14 = vadd.f32 %v4626_v30, %v2102_v5  ;;  %v2208_v31 = vmax.f32 %v2158_v22, 0.0  ;;  %v5105_v22 = vld [vmem:[#allocation43_spill] sm:$0xff] }
 0x23b   :  { %v1434_v49 = vpop.f32.mrb[176].mxu0  ;;  %v1918_v50 = vpop.f32.mrb[176].mxu1  ;;  %v5106_v4 = vmax.f32 %v5104_v21, %v5105_v22 }
 0x23c   :  { %v2209_v32 = vmax.f32 %v2159_v14, 0.0  ;;  %v2053_v48 = vmax.f32 %v1434_v49, %v1918_v50  ;;  %v3465_v36 = vpop.f32.mrb[177].mxu0  ;;  %v3567_v59 = vpop.f32.mrb[177].mxu1  ;;  %v5107_v50 = vld [vmem:[#allocation44_spill] sm:$0xff] }
 0x23d   :  { %v1437_v54 = vpop.f32.mrb[178].mxu0  ;;  %v1921_v24 = vpop.f32.mrb[178].mxu1 }
 0x23e   :  { %v3021_v25 = vpack.c.bf16 %v2209_v32, %v2208_v31  ;;  %v2103_v43 = vmax.f32 %v5094_v39, %v2053_v48  ;;  %v2054_v28 = vmax.f32 %v1437_v54, %v1921_v24  ;;  %v3466_v52 = vpop.f32.mrb[179].mxu0  ;;  %v3568_v53 = vpop.f32.mrb[179].mxu1  ;;  %v5108_v31 = vld [vmem:[#allocation45_spill] sm:$0xff] }
 0x23f   :  { %v5109_v32 = vmax.f32 %v5107_v50, %v5108_v31  ;;  %v5110_v53 = vld [vmem:[#allocation46_spill] sm:$0xff] }
 0x240   :  { %3070 = vst [vmem:[%s4906_s3 + $0x90] sm:$0xff] %v3021_v25   ;;  %v2160_v29 = vadd.f32 %v4626_v30, %v2103_v43  ;;  %v2104_v44 = vmax.f32 %v5097_v18, %v2054_v28 }
 0x242   :  { %v2161_v27 = vadd.f32 %v4626_v30, %v2104_v44  ;;  %v2210_v55 = vmax.f32 %v2160_v29, 0.0  ;;  %v5111_v29 = vld [vmem:[#allocation47_spill] sm:$0xff] }
 0x243   :  { %v1442_v12 = vpop.f32.mrb[180].mxu0  ;;  %v1926_v62 = vpop.f32.mrb[180].mxu1  ;;  %v5112_v10 = vmax.f32 %v5110_v53, %v5111_v29 }
 0x244   :  { %v2211_v56 = vmax.f32 %v2161_v27, 0.0  ;;  %v2055_v57 = vmax.f32 %v1442_v12, %v1926_v62  ;;  %v3469_v58 = vpop.f32.mrb[181].mxu0  ;;  %v3571_v23 = vpop.f32.mrb[181].mxu1  ;;  %v5113_v62 = vld [vmem:[#allocation48_spill] sm:$0xff] }
 0x245   :  { %v1445_v33 = vpop.f32.mrb[182].mxu0  ;;  %v1929_v34 = vpop.f32.mrb[182].mxu1 }
 0x246   :  { %v3026_v20 = vpack.c.bf16 %v2211_v56, %v2210_v55  ;;  %v2105_v35 = vmax.f32 %v5100_v42, %v2055_v57  ;;  %v2056_v60 = vmax.f32 %v1445_v33, %v1929_v34  ;;  %v3470_v16 = vpop.f32.mrb[183].mxu0  ;;  %v3572_v17 = vpop.f32.mrb[183].mxu1  ;;  %v5114_v55 = vld [vmem:[#allocation49_spill] sm:$0xff] }
 0x247   :  { %v5115_v56 = vmax.f32 %v5113_v62, %v5114_v55  ;;  %v5116_v17 = vld [vmem:[#allocation50_spill] sm:$0xff] }
 0x248   :  { %3071 = vst [vmem:[%s4906_s3 + $0x98] sm:$0xff] %v3026_v20   ;;  %v2162_v7 = vadd.f32 %v4626_v30, %v2105_v35  ;;  %v2106_v37 = vmax.f32 %v5103_v63, %v2056_v60 }
 0x24a   :  { %v2163_v38 = vadd.f32 %v4626_v30, %v2106_v37  ;;  %v2212_v41 = vmax.f32 %v2162_v7, 0.0  ;;  %v5117_v7 = vld [vmem:[#allocation51_spill] sm:$0xff] }
 0x24b   :  { %v1450_v2 = vpop.f32.mrb[184].mxu0  ;;  %v1934_v40 = vpop.f32.mrb[184].mxu1  ;;  %v5118_v8 = vmax.f32 %v5116_v17, %v5117_v7 }
 0x24c   :  { %v2213_v11 = vmax.f32 %v2163_v38, 0.0  ;;  %v2057_v15 = vmax.f32 %v1450_v2, %v1934_v40  ;;  %v3473_v19 = vpop.f32.mrb[185].mxu0  ;;  %v3575_v51 = vpop.f32.mrb[185].mxu1  ;;  %v5119_v40 = vld [vmem:[#allocation52_spill] sm:$0xff] }
 0x24d   :  { %v1453_v1 = vpop.f32.mrb[186].mxu0  ;;  %v1937_v0 = vpop.f32.mrb[186].mxu1 }
 0x24e   :  { %v3031_v47 = vpack.c.bf16 %v2213_v11, %v2212_v41  ;;  %v2107_v45 = vmax.f32 %v5106_v4, %v2057_v15  ;;  %v2058_v46 = vmax.f32 %v1453_v1, %v1937_v0  ;;  %v3474_v5 = vpop.f32.mrb[187].mxu0  ;;  %v3576_v14 = vpop.f32.mrb[187].mxu1  ;;  %v5120_v41 = vld [vmem:[#allocation53_spill] sm:$0xff] }
 0x24f   :  { %v5121_v11 = vmax.f32 %v5119_v40, %v5120_v41  ;;  %v5122_v14 = vld [vmem:[#allocation54_spill] sm:$0xff] }
 0x250   :  { %3072 = vst [vmem:[%s4906_s3 + $0xa0] sm:$0xff] %v3031_v47   ;;  %v2164_v49 = vadd.f32 %v4626_v30, %v2107_v45  ;;  %v2108_v48 = vmax.f32 %v5109_v32, %v2058_v46 }
 0x252   :  { %v2165_v36 = vadd.f32 %v4626_v30, %v2108_v48  ;;  %v2214_v24 = vmax.f32 %v2164_v49, 0.0  ;;  %v5123_v49 = vld [vmem:[#allocation55_spill] sm:$0xff] }
 0x253   :  { %v1458_v59 = vpop.f32.mrb[188].mxu0  ;;  %v1942_v54 = vpop.f32.mrb[188].mxu1  ;;  %v5124_v50 = vmax.f32 %v5122_v14, %v5123_v49 }
 0x254   :  { %v2215_v25 = vmax.f32 %v2165_v36, 0.0  ;;  %v2059_v6 = vmax.f32 %v1458_v59, %v1942_v54  ;;  %v3477_v9 = vpop.f32.mrb[189].mxu0  ;;  %v3579_v39 = vpop.f32.mrb[189].mxu1  ;;  %v5125_v54 = vld [vmem:[#allocation56_spill] sm:$0xff] }
 0x255   :  { %v1461_v43 = vpop.f32.mrb[190].mxu0  ;;  %v1945_v28 = vpop.f32.mrb[190].mxu1 }
 0x256   :  { %v3036_v52 = vpack.c.bf16 %v2215_v25, %v2214_v24  ;;  %v2109_v26 = vmax.f32 %v5112_v10, %v2059_v6  ;;  %v2060_v18 = vmax.f32 %v1461_v43, %v1945_v28  ;;  %v3478_v44 = vpop.f32.mrb[191].mxu0  ;;  %v3580_v27 = vpop.f32.mrb[191].mxu1  ;;  %v5126_v24 = vld [vmem:[#allocation57_spill] sm:$0xff] }
 0x257   :  { %v5127_v25 = vmax.f32 %v5125_v54, %v5126_v24 }
 0x258   :  { %3073 = vst [vmem:[%s4906_s3 + $0xa8] sm:$0xff] %v3036_v52   ;;  %v2166_v12 = vadd.f32 %v4626_v30, %v2109_v26  ;;  %v2110_v57 = vmax.f32 %v5115_v56, %v2060_v18 }
 0x25a   :  { %v2167_v58 = vadd.f32 %v4626_v30, %v2110_v57  ;;  %v2216_v34 = vmax.f32 %v2166_v12, 0.0 }
 0x25b   :  { %v1466_v23 = vpop.f32.mrb[192].mxu0  ;;  %v1950_v33 = vpop.f32.mrb[192].mxu1 }
 0x25c   :  { %v2217_v20 = vmax.f32 %v2167_v58, 0.0  ;;  %v2061_v3 = vmax.f32 %v1466_v23, %v1950_v33  ;;  %v3481_v13 = vpop.f32.mrb[193].mxu0  ;;  %v3583_v42 = vpop.f32.mrb[193].mxu1 }
 0x25d   :  { %v1469_v35 = vpop.f32.mrb[194].mxu0  ;;  %v1953_v60 = vpop.f32.mrb[194].mxu1 }
 0x25e   :  { %v3041_v16 = vpack.c.bf16 %v2217_v20, %v2216_v34  ;;  %v2111_v61 = vmax.f32 %v5118_v8, %v2061_v3  ;;  %v2062_v63 = vmax.f32 %v1469_v35, %v1953_v60  ;;  %v3482_v37 = vpop.f32.mrb[195].mxu0  ;;  %v3584_v38 = vpop.f32.mrb[195].mxu1 }
 0x260   :  { %3074 = vst [vmem:[%s4906_s3 + $0xb0] sm:$0xff] %v3041_v16   ;;  %v2168_v2 = vadd.f32 %v4626_v30, %v2111_v61  ;;  %v2112_v15 = vmax.f32 %v5121_v11, %v2062_v63 }
 0x262   :  { %v2169_v19 = vadd.f32 %v4626_v30, %v2112_v15  ;;  %v2218_v0 = vmax.f32 %v2168_v2, 0.0 }
 0x263   :  { %v1474_v51 = vpop.f32.mrb[196].mxu0  ;;  %v1958_v1 = vpop.f32.mrb[196].mxu1 }
 0x264   :  { %v2219_v47 = vmax.f32 %v2169_v19, 0.0  ;;  %v2063_v21 = vmax.f32 %v1474_v51, %v1958_v1  ;;  %v3485_v22 = vpop.f32.mrb[197].mxu0  ;;  %v3587_v4 = vpop.f32.mrb[197].mxu1 }
 0x265   :  { %v1477_v45 = vpop.f32.mrb[198].mxu0  ;;  %v1961_v46 = vpop.f32.mrb[198].mxu1 }
 0x266   :  { %v3046_v5 = vpack.c.bf16 %v2219_v47, %v2218_v0  ;;  %v2113_v31 = vmax.f32 %v5124_v50, %v2063_v21  ;;  %v2064_v32 = vmax.f32 %v1477_v45, %v1961_v46  ;;  %v3486_v48 = vpop.f32.mrb[199].mxu0  ;;  %v3588_v36 = vpop.f32.mrb[199].mxu1 }
 0x268   :  { %3075 = vst [vmem:[%s4906_s3 + $0xb8] sm:$0xff] %v3046_v5   ;;  %v2170_v59 = vadd.f32 %v4626_v30, %v2113_v31  ;;  %v2114_v6 = vmax.f32 %v5127_v25, %v2064_v32 }
 0x26a   :  { %v2171_v9 = vadd.f32 %v4626_v30, %v2114_v6  ;;  %v2220_v39 = vmax.f32 %v2170_v59, 0.0 }
 0x26c   :  { %v2221_v43 = vmax.f32 %v2171_v9, 0.0 }
 0x26e   :  { %v3051_v28 = vpack.c.bf16 %v2221_v43, %v2220_v39 }
 0x270   :  { %3076 = vst [vmem:[%s4906_s3 + $0xc0] sm:$0xff] %v3051_v28  }

// kernel: emnist_cnn_forward.4
= control target key start
LH: loop header
LB: loop body
LE: loop exit
PB: predicated region body
PF: predicated region fallthrough
CT: control target
= control target key end

     0   :  { %v2437_v1 = vmov 0.0   ;;  %vm2438_vm0 = vmmov 0   ;;  %vm305_vm1 = vcmask 1046528   ;;  %vm283_vm2 = vcmask 113664   ;;  %s3180_s1 = inlined_call_operand.vmem [shape: bf16[270,128], index: 1, kind: input, shape index: {}]   ;;  %s3181_s0 = inlined_call_operand.vmem [shape: bf16[4,112,270], index: 0, kind: input, shape index: {}]   ;;  %s3182_s2 = inlined_call_operand.vmem [shape: f32[1,128], index: 2, kind: input, shape index: {}]   ;;  %s3183_s3 = inlined_call_operand.vmem [shape: bf16[112,128], index: 3, kind: output, shape index: {}]  }
   0x1   :  { %v2462_v0 = vld [vmem:[%s3180_s1 + $0x40] sm:$0xff]   ;;  %2184 = vmatprep.subr.bf16.mxu1 %v2437_v1  ;;  %2186 = vmatprep.mubr.msk.bf16.mxu1 %vm2438_vm0, %v2437_v1  ;;  %v2480_v4 = vld [vmem:[%s3180_s1 + $0x48] sm:$0xff]   ;;  %v2497_v8 = vld [vmem:[%s3180_s1 + $0x50] sm:$0xff]  }
   0x2   :  { %v2470_v2 = vld [vmem:[%s3180_s1] sm:$0xff]   ;;  %1920 = vmatprep.subr.bf16.mxu0 %v2462_v0  ;;  %v2487_v6 = vld [vmem:[%s3180_s1 + $0x8] sm:$0xff]   ;;  %v2504_v9 = vld [vmem:[%s3180_s1 + $0x10] sm:$0xff]  }
   0x3   :  { %v2310_v3 = vld [vmem:[%s3180_s1 + $0x80] sm:$0x7f]   ;;  %1921 = vmatpush3.bf16.msra.mxu0 %v2470_v2  ;;  %v2312_v7 = vld [vmem:[%s3181_s0 + $0x8] ss:$12 sps:$4 sm:$0xff]   ;;  %v2511_v10 = vld [vmem:[%s3180_s1 + $0x58] sm:$0xff]  }
   0x4   :  { %v2482_v5 = vsel %vm305_vm1, %v2310_v3, 0  ;;  %1922 = vmatprep.subr.bf16.mxu0 %v2480_v4  ;;  %v2317_v11 = vld [vmem:[%s3181_s0 + $0x20] ss:$12 sps:$4 sm:$0xff]   ;;  %v2524_v12 = vld [vmem:[%s3180_s1 + $0x18] sm:$0xff]   ;;  %v2564_v18 = vld [vmem:[%s3180_s1 + $0x70] sm:$0xff]  }
   0x5   :  { %2185 = vmatpush3.bf16.msra.mxu1 %v2482_v5  ;;  %v2530_v13 = vld [vmem:[%s3180_s1 + $0x60] sm:$0xff]   ;;  %v2545_v15 = vld [vmem:[%s3180_s1 + $0x68] sm:$0xff]   ;;  %v2575_v20 = vld [vmem:[%s3180_s1 + $0x30] sm:$0xff]  }
   0x6   :  { %1986 = vmatprep.subr.bf16.mxu1 %v2462_v0  ;;  %v2538_v14 = vld [vmem:[%s3180_s1 + $0x20] sm:$0xff]   ;;  %v2558_v17 = vld [vmem:[%s3180_s1 + $0x28] sm:$0xff]   ;;  %v2582_v21 = vld [vmem:[%s3180_s1 + $0x78] sm:$0xff]  }
   0x7   :  { %1923 = vmatpush3.bf16.msra.mxu0 %v2487_v6  ;;  %v2322_v16 = vld [vmem:[%s3181_s0 + $0x38] ss:$12 sps:$4 sm:$0xff]   ;;  %v2327_v23 = vld [vmem:[%s3181_s0 + $0x50] ss:$12 sps:$4 sm:$0xff]   ;;  %v2329_v24 = vld [vmem:[%s3181_s0] ss:$12 sps:$4 sm:$0xff]  }
   0x8   :  { %2187 = vmatmul.mubr.msk.bf16.vlgmr.msra.gmra.mrb[0].mxu1 %vm283_vm2, %v2312_v7  ;;  %1924 = vmatprep.subr.bf16.mxu0 %v2497_v8  ;;  %v2331_v19 = vld [vmem:[%s3181_s0 + $0x4] ss:$12 sps:$4 sm:$0xff]   ;;  %v2591_v22 = vld [vmem:[%s3180_s1 + $0x38] sm:$0xff]   ;;  %v2332_v26 = vld [vmem:[%s3181_s0 + $0x68] ss:$12 sps:$4 sm:$0xff]  }
   0x9   :  { %2190 = vmatprep.mubr.msk.bf16.mxu1 %vm2438_vm0, %v2437_v1  ;;  %1987 = vmatpush3.bf16.msra.mxu1 %v2470_v2  ;;  %v2333_v25 = vld [vmem:[%s3181_s0 + $0x1c] ss:$12 sps:$4 sm:$0xff]   ;;  %v2335_v27 = vld [vmem:[%s3181_s0 + $0x18] ss:$12 sps:$4 sm:$0xff]   ;;  %v2337_v28 = vld [vmem:[%s3181_s0 + $0x34] ss:$12 sps:$4 sm:$0xff]  }
   0xa   :  { %1988 = vmatprep.subr.bf16.mxu1 %v2480_v4  ;;  %341 = vmatprep.mubr.bf16.mxu0 %v2331_v19  ;;  %v2336_v29 = vld [vmem:[%s3181_s0 + $0x80] ss:$12 sps:$4 sm:$0xff]   ;;  %v2339_v30 = vld [vmem:[%s3181_s0 + $0x30] ss:$12 sps:$4 sm:$0xff]   ;;  %v2340_v32 = vld [vmem:[%s3181_s0 + $0x98] ss:$12 sps:$4 sm:$0xff]  }
   0xb   :  { %1925 = vmatpush3.bf16.msra.mxu0 %v2504_v9  ;;  %v2341_v31 = vld [vmem:[%s3181_s0 + $0x4c] ss:$12 sps:$4 sm:$0xff]   ;;  %v2343_v34 = vld [vmem:[%s3181_s0 + $0x48] ss:$12 sps:$4 sm:$0xff]   ;;  %v2347_v35 = vld [vmem:[%s3181_s0 + $0x64] ss:$12 sps:$4 sm:$0xff]  }
   0xc   :  { %1926 = vmatprep.subr.bf16.mxu0 %v2511_v10  ;;  %v2346_v33 = vld [vmem:[%s3181_s0 + $0xac] ss:$12 sps:$4 sm:$0xff]   ;;  %v2344_v36 = vld [vmem:[%s3181_s0 + $0xa8] ss:$12 sps:$4 sm:$0xff]   ;;  %v2350_v37 = vld [vmem:[%s3181_s0 + $0xc4] ss:$12 sps:$4 sm:$0xff]  }
   0xd   :  { %1989 = vmatpush3.bf16.msra.mxu1 %v2487_v6  ;;  %v2349_v38 = vld [vmem:[%s3181_s0 + $0x60] ss:$12 sps:$4 sm:$0xff]   ;;  %v2353_v39 = vld [vmem:[%s3181_s0 + $0x7c] ss:$12 sps:$4 sm:$0xff]   ;;  %v2355_v42 = vld [vmem:[%s3181_s0 + $0x78] ss:$12 sps:$4 sm:$0xff]  }
   0xe   :  { %1990 = vmatprep.subr.bf16.mxu1 %v2497_v8  ;;  %v2352_v40 = vld [vmem:[%s3181_s0 + $0xc0] ss:$12 sps:$4 sm:$0xff]   ;;  %v2356_v41 = vld [vmem:[%s3181_s0 + $0xdc] ss:$12 sps:$4 sm:$0xff]   ;;  %v2358_v44 = vld [vmem:[%s3181_s0 + $0xd8] ss:$12 sps:$4 sm:$0xff]  }
   0xf   :  { %1927 = vmatpush3.bf16.msra.mxu0 %v2524_v12  ;;  %v2359_v43 = vld [vmem:[%s3181_s0 + $0x94] ss:$12 sps:$4 sm:$0xff]   ;;  %v2361_v46 = vld [vmem:[%s3181_s0 + $0x90] ss:$12 sps:$4 sm:$0xff]   ;;  %v2366_v48 = vld [vmem:[%s3181_s0 + $0x10c] ss:$12 sps:$4 sm:$0xff]  }
  0x10   :  { %2191 = vmatmul.mubr.msk.bf16.gmra.mrb[4].mxu1 %vm283_vm2, %v2317_v11  ;;  %1928 = vmatprep.subr.bf16.mxu0 %v2530_v13  ;;  %v2362_v45 = vld [vmem:[%s3181_s0 + $0xf4] ss:$12 sps:$4 sm:$0xff]   ;;  %v2364_v47 = vld [vmem:[%s3181_s0 + $0xf0] ss:$12 sps:$4 sm:$0xff]   ;;  %v2376_v56 = vld [vmem:[%s3181_s0 + $0x138] ss:$12 sps:$4 sm:$0xff]  }
  0x11   :  { %2194 = vmatprep.mubr.msk.bf16.mxu1 %vm2438_vm0, %v2437_v1  ;;  %1991 = vmatpush3.bf16.msra.mxu1 %v2504_v9  ;;  %v2365_v49 = vld [vmem:[%s3181_s0 + $0xb0] ss:$12 sps:$4 sm:$0xff]   ;;  %v2368_v50 = vld [vmem:[%s3181_s0 + $0x108] ss:$12 sps:$4 sm:$0xff]   ;;  %v2372_v53 = vld [vmem:[%s3181_s0 + $0x120] ss:$12 sps:$4 sm:$0xff]  }
  0x12   :  { %1992 = vmatprep.subr.bf16.mxu1 %v2511_v10  ;;  %v2370_v51 = vld [vmem:[%s3181_s0 + $0x124] ss:$12 sps:$4 sm:$0xff]   ;;  %v2369_v52 = vld [vmem:[%s3181_s0 + $0xc8] ss:$12 sps:$4 sm:$0xff]   ;;  %v2373_v55 = vld [vmem:[%s3181_s0 + $0xe0] ss:$12 sps:$4 sm:$0xff]  }
  0x13   :  { %1929 = vmatpush3.bf16.msra.mxu0 %v2538_v14  ;;  %v2374_v54 = vld [vmem:[%s3181_s0 + $0x13c] ss:$12 sps:$4 sm:$0xff]   ;;  %v2380_v57 = vld [vmem:[%s3181_s0 + $0x154] ss:$12 sps:$4 sm:$0xff]   ;;  %v2377_v58 = vld [vmem:[%s3181_s0 + $0xf8] ss:$12 sps:$4 sm:$0xff]  }
  0x14   :  { %1930 = vmatprep.subr.bf16.mxu0 %v2545_v15  ;;  %v2378_v59 = vld [vmem:[%s3181_s0 + $0x150] ss:$12 sps:$4 sm:$0xff]   ;;  %v2382_v60 = vld [vmem:[%s3181_s0 + $0x16c] ss:$12 sps:$4 sm:$0xff]   ;;  %v2384_v62 = vld [vmem:[%s3181_s0 + $0x168] ss:$12 sps:$4 sm:$0xff]  }
  0x15   :  { %1993 = vmatpush3.bf16.msra.mxu1 %v2524_v12  ;;  %v2381_v61 = vld [vmem:[%s3181_s0 + $0x110] ss:$12 sps:$4 sm:$0xff]   ;;  %v2394_v7 = vld [vmem:[%s3181_s0 + $0x1b4] ss:$12 sps:$4 sm:$0xff]  }
  0x16   :  { %1994 = vmatprep.subr.bf16.mxu1 %v2530_v13  ;;  %v2386_v63 = vld [vmem:[%s3181_s0 + $0x184] ss:$12 sps:$4 sm:$0xff]   ;;  %v2390_v3 = vld [vmem:[%s3181_s0 + $0x19c] ss:$12 sps:$4 sm:$0xff]   ;;  %v2410_v19 = vld [vmem:[%s3181_s0 + $0x214] ss:$12 sps:$4 sm:$0xff]  }
  0x17   :  { %1931 = vmatpush3.bf16.msra.mxu0 %v2558_v17  ;;  %v2397_v11 = vld [vmem:[%s3181_s0 + $0x170] ss:$12 sps:$4 sm:$0xff]  }
  0x18   :  { %2195 = vmatmul.mubr.msk.bf16.gmra.mrb[8].mxu1 %vm283_vm2, %v2322_v16  ;;  %1932 = vmatprep.subr.bf16.mxu0 %v2564_v18  ;;  %v2408_v16 = vld [vmem:[%s3181_s0 + $0x1fc] ss:$12 sps:$4 sm:$0xff]  }
  0x19   :  { %2198 = vmatprep.mubr.msk.bf16.mxu1 %vm2438_vm0, %v2437_v1  ;;  %1995 = vmatpush3.bf16.msra.mxu1 %v2538_v14 }
  0x1a   :  { %1996 = vmatprep.subr.bf16.mxu1 %v2545_v15 }
  0x1b   :  { %1933 = vmatpush3.bf16.msra.mxu0 %v2575_v20 }
  0x1c   :  { %1934 = vmatprep.subr.bf16.mxu0 %v2582_v21 }
  0x1d   :  { %1997 = vmatpush3.bf16.msra.mxu1 %v2558_v17 }
  0x1e   :  { %1998 = vmatprep.subr.bf16.mxu1 %v2564_v18 }
  0x1f   :  { %1935 = vmatpush3.bf16.msra.mxu0 %v2591_v22 }
  0x20   :  { %2199 = vmatmul.mubr.msk.bf16.gmra.mrb[12].mxu1 %vm283_vm2, %v2327_v23  ;;  %2214 = vmatprep.subr.bf16.mxu0 %v2437_v1  ;;  %v2413_v23 = vld [vmem:[%s3181_s0 + $0x1d0] ss:$12 sps:$4 sm:$0xff]  }
  0x21   :  { %2202 = vmatprep.mubr.msk.bf16.mxu1 %vm2438_vm0, %v2437_v1  ;;  %1999 = vmatpush3.bf16.msra.mxu1 %v2575_v20 }
  0x22   :  { %342 = vmatmul.mubr.bf16.vlgmr.msra.gmra.mrb[0].mxu0 %v2329_v24  ;;  %2000 = vmatprep.subr.bf16.mxu1 %v2582_v21  ;;  %v2418_v24 = vld [vmem:[%s3181_s0 + $0x244] ss:$12 sps:$4 sm:$0xff]  }
  0x23   :  { %2215 = vmatpush3.bf16.msra.mxu0 %v2482_v5  ;;  %349 = vmatprep.mubr.bf16.mxu0 %v2333_v25  ;;  %v2417_v25 = vld [vmem:[%s3181_s0 + $0x1e8] ss:$12 sps:$4 sm:$0xff]  }
  0x24   :  { %2244 = vmatprep.subr.bf16.mxu0 %v2437_v1 }
  0x25   :  { %2001 = vmatpush3.bf16.msra.mxu1 %v2591_v22 }
  0x26   :  { %2052 = vmatprep.subr.bf16.mxu1 %v2462_v0 }
  0x28   :  { %2203 = vmatmul.mubr.msk.bf16.gmra.mrb[16].mxu1 %vm283_vm2, %v2332_v26  ;;  %v2420_v26 = vld [vmem:[%s3181_s0 + $0x240] ss:$12 sps:$4 sm:$0xff]  }
  0x29   :  { %2206 = vmatprep.mubr.msk.bf16.mxu1 %vm2438_vm0, %v2437_v1 }
  0x2a   :  { %350 = vmatmul.mubr.bf16.gmra.mrb[4].mxu0 %v2335_v27  ;;  %v2422_v27 = vld [vmem:[%s3181_s0 + $0x25c] ss:$12 sps:$4 sm:$0xff]  }
  0x2b   :  { %357 = vmatprep.mubr.bf16.mxu0 %v2337_v28  ;;  %v2421_v28 = vld [vmem:[%s3181_s0 + $0x200] ss:$12 sps:$4 sm:$0xff]  }
  0x30   :  { %2207 = vmatmul.mubr.msk.bf16.gmra.mrb[20].mxu1 %vm283_vm2, %v2336_v29  ;;  %v2424_v29 = vld [vmem:[%s3181_s0 + $0x258] ss:$12 sps:$4 sm:$0xff]  }
  0x31   :  { %2210 = vmatprep.mubr.msk.bf16.mxu1 %vm2438_vm0, %v2437_v1 }
  0x32   :  { %358 = vmatmul.mubr.bf16.gmra.mrb[8].mxu0 %v2339_v30  ;;  %v2426_v30 = vld [vmem:[%s3181_s0 + $0x274] ss:$12 sps:$4 sm:$0xff]  }
  0x33   :  { %365 = vmatprep.mubr.bf16.mxu0 %v2341_v31  ;;  %v2425_v31 = vld [vmem:[%s3181_s0 + $0x218] ss:$12 sps:$4 sm:$0xff]  }
  0x38   :  { %2211 = vmatmul.mubr.msk.bf16.gmra.mrb[24].mxu1 %vm283_vm2, %v2340_v32  ;;  %v2428_v32 = vld [vmem:[%s3181_s0 + $0x270] ss:$12 sps:$4 sm:$0xff]  }
  0x39   :  { %674 = vmatprep.mubr.bf16.mxu1 %v2346_v33  ;;  %v2430_v33 = vld [vmem:[%s3181_s0 + $0x28c] ss:$12 sps:$4 sm:$0xff]  }
  0x3a   :  { %366 = vmatmul.mubr.bf16.gmra.mrb[12].mxu0 %v2343_v34  ;;  %v2429_v34 = vld [vmem:[%s3181_s0 + $0x230] ss:$12 sps:$4 sm:$0xff]  }
  0x3b   :  { %373 = vmatprep.mubr.bf16.mxu0 %v2347_v35 }
  0x40   :  { %675 = vmatmul.mubr.bf16.vlgmr.msra.gmra.mrb[28].mxu1 %v2344_v36  ;;  %v2432_v36 = vld [vmem:[%s3181_s0 + $0x288] ss:$12 sps:$4 sm:$0xff]  }
  0x41   :  { %682 = vmatprep.mubr.bf16.mxu1 %v2350_v37  ;;  %2053 = vmatpush3.bf16.msra.mxu1 %v2470_v2 }
  0x42   :  { %374 = vmatmul.mubr.bf16.gmra.mrb[16].mxu0 %v2349_v38  ;;  %2054 = vmatprep.subr.bf16.mxu1 %v2480_v4 }
  0x43   :  { %381 = vmatprep.mubr.bf16.mxu0 %v2353_v39  ;;  %v2433_v39 = vld [vmem:[%s3181_s0 + $0x248] ss:$12 sps:$4 sm:$0xff]  }
  0x45   :  { %2055 = vmatpush3.bf16.msra.mxu1 %v2487_v6 }
  0x46   :  { %2056 = vmatprep.subr.bf16.mxu1 %v2497_v8 }
  0x48   :  { %683 = vmatmul.mubr.bf16.gmra.mrb[32].mxu1 %v2352_v40 }
  0x49   :  { %690 = vmatprep.mubr.bf16.mxu1 %v2356_v41  ;;  %2057 = vmatpush3.bf16.msra.mxu1 %v2504_v9 }
  0x4a   :  { %382 = vmatmul.mubr.bf16.gmra.mrb[20].mxu0 %v2355_v42  ;;  %2058 = vmatprep.subr.bf16.mxu1 %v2511_v10  ;;  %v2434_v42 = vld [vmem:[%s3181_s0 + $0x290] ss:$12 sps:$4 sm:$0xff]  }
  0x4b   :  { %389 = vmatprep.mubr.bf16.mxu0 %v2359_v43 }
  0x4d   :  { %2059 = vmatpush3.bf16.msra.mxu1 %v2524_v12 }
  0x4e   :  { %2060 = vmatprep.subr.bf16.mxu1 %v2530_v13 }
  0x50   :  { %691 = vmatmul.mubr.bf16.gmra.mrb[36].mxu1 %v2358_v44 }
  0x51   :  { %698 = vmatprep.mubr.bf16.mxu1 %v2362_v45  ;;  %2061 = vmatpush3.bf16.msra.mxu1 %v2538_v14  ;;  %v2435_v45 = vld [vmem:[%s3181_s0 + $0x260] ss:$12 sps:$4 sm:$0xff]  }
  0x52   :  { %390 = vmatmul.mubr.bf16.gmra.mrb[24].mxu0 %v2361_v46  ;;  %2062 = vmatprep.subr.bf16.mxu1 %v2545_v15 }
  0x53   :  { %2216 = vmatprep.mubr.msk.bf16.mxu0 %vm2438_vm0, %v2437_v1 }
  0x55   :  { %2063 = vmatpush3.bf16.msra.mxu1 %v2558_v17 }
  0x56   :  { %2064 = vmatprep.subr.bf16.mxu1 %v2564_v18 }
  0x58   :  { %699 = vmatmul.mubr.bf16.gmra.mrb[40].mxu1 %v2364_v47 }
  0x59   :  { %706 = vmatprep.mubr.bf16.mxu1 %v2366_v48  ;;  %2065 = vmatpush3.bf16.msra.mxu1 %v2575_v20 }
  0x5a   :  { %2217 = vmatmul.mubr.msk.bf16.vlgmr.msra.gmra.mrb[28].mxu0 %vm283_vm2, %v2365_v49  ;;  %2066 = vmatprep.subr.bf16.mxu1 %v2582_v21 }
  0x5b   :  { %2245 = vmatpush3.bf16.msra.mxu0 %v2482_v5  ;;  %2220 = vmatprep.mubr.msk.bf16.mxu0 %vm2438_vm0, %v2437_v1 }
  0x5c   :  { %2274 = vmatprep.subr.bf16.mxu0 %v2437_v1 }
  0x5d   :  { %2067 = vmatpush3.bf16.msra.mxu1 %v2591_v22 }
  0x5e   :  { %2118 = vmatprep.subr.bf16.mxu1 %v2462_v0  ;;  %v2385_v0 = vld [vmem:[%s3181_s0 + $0x128] ss:$12 sps:$4 sm:$0xff]  }
  0x60   :  { %707 = vmatmul.mubr.bf16.gmra.mrb[44].mxu1 %v2368_v50  ;;  %v2436_v50 = vld [vmem:[%s3181_s0 + $0x278] ss:$12 sps:$4 sm:$0xff]  }
  0x61   :  { %714 = vmatprep.mubr.bf16.mxu1 %v2370_v51 }
  0x62   :  { %2221 = vmatmul.mubr.msk.bf16.gmra.mrb[32].mxu0 %vm283_vm2, %v2369_v52 }
  0x63   :  { %2224 = vmatprep.mubr.msk.bf16.mxu0 %vm2438_vm0, %v2437_v1 }
  0x68   :  { %715 = vmatmul.mubr.bf16.gmra.mrb[48].mxu1 %v2372_v53 }
  0x69   :  { %722 = vmatprep.mubr.bf16.mxu1 %v2374_v54 }
  0x6a   :  { %2225 = vmatmul.mubr.msk.bf16.gmra.mrb[36].mxu0 %vm283_vm2, %v2373_v55 }
  0x6b   :  { %2228 = vmatprep.mubr.msk.bf16.mxu0 %vm2438_vm0, %v2437_v1 }
  0x70   :  { %723 = vmatmul.mubr.bf16.gmra.mrb[52].mxu1 %v2376_v56 }
  0x71   :  { %1007 = vmatprep.mubr.bf16.mxu1 %v2380_v57 }
  0x72   :  { %2229 = vmatmul.mubr.msk.bf16.gmra.mrb[40].mxu0 %vm283_vm2, %v2377_v58 }
  0x73   :  { %2232 = vmatprep.mubr.msk.bf16.mxu0 %vm2438_vm0, %v2437_v1 }
  0x78   :  { %1008 = vmatmul.mubr.bf16.vlgmr.msra.gmra.mrb[56].mxu1 %v2378_v59 }
  0x79   :  { %1015 = vmatprep.mubr.bf16.mxu1 %v2382_v60  ;;  %2119 = vmatpush3.bf16.msra.mxu1 %v2470_v2  ;;  %v2388_v2 = vld [vmem:[%s3181_s0 + $0x180] ss:$12 sps:$4 sm:$0xff]  }
  0x7a   :  { %2233 = vmatmul.mubr.msk.bf16.gmra.mrb[44].mxu0 %vm283_vm2, %v2381_v61  ;;  %2120 = vmatprep.subr.bf16.mxu1 %v2480_v4  ;;  %v2389_v4 = vld [vmem:[%s3181_s0 + $0x140] ss:$12 sps:$4 sm:$0xff]  }
  0x7b   :  { %2236 = vmatprep.mubr.msk.bf16.mxu0 %vm2438_vm0, %v2437_v1 }
  0x7d   :  { %2121 = vmatpush3.bf16.msra.mxu1 %v2487_v6  ;;  %v2392_v6 = vld [vmem:[%s3181_s0 + $0x198] ss:$12 sps:$4 sm:$0xff]  }
  0x7e   :  { %2122 = vmatprep.subr.bf16.mxu1 %v2497_v8  ;;  %v2393_v8 = vld [vmem:[%s3181_s0 + $0x158] ss:$12 sps:$4 sm:$0xff]  }
  0x80   :  { %1016 = vmatmul.mubr.bf16.gmra.mrb[60].mxu1 %v2384_v62 }
  0x81   :  { %1023 = vmatprep.mubr.bf16.mxu1 %v2386_v63  ;;  %2123 = vmatpush3.bf16.msra.mxu1 %v2504_v9  ;;  %v2396_v9 = vld [vmem:[%s3181_s0 + $0x1b0] ss:$12 sps:$4 sm:$0xff]  }
  0x82   :  { %2237 = vmatmul.mubr.msk.bf16.gmra.mrb[48].mxu0 %vm283_vm2, %v2385_v0  ;;  %2124 = vmatprep.subr.bf16.mxu1 %v2511_v10  ;;  %v2398_v10 = vld [vmem:[%s3181_s0 + $0x1cc] ss:$12 sps:$4 sm:$0xff]  }
  0x83   :  { %2240 = vmatprep.mubr.msk.bf16.mxu0 %vm2438_vm0, %v2437_v1 }
  0x85   :  { %2125 = vmatpush3.bf16.msra.mxu1 %v2524_v12  ;;  %v2400_v12 = vld [vmem:[%s3181_s0 + $0x1c8] ss:$12 sps:$4 sm:$0xff]  }
  0x86   :  { %2126 = vmatprep.subr.bf16.mxu1 %v2530_v13  ;;  %v2402_v13 = vld [vmem:[%s3181_s0 + $0x1e4] ss:$12 sps:$4 sm:$0xff]  }
  0x88   :  { %1024 = vmatmul.mubr.bf16.gmra.mrb[64].mxu1 %v2388_v2 }
  0x89   :  { %1031 = vmatprep.mubr.bf16.mxu1 %v2390_v3  ;;  %2127 = vmatpush3.bf16.msra.mxu1 %v2538_v14  ;;  %v2401_v14 = vld [vmem:[%s3181_s0 + $0x188] ss:$12 sps:$4 sm:$0xff]  }
  0x8a   :  { %2241 = vmatmul.mubr.msk.bf16.gmra.mrb[52].mxu0 %vm283_vm2, %v2389_v4  ;;  %2128 = vmatprep.subr.bf16.mxu1 %v2545_v15  ;;  %v2404_v15 = vld [vmem:[%s3181_s0 + $0x1e0] ss:$12 sps:$4 sm:$0xff]  }
  0x8b   :  { %2246 = vmatprep.mubr.msk.bf16.mxu0 %vm2438_vm0, %v2437_v1 }
  0x8d   :  { %2129 = vmatpush3.bf16.msra.mxu1 %v2558_v17  ;;  %v2405_v17 = vld [vmem:[%s3181_s0 + $0x1a0] ss:$12 sps:$4 sm:$0xff]  }
  0x8e   :  { %2130 = vmatprep.subr.bf16.mxu1 %v2564_v18  ;;  %v2406_v18 = vld [vmem:[%s3181_s0 + $0x1f8] ss:$12 sps:$4 sm:$0xff]  }
  0x90   :  { %1032 = vmatmul.mubr.bf16.gmra.mrb[68].mxu1 %v2392_v6 }
  0x91   :  { %1039 = vmatprep.mubr.bf16.mxu1 %v2394_v7  ;;  %2131 = vmatpush3.bf16.msra.mxu1 %v2575_v20  ;;  %v2409_v20 = vld [vmem:[%s3181_s0 + $0x1b8] ss:$12 sps:$4 sm:$0xff]  }
  0x92   :  { %2247 = vmatmul.mubr.msk.bf16.vlgmr.msra.gmra.mrb[56].mxu0 %vm283_vm2, %v2393_v8  ;;  %2132 = vmatprep.subr.bf16.mxu1 %v2582_v21  ;;  %v2412_v21 = vld [vmem:[%s3181_s0 + $0x210] ss:$12 sps:$4 sm:$0xff]  }
  0x93   :  { %2275 = vmatpush3.bf16.msra.mxu0 %v2482_v5  ;;  %2250 = vmatprep.mubr.msk.bf16.mxu0 %vm2438_vm0, %v2437_v1 }
  0x95   :  { %2133 = vmatpush3.bf16.msra.mxu1 %v2591_v22  ;;  %v2414_v22 = vld [vmem:[%s3181_s0 + $0x22c] ss:$12 sps:$4 sm:$0xff]  }
  0x96   :  { %2304 = vmatprep.subr.bf16.mxu1 %v2437_v1 }
  0x98   :  { %1040 = vmatmul.mubr.bf16.gmra.mrb[72].mxu1 %v2396_v9 }
  0x99   :  { %1047 = vmatprep.mubr.bf16.mxu1 %v2398_v10 }
  0x9a   :  { %2251 = vmatmul.mubr.msk.bf16.gmra.mrb[60].mxu0 %vm283_vm2, %v2397_v11 }
  0x9b   :  { %2254 = vmatprep.mubr.msk.bf16.mxu0 %vm2438_vm0, %v2437_v1 }
  0xa0   :  { %1048 = vmatmul.mubr.bf16.gmra.mrb[76].mxu1 %v2400_v12 }
  0xa1   :  { %1055 = vmatprep.mubr.bf16.mxu1 %v2402_v13 }
  0xa2   :  { %2255 = vmatmul.mubr.msk.bf16.gmra.mrb[64].mxu0 %vm283_vm2, %v2401_v14 }
  0xa3   :  { %2258 = vmatprep.mubr.msk.bf16.mxu0 %vm2438_vm0, %v2437_v1 }
  0xa8   :  { %1056 = vmatmul.mubr.bf16.gmra.mrb[80].mxu1 %v2404_v15 }
  0xa9   :  { %1340 = vmatprep.mubr.bf16.mxu1 %v2408_v16 }
  0xaa   :  { %2259 = vmatmul.mubr.msk.bf16.gmra.mrb[68].mxu0 %vm283_vm2, %v2405_v17 }
  0xab   :  { %2262 = vmatprep.mubr.msk.bf16.mxu0 %vm2438_vm0, %v2437_v1 }
  0xb0   :  { %1341 = vmatmul.mubr.bf16.vlgmr.msra.gmra.mrb[84].mxu1 %v2406_v18 }
  0xb1   :  { %1348 = vmatprep.mubr.bf16.mxu1 %v2410_v19  ;;  %2305 = vmatpush3.bf16.msra.mxu1 %v2482_v5  ;;  %v2416_v5 = vld [vmem:[%s3181_s0 + $0x228] ss:$12 sps:$4 sm:$0xff]  }
  0xb2   :  { %2263 = vmatmul.mubr.msk.bf16.gmra.mrb[72].mxu0 %vm283_vm2, %v2409_v20 }
  0xb3   :  { %2266 = vmatprep.mubr.msk.bf16.mxu0 %vm2438_vm0, %v2437_v1 }
  0xb8   :  { %1349 = vmatmul.mubr.bf16.gmra.mrb[88].mxu1 %v2412_v21 }
  0xb9   :  { %1356 = vmatprep.mubr.bf16.mxu1 %v2414_v22 }
  0xba   :  { %2267 = vmatmul.mubr.msk.bf16.gmra.mrb[76].mxu0 %vm283_vm2, %v2413_v23 }
  0xbb   :  { %2270 = vmatprep.mubr.msk.bf16.mxu0 %vm2438_vm0, %v2437_v1 }
  0xc0   :  { %1357 = vmatmul.mubr.bf16.gmra.mrb[92].mxu1 %v2416_v5 }
  0xc1   :  { %1364 = vmatprep.mubr.bf16.mxu1 %v2418_v24 }
  0xc2   :  { %2271 = vmatmul.mubr.msk.bf16.gmra.mrb[80].mxu0 %vm283_vm2, %v2417_v25 }
  0xc3   :  { %2276 = vmatprep.mubr.msk.bf16.mxu0 %vm2438_vm0, %v2437_v1 }
  0xc8   :  { %1365 = vmatmul.mubr.bf16.gmra.mrb[96].mxu1 %v2420_v26 }
  0xc9   :  { %1372 = vmatprep.mubr.bf16.mxu1 %v2422_v27 }
  0xca   :  { %2277 = vmatmul.mubr.msk.bf16.vlgmr.msra.gmra.mrb[84].mxu0 %vm283_vm2, %v2421_v28 }
  0xcb   :  { %2280 = vmatprep.mubr.msk.bf16.mxu0 %vm2438_vm0, %v2437_v1 }
  0xd0   :  { %1373 = vmatmul.mubr.bf16.gmra.mrb[100].mxu1 %v2424_v29 }
  0xd1   :  { %1380 = vmatprep.mubr.bf16.mxu1 %v2426_v30 }
  0xd2   :  { %2281 = vmatmul.mubr.msk.bf16.gmra.mrb[88].mxu0 %vm283_vm2, %v2425_v31 }
  0xd3   :  { %2284 = vmatprep.mubr.msk.bf16.mxu0 %vm2438_vm0, %v2437_v1 }
  0xd8   :  { %1381 = vmatmul.mubr.bf16.gmra.mrb[104].mxu1 %v2428_v32 }
  0xd9   :  { %1388 = vmatprep.mubr.bf16.mxu1 %v2430_v33 }
  0xda   :  { %2285 = vmatmul.mubr.msk.bf16.gmra.mrb[92].mxu0 %vm283_vm2, %v2429_v34 }
  0xdb   :  { %2288 = vmatprep.mubr.msk.bf16.mxu0 %vm2438_vm0, %v2437_v1  ;;  %v432_v35 = vpop.f32.mrb[0].mxu1 }
  0xdc   :  { %v2188_v37 = vpop.f32.mrb[1].mxu1 }
  0xdd   :  { %v435_v38 = vpop.f32.mrb[2].mxu1 }
  0xde   :  { %v2189_v40 = vpop.f32.mrb[3].mxu1 }
  0xe0   :  { %1389 = vmatmul.mubr.bf16.gmra.mrb[108].mxu1 %v2432_v36 }
  0xe1   :  { %2300 = vmatprep.mubr.msk.bf16.mxu1 %vm2438_vm0, %v2437_v1 }
  0xe2   :  { %2289 = vmatmul.mubr.msk.bf16.gmra.mrb[96].mxu0 %vm283_vm2, %v2433_v39 }
  0xe3   :  { %2292 = vmatprep.mubr.msk.bf16.mxu0 %vm2438_vm0, %v2437_v1  ;;  %v440_v41 = vpop.f32.mrb[4].mxu1 }
  0xe4   :  { %v2192_v43 = vpop.f32.mrb[5].mxu1 }
  0xe5   :  { %v443_v44 = vpop.f32.mrb[6].mxu1 }
  0xe6   :  { %v2193_v46 = vpop.f32.mrb[7].mxu1 }
  0xe8   :  { %2301 = vmatmul.mubr.msk.bf16.vlgmr.msra.gmra.mrb[112].mxu1 %vm283_vm2, %v2434_v42 }
  0xea   :  { %2293 = vmatmul.mubr.msk.bf16.gmra.mrb[100].mxu0 %vm283_vm2, %v2435_v45 }
  0xeb   :  { %2296 = vmatprep.mubr.msk.bf16.mxu0 %vm2438_vm0, %v2437_v1  ;;  %v448_v47 = vpop.f32.mrb[8].mxu1 }
  0xec   :  { %v2196_v48 = vpop.f32.mrb[9].mxu1 }
  0xed   :  { %v451_v49 = vpop.f32.mrb[10].mxu1 }
  0xee   :  { %v2197_v51 = vpop.f32.mrb[11].mxu1 }
  0xf2   :  { %2297 = vmatmul.mubr.msk.bf16.gmra.mrb[104].mxu0 %vm283_vm2, %v2436_v50 }
  0xf3   :  { %v456_v52 = vpop.f32.mrb[12].mxu1 }
  0xf4   :  { %v2200_v53 = vpop.f32.mrb[13].mxu1 }
  0xf5   :  { %v1936_v54 = vpop.f32.mrb[0].mxu0  ;;  %v459_v55 = vpop.f32.mrb[14].mxu1 }
  0xf6   :  { %v1937_v56 = vpop.f32.mrb[1].mxu0  ;;  %v2201_v57 = vpop.f32.mrb[15].mxu1 }
  0xf7   :  { %v1938_v58 = vadd.f32 %v1937_v56, %v1936_v54  ;;  %v1939_v59 = vpop.f32.mrb[2].mxu0 }
  0xf8   :  { %v1940_v60 = vpop.f32.mrb[3].mxu0 }
  0xf9   :  { %v2954_v1 = vadd.f32 %v1938_v58, %v432_v35  ;;  %v1941_v61 = vadd.f32 %v1940_v60, %v1939_v59 }
  0xfb   :  { %v2956_v62 = vadd.f32 %v1941_v61, %v435_v38  ;;  %v464_v63 = vpop.f32.mrb[16].mxu1 }
  0xfc   :  { %v2204_v0 = vpop.f32.mrb[17].mxu1 }
  0xfd   :  { %v1942_v2 = vpop.f32.mrb[4].mxu0  ;;  %v467_v3 = vpop.f32.mrb[18].mxu1 }
  0xfe   :  { %v1943_v4 = vpop.f32.mrb[5].mxu0  ;;  %v2205_v6 = vpop.f32.mrb[19].mxu1 }
  0xff   :  { %v1944_v7 = vadd.f32 %v1943_v4, %v1942_v2  ;;  %v1945_v8 = vpop.f32.mrb[6].mxu0 }
 0x100   :  { %v1946_v9 = vpop.f32.mrb[7].mxu0 }
 0x101   :  { %v2958_v10 = vadd.f32 %v1944_v7, %v440_v41  ;;  %v1947_v11 = vadd.f32 %v1946_v9, %v1945_v8 }
 0x103   :  { %v2960_v12 = vadd.f32 %v1947_v11, %v443_v44  ;;  %v472_v13 = vpop.f32.mrb[20].mxu1 }
 0x104   :  { %v2208_v14 = vpop.f32.mrb[21].mxu1 }
 0x105   :  { %v1948_v15 = vpop.f32.mrb[8].mxu0  ;;  %v475_v16 = vpop.f32.mrb[22].mxu1 }
 0x106   :  { %v1949_v17 = vpop.f32.mrb[9].mxu0  ;;  %v2209_v18 = vpop.f32.mrb[23].mxu1 }
 0x107   :  { %v1950_v19 = vadd.f32 %v1949_v17, %v1948_v15  ;;  %v1951_v20 = vpop.f32.mrb[10].mxu0 }
 0x108   :  { %v1952_v21 = vpop.f32.mrb[11].mxu0 }
 0x109   :  { %v2962_v22 = vadd.f32 %v1950_v19, %v448_v47  ;;  %v1953_v23 = vadd.f32 %v1952_v21, %v1951_v20 }
 0x10b   :  { %v2964_v5 = vadd.f32 %v1953_v23, %v451_v49  ;;  %v480_v24 = vpop.f32.mrb[24].mxu1 }
 0x10c   :  { %v2212_v25 = vpop.f32.mrb[25].mxu1 }
 0x10d   :  { %v1954_v26 = vpop.f32.mrb[12].mxu0  ;;  %v483_v27 = vpop.f32.mrb[26].mxu1 }
 0x10e   :  { %v1955_v28 = vpop.f32.mrb[13].mxu0  ;;  %v2213_v29 = vpop.f32.mrb[27].mxu1 }
 0x10f   :  { %v1956_v30 = vadd.f32 %v1955_v28, %v1954_v26  ;;  %v1957_v31 = vpop.f32.mrb[14].mxu0 }
 0x110   :  { %v1958_v32 = vpop.f32.mrb[15].mxu0 }
 0x111   :  { %v2966_v33 = vadd.f32 %v1956_v30, %v456_v52  ;;  %v1959_v34 = vadd.f32 %v1958_v32, %v1957_v31 }
 0x113   :  { %v2968_v35 = vadd.f32 %v1959_v34, %v459_v55  ;;  %v2002_v36 = vpop.f32.mrb[28].mxu1 }
 0x114   :  { %v2003_v37 = vpop.f32.mrb[29].mxu1 }
 0x115   :  { %v1960_v38 = vpop.f32.mrb[16].mxu0  ;;  %v2004_v39 = vadd.f32 %v2003_v37, %v2002_v36  ;;  %v2005_v40 = vpop.f32.mrb[30].mxu1 }
 0x116   :  { %v1961_v41 = vpop.f32.mrb[17].mxu0  ;;  %v2006_v42 = vpop.f32.mrb[31].mxu1 }
 0x117   :  { %v1962_v43 = vadd.f32 %v1961_v41, %v1960_v38  ;;  %v1963_v44 = vpop.f32.mrb[18].mxu0  ;;  %v2007_v45 = vadd.f32 %v2006_v42, %v2005_v40 }
 0x118   :  { %v1964_v46 = vpop.f32.mrb[19].mxu0 }
 0x119   :  { %v2970_v47 = vadd.f32 %v1962_v43, %v464_v63  ;;  %v1965_v48 = vadd.f32 %v1964_v46, %v1963_v44 }
 0x11b   :  { %v2972_v49 = vadd.f32 %v1965_v48, %v467_v3  ;;  %v2008_v50 = vpop.f32.mrb[32].mxu1 }
 0x11c   :  { %v2009_v51 = vpop.f32.mrb[33].mxu1 }
 0x11d   :  { %v1966_v52 = vpop.f32.mrb[20].mxu0  ;;  %v2010_v53 = vadd.f32 %v2009_v51, %v2008_v50  ;;  %v2011_v54 = vpop.f32.mrb[34].mxu1 }
 0x11e   :  { %v1967_v55 = vpop.f32.mrb[21].mxu0  ;;  %v2012_v56 = vpop.f32.mrb[35].mxu1 }
 0x11f   :  { %v1968_v57 = vadd.f32 %v1967_v55, %v1966_v52  ;;  %v1969_v58 = vpop.f32.mrb[22].mxu0  ;;  %v2013_v59 = vadd.f32 %v2012_v56, %v2011_v54 }
 0x120   :  { %v1970_v60 = vpop.f32.mrb[23].mxu0 }
 0x121   :  { %v2974_v61 = vadd.f32 %v1968_v57, %v472_v13  ;;  %v1971_v0 = vadd.f32 %v1970_v60, %v1969_v58 }
 0x123   :  { %v2976_v2 = vadd.f32 %v1971_v0, %v475_v16  ;;  %v2014_v63 = vpop.f32.mrb[36].mxu1 }
 0x124   :  { %v2015_v4 = vpop.f32.mrb[37].mxu1 }
 0x125   :  { %3186 = vst [vmem:[#allocation2_spill] sm:$0xff] %v2976_v2  ;;  %v1972_v3 = vpop.f32.mrb[24].mxu0  ;;  %v2016_v6 = vadd.f32 %v2015_v4, %v2014_v63  ;;  %v2017_v7 = vpop.f32.mrb[38].mxu1 }
 0x126   :  { %v1973_v8 = vpop.f32.mrb[25].mxu0  ;;  %v2018_v9 = vpop.f32.mrb[39].mxu1 }
 0x127   :  { %v1974_v11 = vadd.f32 %v1973_v8, %v1972_v3  ;;  %v1975_v14 = vpop.f32.mrb[26].mxu0  ;;  %v2019_v15 = vadd.f32 %v2018_v9, %v2017_v7 }
 0x128   :  { %v1976_v17 = vpop.f32.mrb[27].mxu0 }
 0x129   :  { %v2978_v18 = vadd.f32 %v1974_v11, %v480_v24  ;;  %v1977_v19 = vadd.f32 %v1976_v17, %v1975_v14 }
 0x12b   :  { %v2980_v20 = vadd.f32 %v1977_v19, %v483_v27  ;;  %v2020_v13 = vpop.f32.mrb[40].mxu1 }
 0x12c   :  { %v2021_v21 = vpop.f32.mrb[41].mxu1 }
 0x12d   :  { %v765_v16 = vpop.f32.mrb[28].mxu0  ;;  %v2022_v23 = vadd.f32 %v2021_v21, %v2020_v13  ;;  %v2023_v25 = vpop.f32.mrb[42].mxu1 }
 0x12e   :  { %v2982_v26 = vadd.f32 %v2004_v39, %v765_v16  ;;  %v2218_v28 = vpop.f32.mrb[29].mxu0  ;;  %v2024_v29 = vpop.f32.mrb[43].mxu1 }
 0x12f   :  { %v768_v30 = vpop.f32.mrb[30].mxu0  ;;  %v2025_v31 = vadd.f32 %v2024_v29, %v2023_v25 }
 0x130   :  { %v2986_v34 = vadd.f32 %v2007_v45, %v768_v30  ;;  %v2219_v24 = vpop.f32.mrb[31].mxu0 }
 0x133   :  { %v2026_v36 = vpop.f32.mrb[44].mxu1 }
 0x134   :  { %v2027_v37 = vpop.f32.mrb[45].mxu1 }
 0x135   :  { %v773_v38 = vpop.f32.mrb[32].mxu0  ;;  %v2028_v40 = vadd.f32 %v2027_v37, %v2026_v36  ;;  %v2029_v41 = vpop.f32.mrb[46].mxu1 }
 0x136   :  { %v2990_v39 = vadd.f32 %v2010_v53, %v773_v38  ;;  %v2222_v42 = vpop.f32.mrb[33].mxu0  ;;  %v2030_v43 = vpop.f32.mrb[47].mxu1 }
 0x137   :  { %v776_v44 = vpop.f32.mrb[34].mxu0  ;;  %v2031_v46 = vadd.f32 %v2030_v43, %v2029_v41 }
 0x138   :  { %v2994_v45 = vadd.f32 %v2013_v59, %v776_v44  ;;  %v2223_v50 = vpop.f32.mrb[35].mxu0 }
 0x13b   :  { %v2032_v52 = vpop.f32.mrb[48].mxu1 }
 0x13c   :  { %v2033_v54 = vpop.f32.mrb[49].mxu1 }
 0x13d   :  { %v781_v55 = vpop.f32.mrb[36].mxu0  ;;  %v2034_v56 = vadd.f32 %v2033_v54, %v2032_v52  ;;  %v2035_v57 = vpop.f32.mrb[50].mxu1 }
 0x13e   :  { %v2998_v53 = vadd.f32 %v2016_v6, %v781_v55  ;;  %v2226_v58 = vpop.f32.mrb[37].mxu0  ;;  %v2036_v60 = vpop.f32.mrb[51].mxu1 }
 0x13f   :  { %v784_v0 = vpop.f32.mrb[38].mxu0  ;;  %v2037_v63 = vadd.f32 %v2036_v60, %v2035_v57 }
 0x140   :  { %v3002_v59 = vadd.f32 %v2019_v15, %v784_v0  ;;  %v2227_v3 = vpop.f32.mrb[39].mxu0 }
 0x143   :  { %v2038_v8 = vpop.f32.mrb[52].mxu1 }
 0x144   :  { %v2039_v9 = vpop.f32.mrb[53].mxu1 }
 0x145   :  { %v789_v11 = vpop.f32.mrb[40].mxu0  ;;  %v2040_v14 = vadd.f32 %v2039_v9, %v2038_v8  ;;  %v2041_v17 = vpop.f32.mrb[54].mxu1 }
 0x146   :  { %v3006_v6 = vadd.f32 %v2022_v23, %v789_v11  ;;  %v2230_v19 = vpop.f32.mrb[41].mxu0  ;;  %v2042_v13 = vpop.f32.mrb[55].mxu1 }
 0x147   :  { %v792_v21 = vpop.f32.mrb[42].mxu0  ;;  %v2043_v16 = vadd.f32 %v2042_v13, %v2041_v17 }
 0x148   :  { %v3010_v15 = vadd.f32 %v2025_v31, %v792_v21  ;;  %v2231_v28 = vpop.f32.mrb[43].mxu0 }
 0x14b   :  { %v2068_v30 = vpop.f32.mrb[56].mxu1 }
 0x14c   :  { %v2069_v24 = vpop.f32.mrb[57].mxu1 }
 0x14d   :  { %v797_v36 = vpop.f32.mrb[44].mxu0  ;;  %v2070_v37 = vadd.f32 %v2069_v24, %v2068_v30  ;;  %v2071_v38 = vpop.f32.mrb[58].mxu1 }
 0x14e   :  { %v3014_v23 = vadd.f32 %v2028_v40, %v797_v36  ;;  %v2234_v41 = vpop.f32.mrb[45].mxu0  ;;  %v2072_v42 = vpop.f32.mrb[59].mxu1 }
 0x14f   :  { %v800_v43 = vpop.f32.mrb[46].mxu0  ;;  %v2073_v44 = vadd.f32 %v2072_v42, %v2071_v38 }
 0x150   :  { %v3018_v31 = vadd.f32 %v2031_v46, %v800_v43  ;;  %v2235_v52 = vpop.f32.mrb[47].mxu0 }
 0x153   :  { %v2074_v55 = vpop.f32.mrb[60].mxu1 }
 0x154   :  { %v2075_v57 = vpop.f32.mrb[61].mxu1 }
 0x155   :  { %v805_v58 = vpop.f32.mrb[48].mxu0  ;;  %v2076_v60 = vadd.f32 %v2075_v57, %v2074_v55  ;;  %v2077_v0 = vpop.f32.mrb[62].mxu1 }
 0x156   :  { %v3022_v40 = vadd.f32 %v2034_v56, %v805_v58  ;;  %v2238_v3 = vpop.f32.mrb[49].mxu0  ;;  %v2078_v8 = vpop.f32.mrb[63].mxu1 }
 0x157   :  { %v808_v9 = vpop.f32.mrb[50].mxu0  ;;  %v2079_v11 = vadd.f32 %v2078_v8, %v2077_v0 }
 0x158   :  { %v3026_v46 = vadd.f32 %v2037_v63, %v808_v9  ;;  %v2239_v19 = vpop.f32.mrb[51].mxu0 }
 0x15a   :  { %3187 = vst [vmem:[#allocation3_spill] sm:$0xff] %v3026_v46 }
 0x15b   :  { %v2080_v21 = vpop.f32.mrb[64].mxu1 }
 0x15c   :  { %v2081_v28 = vpop.f32.mrb[65].mxu1 }
 0x15d   :  { %v813_v30 = vpop.f32.mrb[52].mxu0  ;;  %v2082_v24 = vadd.f32 %v2081_v28, %v2080_v21  ;;  %v2083_v36 = vpop.f32.mrb[66].mxu1 }
 0x15e   :  { %v3030_v56 = vadd.f32 %v2040_v14, %v813_v30  ;;  %v2242_v38 = vpop.f32.mrb[53].mxu0  ;;  %v2084_v41 = vpop.f32.mrb[67].mxu1 }
 0x15f   :  { %v816_v42 = vpop.f32.mrb[54].mxu0  ;;  %v2085_v43 = vadd.f32 %v2084_v41, %v2083_v36 }
 0x160   :  { %v3034_v63 = vadd.f32 %v2043_v16, %v816_v42  ;;  %v2243_v55 = vpop.f32.mrb[55].mxu0 }
 0x163   :  { %v2086_v58 = vpop.f32.mrb[68].mxu1 }
 0x164   :  { %v2087_v0 = vpop.f32.mrb[69].mxu1 }
 0x165   :  { %v1098_v3 = vpop.f32.mrb[56].mxu0  ;;  %v2088_v8 = vadd.f32 %v2087_v0, %v2086_v58  ;;  %v2089_v9 = vpop.f32.mrb[70].mxu1 }
 0x166   :  { %v3038_v14 = vadd.f32 %v2070_v37, %v1098_v3  ;;  %v2248_v19 = vpop.f32.mrb[57].mxu0  ;;  %v2090_v21 = vpop.f32.mrb[71].mxu1 }
 0x167   :  { %v1101_v28 = vpop.f32.mrb[58].mxu0  ;;  %v2091_v30 = vadd.f32 %v2090_v21, %v2089_v9 }
 0x168   :  { %v3040_v36 = vadd.f32 %v2073_v44, %v1101_v28  ;;  %v2249_v38 = vpop.f32.mrb[59].mxu0 }
 0x16b   :  { %v2092_v16 = vpop.f32.mrb[72].mxu1 }
 0x16c   :  { %v2093_v41 = vpop.f32.mrb[73].mxu1 }
 0x16d   :  { %v1106_v42 = vpop.f32.mrb[60].mxu0  ;;  %v2094_v55 = vadd.f32 %v2093_v41, %v2092_v16  ;;  %v2095_v13 = vpop.f32.mrb[74].mxu1 }
 0x16e   :  { %v3042_v17 = vadd.f32 %v2076_v60, %v1106_v42  ;;  %v2252_v54 = vpop.f32.mrb[61].mxu0  ;;  %v2096_v50 = vpop.f32.mrb[75].mxu1 }
 0x16f   :  { %v1109_v58 = vpop.f32.mrb[62].mxu0  ;;  %v2097_v0 = vadd.f32 %v2096_v50, %v2095_v13 }
 0x170   :  { %v3044_v37 = vadd.f32 %v2079_v11, %v1109_v58  ;;  %v2253_v3 = vpop.f32.mrb[63].mxu0 }
 0x173   :  { %v2098_v19 = vpop.f32.mrb[76].mxu1 }
 0x174   :  { %v2099_v57 = vpop.f32.mrb[77].mxu1 }
 0x175   :  { %v1114_v9 = vpop.f32.mrb[64].mxu0  ;;  %v2100_v44 = vadd.f32 %v2099_v57, %v2098_v19  ;;  %v2101_v21 = vpop.f32.mrb[78].mxu1 }
 0x176   :  { %v3046_v28 = vadd.f32 %v2082_v24, %v1114_v9  ;;  %v2256_v38 = vpop.f32.mrb[65].mxu0  ;;  %v2102_v52 = vpop.f32.mrb[79].mxu1 }
 0x177   :  { %v1117_v16 = vpop.f32.mrb[66].mxu0  ;;  %v2103_v41 = vadd.f32 %v2102_v52, %v2101_v21 }
 0x178   :  { %v3048_v60 = vadd.f32 %v2085_v43, %v1117_v16  ;;  %v2257_v54 = vpop.f32.mrb[67].mxu0 }
 0x17b   :  { %v2104_v42 = vpop.f32.mrb[80].mxu1 }
 0x17c   :  { %v2105_v29 = vpop.f32.mrb[81].mxu1 }
 0x17d   :  { %v1122_v50 = vpop.f32.mrb[68].mxu0  ;;  %v2106_v11 = vadd.f32 %v2105_v29, %v2104_v42  ;;  %v2107_v13 = vpop.f32.mrb[82].mxu1 }
 0x17e   :  { %v3050_v58 = vadd.f32 %v2088_v8, %v1122_v50  ;;  %v2260_v3 = vpop.f32.mrb[69].mxu0  ;;  %v2108_v25 = vpop.f32.mrb[83].mxu1 }
 0x17f   :  { %v1125_v57 = vpop.f32.mrb[70].mxu0  ;;  %v2109_v19 = vadd.f32 %v2108_v25, %v2107_v13 }
 0x180   :  { %v3052_v24 = vadd.f32 %v2091_v30, %v1125_v57  ;;  %v2261_v9 = vpop.f32.mrb[71].mxu0 }
 0x183   :  { %v2134_v38 = vpop.f32.mrb[84].mxu1 }
 0x184   :  { %v2135_v7 = vpop.f32.mrb[85].mxu1 }
 0x185   :  { %v1130_v52 = vpop.f32.mrb[72].mxu0  ;;  %v2136_v43 = vadd.f32 %v2135_v7, %v2134_v38  ;;  %v2137_v21 = vpop.f32.mrb[86].mxu1 }
 0x186   :  { %v3054_v16 = vadd.f32 %v2094_v55, %v1130_v52  ;;  %v2264_v54 = vpop.f32.mrb[73].mxu0  ;;  %v2138_v4 = vpop.f32.mrb[87].mxu1 }
 0x187   :  { %v1133_v29 = vpop.f32.mrb[74].mxu0  ;;  %v2139_v42 = vadd.f32 %v2138_v4, %v2137_v21 }
 0x188   :  { %v3056_v8 = vadd.f32 %v2097_v0, %v1133_v29  ;;  %v2265_v50 = vpop.f32.mrb[75].mxu0 }
 0x18b   :  { %v2140_v3 = vpop.f32.mrb[88].mxu1 }
 0x18c   :  { %v2141_v51 = vpop.f32.mrb[89].mxu1 }
 0x18d   :  { %v1138_v25 = vpop.f32.mrb[76].mxu0  ;;  %v2142_v30 = vadd.f32 %v2141_v51, %v2140_v3  ;;  %v2143_v13 = vpop.f32.mrb[90].mxu1 }
 0x18e   :  { %v3058_v57 = vadd.f32 %v2100_v44, %v1138_v25  ;;  %v2268_v9 = vpop.f32.mrb[77].mxu0  ;;  %v2144_v48 = vpop.f32.mrb[91].mxu1 }
 0x18f   :  { %v1141_v7 = vpop.f32.mrb[78].mxu0  ;;  %v2145_v38 = vadd.f32 %v2144_v48, %v2143_v13 }
 0x190   :  { %v3060_v55 = vadd.f32 %v2103_v41, %v1141_v7  ;;  %v2269_v52 = vpop.f32.mrb[79].mxu0 }
 0x193   :  { %v2146_v54 = vpop.f32.mrb[92].mxu1 }
 0x194   :  { %v2147_v27 = vpop.f32.mrb[93].mxu1 }
 0x195   :  { %v1146_v4 = vpop.f32.mrb[80].mxu0  ;;  %v2148_v0 = vadd.f32 %v2147_v27, %v2146_v54  ;;  %v2149_v21 = vpop.f32.mrb[94].mxu1 }
 0x196   :  { %v3062_v29 = vadd.f32 %v2106_v11, %v1146_v4  ;;  %v2272_v50 = vpop.f32.mrb[81].mxu0  ;;  %v2150_v32 = vpop.f32.mrb[95].mxu1 }
 0x197   :  { %v1149_v51 = vpop.f32.mrb[82].mxu0  ;;  %v2151_v3 = vadd.f32 %v2150_v32, %v2149_v21  ;;  %v3074_v32 = vld [vmem:[%s3182_s2] ss:$0 sm:$0xff] }
 0x198   :  { %v3064_v44 = vadd.f32 %v2109_v19, %v1149_v51  ;;  %v2273_v25 = vpop.f32.mrb[83].mxu0 }
 0x19b   :  { %v2152_v9 = vpop.f32.mrb[96].mxu1 }
 0x19c   :  { %v2153_v46 = vpop.f32.mrb[97].mxu1 }
 0x19d   :  { %v1431_v48 = vpop.f32.mrb[84].mxu0  ;;  %v3066_v41 = vadd.f32 %v2153_v46, %v2152_v9  ;;  %v2155_v13 = vpop.f32.mrb[98].mxu1  ;;  %v3188_v46 = vmax.f32 %v2954_v1, %v2982_v26 }
 0x19e   :  { %v1432_v7 = vadd.f32 %v2136_v43, %v1431_v48  ;;  %v2278_v52 = vpop.f32.mrb[85].mxu0  ;;  %v2156_v2 = vpop.f32.mrb[99].mxu1 }
 0x19f   :  { %v1434_v27 = vpop.f32.mrb[86].mxu0  ;;  %v3068_v54 = vadd.f32 %v2156_v2, %v2155_v13  ;;  %v3189_v2 = vmax.f32 %v2956_v62, %v2986_v34 }
 0x1a0   :  { %v1500_v11 = vmax.f32 %v3038_v14, %v1432_v7  ;;  %v1435_v4 = vadd.f32 %v2139_v42, %v1434_v27  ;;  %v2279_v50 = vpop.f32.mrb[87].mxu0 }
 0x1a2   :  { %v1514_v19 = vmax.f32 %v3188_v46, %v1500_v11  ;;  %v1501_v43 = vmax.f32 %v3040_v36, %v1435_v4  ;;  %v3190_v46 = vmax.f32 %v2958_v10, %v2990_v39 }
 0x1a3   :  { %v2158_v21 = vpop.f32.mrb[100].mxu1 }
 0x1a4   :  { %v1535_v51 = vadd.f32 %v3074_v32, %v1514_v19  ;;  %v1515_v14 = vmax.f32 %v3189_v2, %v1501_v43  ;;  %v2159_v42 = vpop.f32.mrb[101].mxu1 }
 0x1a5   :  { %v1439_v25 = vpop.f32.mrb[88].mxu0  ;;  %v3084_v9 = vadd.f32 %v2159_v42, %v2158_v21  ;;  %v2161_v48 = vpop.f32.mrb[102].mxu1 }
 0x1a6   :  { %v1536_v13 = vadd.f32 %v3074_v32, %v1515_v14  ;;  %v1440_v7 = vadd.f32 %v2142_v30, %v1439_v25  ;;  %v2282_v52 = vpop.f32.mrb[89].mxu0  ;;  %v2162_v1 = vpop.f32.mrb[103].mxu1  ;;  %v1549_v36 = vmax.f32 %v1535_v51, 0.0  ;;  %v3191_v51 = vmax.f32 %v2960_v12, %v2994_v45 }
 0x1a7   :  { %v1442_v26 = vpop.f32.mrb[90].mxu0  ;;  %v3087_v27 = vadd.f32 %v2162_v1, %v2161_v48 }
 0x1a8   :  { %v1550_v11 = vmax.f32 %v1536_v13, 0.0  ;;  %v1502_v4 = vmax.f32 %v3042_v17, %v1440_v7  ;;  %v1443_v50 = vadd.f32 %v2145_v38, %v1442_v26  ;;  %v2283_v62 = vpop.f32.mrb[91].mxu0 }
 0x1a9   :  { %v3193_v62 = vmax.f32 %v2964_v5, %v3002_v59 }
 0x1aa   :  { %v1882_v34 = vpack.c.bf16 %v1550_v11, %v1549_v36  ;;  %v1516_v19 = vmax.f32 %v3190_v46, %v1502_v4  ;;  %v1503_v43 = vmax.f32 %v3044_v37, %v1443_v50  ;;  %v3192_v36 = vmax.f32 %v2962_v22, %v2998_v53 }
 0x1ab   :  { %v2164_v21 = vpop.f32.mrb[104].mxu1 }
 0x1ac   :  { %1883 = vst [vmem:[%s3183_s3] sm:$0xff] %v1882_v34   ;;  %v1537_v30 = vadd.f32 %v3074_v32, %v1516_v19  ;;  %v1517_v17 = vmax.f32 %v3191_v51, %v1503_v43  ;;  %v2165_v38 = vpop.f32.mrb[105].mxu1 }
 0x1ad   :  { %v1447_v2 = vpop.f32.mrb[92].mxu0  ;;  %v3101_v14 = vadd.f32 %v2165_v38, %v2164_v21  ;;  %v2167_v42 = vpop.f32.mrb[106].mxu1 }
 0x1ae   :  { %v1538_v10 = vadd.f32 %v3074_v32, %v1517_v17  ;;  %v1448_v39 = vadd.f32 %v2148_v0, %v1447_v2  ;;  %v2286_v37 = vpop.f32.mrb[93].mxu0  ;;  %v2168_v25 = vpop.f32.mrb[107].mxu1  ;;  %v1551_v7 = vmax.f32 %v1537_v30, 0.0 }
 0x1af   :  { %v1450_v48 = vpop.f32.mrb[94].mxu0  ;;  %v3104_v13 = vadd.f32 %v2168_v25, %v2167_v42  ;;  %v3194_v42 = vmax.f32 %v2966_v33, %v3006_v6 }
 0x1b0   :  { %v1552_v52 = vmax.f32 %v1538_v10, 0.0  ;;  %v1504_v1 = vmax.f32 %v3046_v28, %v1448_v39  ;;  %v1451_v26 = vadd.f32 %v2151_v3, %v1450_v48  ;;  %v2287_v12 = vpop.f32.mrb[95].mxu0 }
 0x1b2   :  { %v1887_v45 = vpack.c.bf16 %v1552_v52, %v1551_v7  ;;  %v1518_v11 = vmax.f32 %v3192_v36, %v1504_v1  ;;  %v1505_v4 = vmax.f32 %v3048_v60, %v1451_v26 }
 0x1b3   :  { %v2170_v50 = vpop.f32.mrb[108].mxu1 }
 0x1b4   :  { %1914 = vst [vmem:[%s3183_s3 + $0x8] sm:$0xff] %v1887_v45   ;;  %v1539_v0 = vadd.f32 %v3074_v32, %v1518_v11  ;;  %v1519_v28 = vmax.f32 %v3193_v62, %v1505_v4  ;;  %v2171_v3 = vpop.f32.mrb[109].mxu1 }
 0x1b5   :  { %v1455_v34 = vpop.f32.mrb[96].mxu0  ;;  %v2172_v46 = vadd.f32 %v2171_v3, %v2170_v50  ;;  %v2173_v19 = vpop.f32.mrb[110].mxu1  ;;  %v3197_v3 = vmax.f32 %v2980_v20, %v3034_v63 }
 0x1b6   :  { %v1540_v22 = vadd.f32 %v3074_v32, %v1519_v28  ;;  %v1456_v53 = vadd.f32 %v3066_v41, %v1455_v34  ;;  %v2290_v60 = vpop.f32.mrb[97].mxu0  ;;  %v2174_v43 = vpop.f32.mrb[111].mxu1  ;;  %v1553_v51 = vmax.f32 %v1539_v0, 0.0 }
 0x1b7   :  { %v1458_v21 = vpop.f32.mrb[98].mxu0  ;;  %v2175_v30 = vadd.f32 %v2174_v43, %v2173_v19 }
 0x1b8   :  { %v1554_v17 = vmax.f32 %v1540_v22, 0.0  ;;  %v1506_v38 = vmax.f32 %v3050_v58, %v1456_v53  ;;  %v1459_v2 = vadd.f32 %v3068_v54, %v1458_v21  ;;  %v2291_v5 = vpop.f32.mrb[99].mxu0  ;;  %v3195_v58 = vmax.f32 %v2968_v35, %v3010_v15 }
 0x1b9   :  { %v3196_v35 = vmax.f32 %v2978_v18, %v3030_v56  ;;  %v3198_v18 = vmax.f32 %v2970_v47, %v3014_v23 }
 0x1ba   :  { %v1892_v59 = vpack.c.bf16 %v1554_v17, %v1553_v51  ;;  %v1520_v10 = vmax.f32 %v3194_v42, %v1506_v38  ;;  %v1507_v39 = vmax.f32 %v3052_v24, %v1459_v2  ;;  %v3200_v51 = vmax.f32 %v2974_v61, %v3022_v40  ;;  %v3201_v38 = vld [vmem:[#allocation2_spill] sm:$0xff] }
 0x1bb   :  { %v1479_v37 = vpop.f32.mrb[112].mxu1 }
 0x1bc   :  { %1915 = vst [vmem:[%s3183_s3 + $0x10] sm:$0xff] %v1892_v59   ;;  %v1541_v41 = vadd.f32 %v3074_v32, %v1520_v10  ;;  %v1521_v25 = vmax.f32 %v3195_v58, %v1507_v39  ;;  %v1480_v54 = vadd.f32 %v2172_v46, %v1479_v37  ;;  %v2302_v48 = vpop.f32.mrb[113].mxu1 }
 0x1bd   :  { %v1482_v7 = vpop.f32.mrb[114].mxu1  ;;  %v1463_v52 = vpop.f32.mrb[100].mxu0 }
 0x1be   :  { %v1542_v33 = vadd.f32 %v3074_v32, %v1521_v25  ;;  %v1512_v6 = vmax.f32 %v3062_v29, %v1480_v54  ;;  %v1483_v24 = vadd.f32 %v2175_v30, %v1482_v7  ;;  %v2294_v1 = vpop.f32.mrb[101].mxu0  ;;  %v2303_v26 = vpop.f32.mrb[115].mxu1  ;;  %v1555_v12 = vmax.f32 %v1541_v41, 0.0 }
 0x1bf   :  { %v1464_v45 = vadd.f32 %v3084_v9, %v1463_v52  ;;  %v1466_v36 = vpop.f32.mrb[102].mxu0 }
 0x1c0   :  { %v1556_v11 = vmax.f32 %v1542_v33, 0.0  ;;  %v1526_v15 = vmax.f32 %v3196_v35, %v1512_v6  ;;  %v1513_v4 = vmax.f32 %v3064_v44, %v1483_v24  ;;  %v1467_v50 = vadd.f32 %v3087_v27, %v1466_v36  ;;  %v2295_v0 = vpop.f32.mrb[103].mxu0 }
 0x1c1   :  { %v1508_v62 = vmax.f32 %v3054_v16, %v1464_v45  ;;  %v3199_v16 = vmax.f32 %v2972_v49, %v3018_v31 }
 0x1c2   :  { %v1897_v29 = vpack.c.bf16 %v1556_v11, %v1555_v12  ;;  %v1547_v28 = vadd.f32 %v3074_v32, %v1526_v15  ;;  %v1527_v9 = vmax.f32 %v3197_v3, %v1513_v4  ;;  %v1509_v34 = vmax.f32 %v3056_v8, %v1467_v50 }
 0x1c3   :  { %v1522_v56 = vmax.f32 %v3198_v18, %v1508_v62 }
 0x1c4   :  { %1916 = vst [vmem:[%s3183_s3 + $0x18] sm:$0xff] %v1897_v29   ;;  %v1548_v44 = vadd.f32 %v3074_v32, %v1527_v9  ;;  %v1523_v27 = vmax.f32 %v3199_v16, %v1509_v34  ;;  %v1561_v63 = vmax.f32 %v1547_v28, 0.0 }
 0x1c5   :  { %v1543_v46 = vadd.f32 %v3074_v32, %v1522_v56  ;;  %v1471_v20 = vpop.f32.mrb[104].mxu0 }
 0x1c6   :  { %v1562_v19 = vmax.f32 %v1548_v44, 0.0  ;;  %v1544_v8 = vadd.f32 %v3074_v32, %v1523_v27  ;;  %v1472_v47 = vadd.f32 %v3101_v14, %v1471_v20  ;;  %v2298_v23 = vpop.f32.mrb[105].mxu0 }
 0x1c7   :  { %v1557_v22 = vmax.f32 %v1543_v46, 0.0  ;;  %v1474_v53 = vpop.f32.mrb[106].mxu0 }
 0x1c8   :  { %v1912_v60 = vpack.c.bf16 %v1562_v19, %v1561_v63  ;;  %v1558_v43 = vmax.f32 %v1544_v8, 0.0  ;;  %v1510_v21 = vmax.f32 %v3058_v57, %v1472_v47  ;;  %v1475_v30 = vadd.f32 %v3104_v13, %v1474_v53  ;;  %v2299_v49 = vpop.f32.mrb[107].mxu0  ;;  %v3202_v13 = vld [vmem:[#allocation3_spill] sm:$0xff] }
 0x1c9   :  { %v3203_v2 = vmax.f32 %v3201_v38, %v3202_v13 }
 0x1ca   :  { %1919 = vst [vmem:[%s3183_s3 + $0x30] sm:$0xff] %v1912_v60   ;;  %v1902_v31 = vpack.c.bf16 %v1558_v43, %v1557_v22  ;;  %v1524_v17 = vmax.f32 %v3200_v51, %v1510_v21  ;;  %v1511_v14 = vmax.f32 %v3060_v55, %v1475_v30 }
 0x1cc   :  { %1917 = vst [vmem:[%s3183_s3 + $0x20] sm:$0xff] %v1902_v31   ;;  %v1545_v57 = vadd.f32 %v3074_v32, %v1524_v17  ;;  %v1525_v5 = vmax.f32 %v3203_v2, %v1511_v14 }
 0x1ce   :  { %v1546_v59 = vadd.f32 %v3074_v32, %v1525_v5  ;;  %v1559_v42 = vmax.f32 %v1545_v57, 0.0 }
 0x1d0   :  { %v1560_v10 = vmax.f32 %v1546_v59, 0.0 }
 0x1d2   :  { %v1907_v39 = vpack.c.bf16 %v1560_v10, %v1559_v42 }
 0x1d4   :  { %1918 = vst [vmem:[%s3183_s3 + $0x28] sm:$0xff] %v1907_v39  }

// kernel: emnist_cnn_forward.5
= control target key start
LH: loop header
LB: loop body
LE: loop exit
PB: predicated region body
PF: predicated region fallthrough
CT: control target
= control target key end

     0   :  { %vm6119_vm0 = vmmov 0   ;;  %s7551_s1 = inlined_call_operand.vmem [shape: bf16[6272,128], index: 1, kind: input, shape index: {}]   ;;  %s7552_s0 = inlined_call_operand.vmem [shape: bf16[16,6272], index: 0, kind: input, shape index: {}]   ;;  %s7553_s2 = inlined_call_operand.vmem [shape: f32[1,128], index: 2, kind: input, shape index: {}]   ;;  %s7554_s3 = inlined_call_operand.vmem [shape: bf16[128,128], index: 3, kind: input, shape index: {}]   ;;  %s7555_s4 = inlined_call_operand.vmem [shape: f32[1,128], index: 4, kind: input, shape index: {}]   ;;  %s7556_s5 = inlined_call_operand.vmem [shape: f32[16,128], index: 5, kind: output, shape index: {}]  }
   0x1   :  { %v5645_v0 = vld [vmem:[%s7551_s1 + $0x40] sm:$0xff]   ;;  %v5649_v4 = vld [vmem:[%s7551_s1 + $0x48] sm:$0xff]   ;;  %v5653_v8 = vld [vmem:[%s7551_s1 + $0x50] sm:$0xff]  }
   0x2   :  { %v5646_v1 = vld [vmem:[%s7551_s1] sm:$0xff]   ;;  %5057 = vmatprep.subr.bf16.mxu0 %v5645_v0  ;;  %v5650_v5 = vld [vmem:[%s7551_s1 + $0x8] sm:$0xff]   ;;  %v5654_v9 = vld [vmem:[%s7551_s1 + $0x10] sm:$0xff]  }
   0x3   :  { %v5647_v2 = vld [vmem:[%s7551_s1 + $0xc0] sm:$0xff]   ;;  %5058 = vmatpush3.bf16.msra.mxu0 %v5646_v1  ;;  %v5651_v6 = vld [vmem:[%s7551_s1 + $0xc8] sm:$0xff]   ;;  %v5655_v10 = vld [vmem:[%s7551_s1 + $0xd0] sm:$0xff]  }
   0x4   :  { %v5648_v3 = vld [vmem:[%s7551_s1 + $0x80] sm:$0xff]   ;;  %5079 = vmatprep.subr.bf16.mxu1 %v5647_v2  ;;  %5059 = vmatprep.subr.bf16.mxu0 %v5649_v4  ;;  %v5652_v7 = vld [vmem:[%s7551_s1 + $0x88] sm:$0xff]   ;;  %v5656_v11 = vld [vmem:[%s7551_s1 + $0x90] sm:$0xff]  }
   0x5   :  { %5080 = vmatpush3.bf16.msra.mxu1 %v5648_v3  ;;  %v5657_v12 = vld [vmem:[%s7551_s1 + $0x58] sm:$0xff]   ;;  %v5661_v16 = vld [vmem:[%s7551_s1 + $0x60] sm:$0xff]   ;;  %v5665_v20 = vld [vmem:[%s7551_s1 + $0x68] sm:$0xff]  }
   0x6   :  { %5081 = vmatprep.subr.bf16.mxu1 %v5651_v6  ;;  %v5658_v13 = vld [vmem:[%s7551_s1 + $0x18] sm:$0xff]   ;;  %v5662_v17 = vld [vmem:[%s7551_s1 + $0x20] sm:$0xff]   ;;  %v5666_v21 = vld [vmem:[%s7551_s1 + $0x28] sm:$0xff]  }
   0x7   :  { %5060 = vmatpush3.bf16.msra.mxu0 %v5650_v5  ;;  %v5659_v14 = vld [vmem:[%s7551_s1 + $0xd8] sm:$0xff]   ;;  %v5663_v18 = vld [vmem:[%s7551_s1 + $0xe0] sm:$0xff]   ;;  %v5667_v22 = vld [vmem:[%s7551_s1 + $0xe8] sm:$0xff]  }
   0x8   :  { %5061 = vmatprep.subr.bf16.mxu0 %v5653_v8  ;;  %v5660_v15 = vld [vmem:[%s7551_s1 + $0x98] sm:$0xff]   ;;  %v5664_v19 = vld [vmem:[%s7551_s1 + $0xa0] sm:$0xff]   ;;  %v5668_v23 = vld [vmem:[%s7551_s1 + $0xa8] sm:$0xff]  }
   0x9   :  { %5082 = vmatpush3.bf16.msra.mxu1 %v5652_v7  ;;  %v5669_v24 = vld [vmem:[%s7551_s1 + $0x70] sm:$0xff]   ;;  %v5673_v28 = vld [vmem:[%s7551_s1 + $0x78] sm:$0xff]   ;;  %v5676_v31 = vld [vmem:[%s7552_s0] ss:$196 sps:$4 sm:$0xff]  }
   0xa   :  { %5083 = vmatprep.subr.bf16.mxu1 %v5655_v10  ;;  %v5670_v25 = vld [vmem:[%s7551_s1 + $0x30] sm:$0xff]   ;;  %v5674_v29 = vld [vmem:[%s7551_s1 + $0x38] sm:$0xff]   ;;  %v5678_v32 = vld [vmem:[%s7552_s0 + $0x4] ss:$196 sps:$4 sm:$0xff]  }
   0xb   :  { %5062 = vmatpush3.bf16.msra.mxu0 %v5654_v9  ;;  %v5671_v26 = vld [vmem:[%s7551_s1 + $0xf0] sm:$0xff]   ;;  %v5675_v30 = vld [vmem:[%s7551_s1 + $0xf8] sm:$0xff]   ;;  %3492 = vmatprep.mubr.bf16.mxu0 %v5678_v32  ;;  %v5680_v34 = vld [vmem:[%s7551_s1 + $0x140] sm:$0xff]  }
   0xc   :  { %5063 = vmatprep.subr.bf16.mxu0 %v5657_v12  ;;  %v5672_v27 = vld [vmem:[%s7551_s1 + $0xb0] sm:$0xff]   ;;  %v5679_v33 = vld [vmem:[%s7551_s1 + $0xb8] sm:$0xff]   ;;  %v5681_v35 = vld [vmem:[%s7552_s0 + $0x8] ss:$196 sps:$4 sm:$0xff]  }
   0xd   :  { %5084 = vmatpush3.bf16.msra.mxu1 %v5656_v11  ;;  %v5683_v36 = vld [vmem:[%s7552_s0 + $0xc] ss:$196 sps:$4 sm:$0xff]   ;;  %v5684_v37 = vld [vmem:[%s7551_s1 + $0x100] sm:$0xff]   ;;  %v5695_v48 = vld [vmem:[%s7551_s1 + $0x158] sm:$0xff]  }
   0xe   :  { %5085 = vmatprep.subr.bf16.mxu1 %v5659_v14  ;;  %3533 = vmatprep.mubr.bf16.mxu1 %v5683_v36  ;;  %v5685_v38 = vld [vmem:[%s7551_s1 + $0x1c0] sm:$0xff]   ;;  %v5687_v40 = vld [vmem:[%s7551_s1 + $0x148] sm:$0xff]   ;;  %v5691_v44 = vld [vmem:[%s7551_s1 + $0x150] sm:$0xff]  }
   0xf   :  { %5064 = vmatpush3.bf16.msra.mxu0 %v5658_v13  ;;  %v5686_v39 = vld [vmem:[%s7551_s1 + $0x180] sm:$0xff]   ;;  %v5688_v41 = vld [vmem:[%s7551_s1 + $0x108] sm:$0xff]   ;;  %v5692_v45 = vld [vmem:[%s7551_s1 + $0x110] sm:$0xff]  }
  0x10   :  { %5065 = vmatprep.subr.bf16.mxu0 %v5661_v16  ;;  %v5689_v42 = vld [vmem:[%s7551_s1 + $0x1c8] sm:$0xff]   ;;  %v5693_v46 = vld [vmem:[%s7551_s1 + $0x1d0] sm:$0xff]   ;;  %v5696_v49 = vld [vmem:[%s7551_s1 + $0x118] sm:$0xff]  }
  0x11   :  { %5086 = vmatpush3.bf16.msra.mxu1 %v5660_v15  ;;  %v5690_v43 = vld [vmem:[%s7551_s1 + $0x188] sm:$0xff]   ;;  %v5694_v47 = vld [vmem:[%s7551_s1 + $0x190] sm:$0xff]   ;;  %v5697_v50 = vld [vmem:[%s7551_s1 + $0x1d8] sm:$0xff]  }
  0x12   :  { %5087 = vmatprep.subr.bf16.mxu1 %v5663_v18  ;;  %v5698_v51 = vld [vmem:[%s7551_s1 + $0x198] sm:$0xff]   ;;  %v5699_v52 = vld [vmem:[%s7551_s1 + $0x160] sm:$0xff]   ;;  %v5703_v56 = vld [vmem:[%s7551_s1 + $0x168] sm:$0xff]  }
  0x13   :  { %5066 = vmatpush3.bf16.msra.mxu0 %v5662_v17  ;;  %v5700_v53 = vld [vmem:[%s7551_s1 + $0x120] sm:$0xff]   ;;  %v5704_v57 = vld [vmem:[%s7551_s1 + $0x128] sm:$0xff]   ;;  %v5707_v60 = vld [vmem:[%s7551_s1 + $0x170] sm:$0xff]  }
  0x14   :  { %5067 = vmatprep.subr.bf16.mxu0 %v5665_v20  ;;  %v5701_v54 = vld [vmem:[%s7551_s1 + $0x1e0] sm:$0xff]   ;;  %v5705_v58 = vld [vmem:[%s7551_s1 + $0x1e8] sm:$0xff]   ;;  %v5708_v61 = vld [vmem:[%s7551_s1 + $0x130] sm:$0xff]  }
  0x15   :  { %5088 = vmatpush3.bf16.msra.mxu1 %v5664_v19  ;;  %v5702_v55 = vld [vmem:[%s7551_s1 + $0x1a0] sm:$0xff]   ;;  %v5706_v59 = vld [vmem:[%s7551_s1 + $0x1a8] sm:$0xff]   ;;  %v5709_v62 = vld [vmem:[%s7551_s1 + $0x1f0] sm:$0xff]  }
  0x16   :  { %5089 = vmatprep.subr.bf16.mxu1 %v5667_v22  ;;  %v5710_v63 = vld [vmem:[%s7551_s1 + $0x1b0] sm:$0xff]   ;;  %v5711_v0 = vld [vmem:[%s7551_s1 + $0x178] sm:$0xff]   ;;  %v5718_v6 = vld [vmem:[%s7551_s1 + $0x240] sm:$0xff]  }
  0x17   :  { %5068 = vmatpush3.bf16.msra.mxu0 %v5666_v21  ;;  %v5712_v1 = vld [vmem:[%s7551_s1 + $0x138] sm:$0xff]   ;;  %v5714_v3 = vld [vmem:[%s7552_s0 + $0x10] ss:$196 sps:$4 sm:$0xff]   ;;  %v5722_v9 = vld [vmem:[%s7551_s1 + $0x200] sm:$0xff]  }
  0x18   :  { %5069 = vmatprep.subr.bf16.mxu0 %v5669_v24  ;;  %v5713_v2 = vld [vmem:[%s7551_s1 + $0x1f8] sm:$0xff]   ;;  %v5723_v10 = vld [vmem:[%s7551_s1 + $0x2c0] sm:$0xff]   ;;  %v5725_v12 = vld [vmem:[%s7551_s1 + $0x248] sm:$0xff]  }
  0x19   :  { %5090 = vmatpush3.bf16.msra.mxu1 %v5668_v23  ;;  %v5716_v4 = vld [vmem:[%s7552_s0 + $0x14] ss:$196 sps:$4 sm:$0xff]   ;;  %v5721_v8 = vld [vmem:[%s7552_s0 + $0x1c] ss:$196 sps:$4 sm:$0xff]   ;;  %v5726_v13 = vld [vmem:[%s7551_s1 + $0x208] sm:$0xff]  }
  0x1a   :  { %5091 = vmatprep.subr.bf16.mxu1 %v5671_v26  ;;  %v5717_v5 = vld [vmem:[%s7551_s1 + $0x1b8] sm:$0xff]   ;;  %v5724_v11 = vld [vmem:[%s7551_s1 + $0x280] sm:$0xff]   ;;  %v5727_v14 = vld [vmem:[%s7551_s1 + $0x2c8] sm:$0xff]  }
  0x1b   :  { %5070 = vmatpush3.bf16.msra.mxu0 %v5670_v25  ;;  %v5719_v7 = vld [vmem:[%s7552_s0 + $0x18] ss:$196 sps:$4 sm:$0xff]   ;;  %v5728_v15 = vld [vmem:[%s7551_s1 + $0x288] sm:$0xff]   ;;  %v5729_v16 = vld [vmem:[%s7551_s1 + $0x250] sm:$0xff]  }
  0x1c   :  { %5071 = vmatprep.subr.bf16.mxu0 %v5673_v28  ;;  %v5730_v17 = vld [vmem:[%s7551_s1 + $0x210] sm:$0xff]   ;;  %v5733_v20 = vld [vmem:[%s7551_s1 + $0x258] sm:$0xff]   ;;  %v5737_v24 = vld [vmem:[%s7551_s1 + $0x260] sm:$0xff]  }
  0x1d   :  { %5092 = vmatpush3.bf16.msra.mxu1 %v5672_v27  ;;  %v5731_v18 = vld [vmem:[%s7551_s1 + $0x2d0] sm:$0xff]   ;;  %v5734_v21 = vld [vmem:[%s7551_s1 + $0x218] sm:$0xff]   ;;  %v5738_v25 = vld [vmem:[%s7551_s1 + $0x220] sm:$0xff]  }
  0x1e   :  { %5093 = vmatprep.subr.bf16.mxu1 %v5675_v30  ;;  %v5732_v19 = vld [vmem:[%s7551_s1 + $0x290] sm:$0xff]   ;;  %v5735_v22 = vld [vmem:[%s7551_s1 + $0x2d8] sm:$0xff]   ;;  %v5739_v26 = vld [vmem:[%s7551_s1 + $0x2e0] sm:$0xff]  }
  0x1f   :  { %5072 = vmatpush3.bf16.msra.mxu0 %v5674_v29  ;;  %v5736_v23 = vld [vmem:[%s7551_s1 + $0x298] sm:$0xff]   ;;  %v5740_v27 = vld [vmem:[%s7551_s1 + $0x2a0] sm:$0xff]   ;;  %v5741_v28 = vld [vmem:[%s7551_s1 + $0x268] sm:$0xff]  }
  0x20   :  { %5101 = vmatprep.subr.bf16.mxu0 %v5680_v34  ;;  %v5742_v29 = vld [vmem:[%s7551_s1 + $0x228] sm:$0xff]   ;;  %v5745_v32 = vld [vmem:[%s7551_s1 + $0x270] sm:$0xff]   ;;  %v5749_v36 = vld [vmem:[%s7551_s1 + $0x278] sm:$0xff]  }
  0x21   :  { %5094 = vmatpush3.bf16.msra.mxu1 %v5679_v33  ;;  %v5743_v30 = vld [vmem:[%s7551_s1 + $0x2e8] sm:$0xff]   ;;  %v5746_v33 = vld [vmem:[%s7551_s1 + $0x230] sm:$0xff]  }
  0x22   :  { %3493 = vmatmul.mubr.bf16.vlgmr.msra.gmra.mrb[0].mxu0 %v5676_v31  ;;  %5123 = vmatprep.subr.bf16.mxu1 %v5685_v38  ;;  %v5744_v31 = vld [vmem:[%s7551_s1 + $0x2a8] sm:$0xff]   ;;  %v5747_v34 = vld [vmem:[%s7551_s1 + $0x2f0] sm:$0xff]   ;;  %v5751_v38 = vld [vmem:[%s7551_s1 + $0x2f8] sm:$0xff]  }
  0x23   :  { %5102 = vmatpush3.bf16.msra.mxu0 %v5684_v37  ;;  %3574 = vmatprep.mubr.bf16.mxu0 %v5716_v4  ;;  %v5750_v37 = vld [vmem:[%s7551_s1 + $0x238] sm:$0xff]   ;;  %v5783_v4 = vld [vmem:[%s7551_s1 + $0x370] sm:$0xff]  }
  0x24   :  { %3534 = vmatmul.mubr.bf16.vlgmr.msra.gmra.mrb[0].mxu1 %v5681_v35  ;;  %5103 = vmatprep.subr.bf16.mxu0 %v5687_v40  ;;  %v5748_v35 = vld [vmem:[%s7551_s1 + $0x2b0] sm:$0xff]   ;;  %v5754_v40 = vld [vmem:[%s7552_s0 + $0x24] ss:$196 sps:$4 sm:$0xff]  }
  0x25   :  { %5124 = vmatpush3.bf16.msra.mxu1 %v5686_v39  ;;  %3615 = vmatprep.mubr.bf16.mxu1 %v5721_v8  ;;  %v5752_v39 = vld [vmem:[%s7552_s0 + $0x20] ss:$196 sps:$4 sm:$0xff]   ;;  %v5787_v8 = vld [vmem:[%s7551_s1 + $0x378] sm:$0xff]  }
  0x26   :  { %5125 = vmatprep.subr.bf16.mxu1 %v5689_v42  ;;  %v5756_v42 = vld [vmem:[%s7551_s1 + $0x340] sm:$0xff]  }
  0x27   :  { %5104 = vmatpush3.bf16.msra.mxu0 %v5688_v41  ;;  %v5755_v41 = vld [vmem:[%s7551_s1 + $0x2b8] sm:$0xff]  }
  0x28   :  { %5105 = vmatprep.subr.bf16.mxu0 %v5691_v44  ;;  %v5759_v44 = vld [vmem:[%s7552_s0 + $0x2c] ss:$196 sps:$4 sm:$0xff]  }
  0x29   :  { %5126 = vmatpush3.bf16.msra.mxu1 %v5690_v43  ;;  %v5757_v43 = vld [vmem:[%s7552_s0 + $0x28] ss:$196 sps:$4 sm:$0xff]  }
  0x2a   :  { %5127 = vmatprep.subr.bf16.mxu1 %v5693_v46  ;;  %v5761_v46 = vld [vmem:[%s7551_s1 + $0x3c0] sm:$0xff]  }
  0x2b   :  { %5106 = vmatpush3.bf16.msra.mxu0 %v5692_v45  ;;  %v5760_v45 = vld [vmem:[%s7551_s1 + $0x300] sm:$0xff]  }
  0x2c   :  { %5107 = vmatprep.subr.bf16.mxu0 %v5695_v48  ;;  %v5763_v48 = vld [vmem:[%s7551_s1 + $0x348] sm:$0xff]  }
  0x2d   :  { %5128 = vmatpush3.bf16.msra.mxu1 %v5694_v47  ;;  %v5762_v47 = vld [vmem:[%s7551_s1 + $0x380] sm:$0xff]  }
  0x2e   :  { %5129 = vmatprep.subr.bf16.mxu1 %v5697_v50  ;;  %v5765_v50 = vld [vmem:[%s7551_s1 + $0x3c8] sm:$0xff]  }
  0x2f   :  { %5108 = vmatpush3.bf16.msra.mxu0 %v5696_v49  ;;  %v5764_v49 = vld [vmem:[%s7551_s1 + $0x308] sm:$0xff]  }
  0x30   :  { %5109 = vmatprep.subr.bf16.mxu0 %v5699_v52  ;;  %v5767_v52 = vld [vmem:[%s7551_s1 + $0x350] sm:$0xff]  }
  0x31   :  { %5130 = vmatpush3.bf16.msra.mxu1 %v5698_v51  ;;  %v5766_v51 = vld [vmem:[%s7551_s1 + $0x388] sm:$0xff]  }
  0x32   :  { %5131 = vmatprep.subr.bf16.mxu1 %v5701_v54  ;;  %v5769_v54 = vld [vmem:[%s7551_s1 + $0x3d0] sm:$0xff]  }
  0x33   :  { %5110 = vmatpush3.bf16.msra.mxu0 %v5700_v53  ;;  %v5768_v53 = vld [vmem:[%s7551_s1 + $0x310] sm:$0xff]  }
  0x34   :  { %5111 = vmatprep.subr.bf16.mxu0 %v5703_v56  ;;  %v5771_v56 = vld [vmem:[%s7551_s1 + $0x358] sm:$0xff]  }
  0x35   :  { %5132 = vmatpush3.bf16.msra.mxu1 %v5702_v55  ;;  %v5770_v55 = vld [vmem:[%s7551_s1 + $0x390] sm:$0xff]  }
  0x36   :  { %5133 = vmatprep.subr.bf16.mxu1 %v5705_v58  ;;  %v5773_v58 = vld [vmem:[%s7551_s1 + $0x3d8] sm:$0xff]  }
  0x37   :  { %5112 = vmatpush3.bf16.msra.mxu0 %v5704_v57  ;;  %v5772_v57 = vld [vmem:[%s7551_s1 + $0x318] sm:$0xff]  }
  0x38   :  { %5113 = vmatprep.subr.bf16.mxu0 %v5707_v60  ;;  %v5775_v60 = vld [vmem:[%s7551_s1 + $0x360] sm:$0xff]  }
  0x39   :  { %5134 = vmatpush3.bf16.msra.mxu1 %v5706_v59  ;;  %v5774_v59 = vld [vmem:[%s7551_s1 + $0x398] sm:$0xff]  }
  0x3a   :  { %5135 = vmatprep.subr.bf16.mxu1 %v5709_v62  ;;  %v5777_v62 = vld [vmem:[%s7551_s1 + $0x3e0] sm:$0xff]  }
  0x3b   :  { %5114 = vmatpush3.bf16.msra.mxu0 %v5708_v61  ;;  %v5776_v61 = vld [vmem:[%s7551_s1 + $0x320] sm:$0xff]  }
  0x3c   :  { %5115 = vmatprep.subr.bf16.mxu0 %v5711_v0  ;;  %v5779_v0 = vld [vmem:[%s7551_s1 + $0x368] sm:$0xff]  }
  0x3d   :  { %5136 = vmatpush3.bf16.msra.mxu1 %v5710_v63  ;;  %v5778_v63 = vld [vmem:[%s7551_s1 + $0x3a0] sm:$0xff]  }
  0x3e   :  { %5137 = vmatprep.subr.bf16.mxu1 %v5713_v2  ;;  %v5781_v2 = vld [vmem:[%s7551_s1 + $0x3e8] sm:$0xff]  }
  0x3f   :  { %5116 = vmatpush3.bf16.msra.mxu0 %v5712_v1  ;;  %v5780_v1 = vld [vmem:[%s7551_s1 + $0x328] sm:$0xff]  }
  0x40   :  { %5145 = vmatprep.subr.bf16.mxu0 %v5718_v6  ;;  %v5785_v6 = vld [vmem:[%s7551_s1 + $0x3f0] sm:$0xff]  }
  0x41   :  { %5138 = vmatpush3.bf16.msra.mxu1 %v5717_v5  ;;  %v5784_v5 = vld [vmem:[%s7551_s1 + $0x330] sm:$0xff]  }
  0x42   :  { %3575 = vmatmul.mubr.bf16.vlgmr.msra.gmra.mrb[4].mxu0 %v5714_v3  ;;  %5167 = vmatprep.subr.bf16.mxu1 %v5723_v10  ;;  %v5782_v3 = vld [vmem:[%s7551_s1 + $0x3a8] sm:$0xff]   ;;  %v5789_v10 = vld [vmem:[%s7551_s1 + $0x3f8] sm:$0xff]  }
  0x43   :  { %5146 = vmatpush3.bf16.msra.mxu0 %v5722_v9  ;;  %3656 = vmatprep.mubr.bf16.mxu0 %v5754_v40  ;;  %v5788_v9 = vld [vmem:[%s7551_s1 + $0x338] sm:$0xff]   ;;  %v5821_v40 = vld [vmem:[%s7551_s1 + $0x470] sm:$0xff]  }
  0x44   :  { %3616 = vmatmul.mubr.bf16.vlgmr.msra.gmra.mrb[4].mxu1 %v5719_v7  ;;  %5147 = vmatprep.subr.bf16.mxu0 %v5725_v12  ;;  %v5786_v7 = vld [vmem:[%s7551_s1 + $0x3b0] sm:$0xff]  }
  0x45   :  { %5168 = vmatpush3.bf16.msra.mxu1 %v5724_v11  ;;  %3697 = vmatprep.mubr.bf16.mxu1 %v5759_v44  ;;  %v5790_v11 = vld [vmem:[%s7552_s0 + $0x30] ss:$196 sps:$4 sm:$0xff]   ;;  %v5825_v44 = vld [vmem:[%s7551_s1 + $0x478] sm:$0xff]  }
  0x46   :  { %5169 = vmatprep.subr.bf16.mxu1 %v5727_v14  ;;  %v5792_v12 = vld [vmem:[%s7552_s0 + $0x34] ss:$196 sps:$4 sm:$0xff]   ;;  %v5794_v14 = vld [vmem:[%s7551_s1 + $0x440] sm:$0xff]  }
  0x47   :  { %5148 = vmatpush3.bf16.msra.mxu0 %v5726_v13  ;;  %v5793_v13 = vld [vmem:[%s7551_s1 + $0x3b8] sm:$0xff]  }
  0x48   :  { %5149 = vmatprep.subr.bf16.mxu0 %v5729_v16  ;;  %v5797_v16 = vld [vmem:[%s7552_s0 + $0x3c] ss:$196 sps:$4 sm:$0xff]  }
  0x49   :  { %5170 = vmatpush3.bf16.msra.mxu1 %v5728_v15  ;;  %v5795_v15 = vld [vmem:[%s7552_s0 + $0x38] ss:$196 sps:$4 sm:$0xff]  }
  0x4a   :  { %5171 = vmatprep.subr.bf16.mxu1 %v5731_v18  ;;  %v5799_v18 = vld [vmem:[%s7551_s1 + $0x4c0] sm:$0xff]  }
  0x4b   :  { %5150 = vmatpush3.bf16.msra.mxu0 %v5730_v17  ;;  %v5798_v17 = vld [vmem:[%s7551_s1 + $0x400] sm:$0xff]  }
  0x4c   :  { %5151 = vmatprep.subr.bf16.mxu0 %v5733_v20  ;;  %v5801_v20 = vld [vmem:[%s7551_s1 + $0x448] sm:$0xff]  }
  0x4d   :  { %5172 = vmatpush3.bf16.msra.mxu1 %v5732_v19  ;;  %v5800_v19 = vld [vmem:[%s7551_s1 + $0x480] sm:$0xff]  }
  0x4e   :  { %5173 = vmatprep.subr.bf16.mxu1 %v5735_v22  ;;  %v5803_v22 = vld [vmem:[%s7551_s1 + $0x4c8] sm:$0xff]  }
  0x4f   :  { %5152 = vmatpush3.bf16.msra.mxu0 %v5734_v21  ;;  %v5802_v21 = vld [vmem:[%s7551_s1 + $0x408] sm:$0xff]  }
  0x50   :  { %5153 = vmatprep.subr.bf16.mxu0 %v5737_v24  ;;  %v5805_v24 = vld [vmem:[%s7551_s1 + $0x450] sm:$0xff]  }
  0x51   :  { %5174 = vmatpush3.bf16.msra.mxu1 %v5736_v23  ;;  %v5804_v23 = vld [vmem:[%s7551_s1 + $0x488] sm:$0xff]  }
  0x52   :  { %5175 = vmatprep.subr.bf16.mxu1 %v5739_v26  ;;  %v5807_v26 = vld [vmem:[%s7551_s1 + $0x4d0] sm:$0xff]  }
  0x53   :  { %5154 = vmatpush3.bf16.msra.mxu0 %v5738_v25  ;;  %v5806_v25 = vld [vmem:[%s7551_s1 + $0x410] sm:$0xff]  }
  0x54   :  { %5155 = vmatprep.subr.bf16.mxu0 %v5741_v28  ;;  %v5809_v28 = vld [vmem:[%s7551_s1 + $0x458] sm:$0xff]  }
  0x55   :  { %5176 = vmatpush3.bf16.msra.mxu1 %v5740_v27  ;;  %v5808_v27 = vld [vmem:[%s7551_s1 + $0x490] sm:$0xff]  }
  0x56   :  { %5177 = vmatprep.subr.bf16.mxu1 %v5743_v30  ;;  %v5811_v30 = vld [vmem:[%s7551_s1 + $0x4d8] sm:$0xff]  }
  0x57   :  { %5156 = vmatpush3.bf16.msra.mxu0 %v5742_v29  ;;  %v5810_v29 = vld [vmem:[%s7551_s1 + $0x418] sm:$0xff]  }
  0x58   :  { %5157 = vmatprep.subr.bf16.mxu0 %v5745_v32  ;;  %v5813_v32 = vld [vmem:[%s7551_s1 + $0x460] sm:$0xff]  }
  0x59   :  { %5178 = vmatpush3.bf16.msra.mxu1 %v5744_v31  ;;  %v5812_v31 = vld [vmem:[%s7551_s1 + $0x498] sm:$0xff]  }
  0x5a   :  { %5179 = vmatprep.subr.bf16.mxu1 %v5747_v34  ;;  %v5815_v34 = vld [vmem:[%s7551_s1 + $0x4e0] sm:$0xff]  }
  0x5b   :  { %5158 = vmatpush3.bf16.msra.mxu0 %v5746_v33  ;;  %v5814_v33 = vld [vmem:[%s7551_s1 + $0x420] sm:$0xff]  }
  0x5c   :  { %5159 = vmatprep.subr.bf16.mxu0 %v5749_v36  ;;  %v5817_v36 = vld [vmem:[%s7551_s1 + $0x468] sm:$0xff]  }
  0x5d   :  { %5180 = vmatpush3.bf16.msra.mxu1 %v5748_v35  ;;  %v5816_v35 = vld [vmem:[%s7551_s1 + $0x4a0] sm:$0xff]  }
  0x5e   :  { %5181 = vmatprep.subr.bf16.mxu1 %v5751_v38  ;;  %v5819_v38 = vld [vmem:[%s7551_s1 + $0x4e8] sm:$0xff]  }
  0x5f   :  { %5160 = vmatpush3.bf16.msra.mxu0 %v5750_v37  ;;  %v5818_v37 = vld [vmem:[%s7551_s1 + $0x428] sm:$0xff]  }
  0x60   :  { %5189 = vmatprep.subr.bf16.mxu0 %v5756_v42  ;;  %v5823_v42 = vld [vmem:[%s7551_s1 + $0x4f0] sm:$0xff]  }
  0x61   :  { %5182 = vmatpush3.bf16.msra.mxu1 %v5755_v41  ;;  %v5822_v41 = vld [vmem:[%s7551_s1 + $0x430] sm:$0xff]  }
  0x62   :  { %3657 = vmatmul.mubr.bf16.vlgmr.msra.gmra.mrb[8].mxu0 %v5752_v39  ;;  %5211 = vmatprep.subr.bf16.mxu1 %v5761_v46  ;;  %v5820_v39 = vld [vmem:[%s7551_s1 + $0x4a8] sm:$0xff]   ;;  %v5827_v46 = vld [vmem:[%s7551_s1 + $0x4f8] sm:$0xff]  }
  0x63   :  { %5190 = vmatpush3.bf16.msra.mxu0 %v5760_v45  ;;  %3738 = vmatprep.mubr.bf16.mxu0 %v5792_v12  ;;  %v5826_v45 = vld [vmem:[%s7551_s1 + $0x438] sm:$0xff]   ;;  %v5859_v12 = vld [vmem:[%s7551_s1 + $0x570] sm:$0xff]  }
  0x64   :  { %3698 = vmatmul.mubr.bf16.vlgmr.msra.gmra.mrb[8].mxu1 %v5757_v43  ;;  %5191 = vmatprep.subr.bf16.mxu0 %v5763_v48  ;;  %v5824_v43 = vld [vmem:[%s7551_s1 + $0x4b0] sm:$0xff]   ;;  %v5830_v48 = vld [vmem:[%s7552_s0 + $0x44] ss:$196 sps:$4 sm:$0xff]  }
  0x65   :  { %5212 = vmatpush3.bf16.msra.mxu1 %v5762_v47  ;;  %3779 = vmatprep.mubr.bf16.mxu1 %v5797_v16  ;;  %v5828_v47 = vld [vmem:[%s7552_s0 + $0x40] ss:$196 sps:$4 sm:$0xff]   ;;  %v5863_v16 = vld [vmem:[%s7551_s1 + $0x578] sm:$0xff]  }
  0x66   :  { %5213 = vmatprep.subr.bf16.mxu1 %v5765_v50  ;;  %v5832_v50 = vld [vmem:[%s7551_s1 + $0x540] sm:$0xff]  }
  0x67   :  { %5192 = vmatpush3.bf16.msra.mxu0 %v5764_v49  ;;  %v5831_v49 = vld [vmem:[%s7551_s1 + $0x4b8] sm:$0xff]  }
  0x68   :  { %5193 = vmatprep.subr.bf16.mxu0 %v5767_v52  ;;  %v5835_v52 = vld [vmem:[%s7552_s0 + $0x4c] ss:$196 sps:$4 sm:$0xff]  }
  0x69   :  { %5214 = vmatpush3.bf16.msra.mxu1 %v5766_v51  ;;  %v5833_v51 = vld [vmem:[%s7552_s0 + $0x48] ss:$196 sps:$4 sm:$0xff]  }
  0x6a   :  { %5215 = vmatprep.subr.bf16.mxu1 %v5769_v54  ;;  %v5837_v54 = vld [vmem:[%s7551_s1 + $0x5c0] sm:$0xff]  }
  0x6b   :  { %5194 = vmatpush3.bf16.msra.mxu0 %v5768_v53  ;;  %v5836_v53 = vld [vmem:[%s7551_s1 + $0x500] sm:$0xff]  }
  0x6c   :  { %5195 = vmatprep.subr.bf16.mxu0 %v5771_v56  ;;  %v5839_v56 = vld [vmem:[%s7551_s1 + $0x548] sm:$0xff]  }
  0x6d   :  { %5216 = vmatpush3.bf16.msra.mxu1 %v5770_v55  ;;  %v5838_v55 = vld [vmem:[%s7551_s1 + $0x580] sm:$0xff]  }
  0x6e   :  { %5217 = vmatprep.subr.bf16.mxu1 %v5773_v58  ;;  %v5841_v58 = vld [vmem:[%s7551_s1 + $0x5c8] sm:$0xff]  }
  0x6f   :  { %5196 = vmatpush3.bf16.msra.mxu0 %v5772_v57  ;;  %v5840_v57 = vld [vmem:[%s7551_s1 + $0x508] sm:$0xff]  }
  0x70   :  { %5197 = vmatprep.subr.bf16.mxu0 %v5775_v60  ;;  %v5843_v60 = vld [vmem:[%s7551_s1 + $0x550] sm:$0xff]  }
  0x71   :  { %5218 = vmatpush3.bf16.msra.mxu1 %v5774_v59  ;;  %v5842_v59 = vld [vmem:[%s7551_s1 + $0x588] sm:$0xff]  }
  0x72   :  { %5219 = vmatprep.subr.bf16.mxu1 %v5777_v62  ;;  %v5845_v62 = vld [vmem:[%s7551_s1 + $0x5d0] sm:$0xff]  }
  0x73   :  { %5198 = vmatpush3.bf16.msra.mxu0 %v5776_v61  ;;  %v5844_v61 = vld [vmem:[%s7551_s1 + $0x510] sm:$0xff]  }
  0x74   :  { %5199 = vmatprep.subr.bf16.mxu0 %v5779_v0  ;;  %v5847_v0 = vld [vmem:[%s7551_s1 + $0x558] sm:$0xff]  }
  0x75   :  { %5220 = vmatpush3.bf16.msra.mxu1 %v5778_v63  ;;  %v5846_v63 = vld [vmem:[%s7551_s1 + $0x590] sm:$0xff]  }
  0x76   :  { %5221 = vmatprep.subr.bf16.mxu1 %v5781_v2  ;;  %v5849_v2 = vld [vmem:[%s7551_s1 + $0x5d8] sm:$0xff]  }
  0x77   :  { %5200 = vmatpush3.bf16.msra.mxu0 %v5780_v1  ;;  %v5848_v1 = vld [vmem:[%s7551_s1 + $0x518] sm:$0xff]  }
  0x78   :  { %5201 = vmatprep.subr.bf16.mxu0 %v5783_v4  ;;  %v5851_v4 = vld [vmem:[%s7551_s1 + $0x560] sm:$0xff]  }
  0x79   :  { %5222 = vmatpush3.bf16.msra.mxu1 %v5782_v3  ;;  %v5850_v3 = vld [vmem:[%s7551_s1 + $0x598] sm:$0xff]  }
  0x7a   :  { %5223 = vmatprep.subr.bf16.mxu1 %v5785_v6  ;;  %v5853_v6 = vld [vmem:[%s7551_s1 + $0x5e0] sm:$0xff]  }
  0x7b   :  { %5202 = vmatpush3.bf16.msra.mxu0 %v5784_v5  ;;  %v5852_v5 = vld [vmem:[%s7551_s1 + $0x520] sm:$0xff]  }
  0x7c   :  { %5203 = vmatprep.subr.bf16.mxu0 %v5787_v8  ;;  %v5855_v8 = vld [vmem:[%s7551_s1 + $0x568] sm:$0xff]  }
  0x7d   :  { %5224 = vmatpush3.bf16.msra.mxu1 %v5786_v7  ;;  %v5854_v7 = vld [vmem:[%s7551_s1 + $0x5a0] sm:$0xff]  }
  0x7e   :  { %5225 = vmatprep.subr.bf16.mxu1 %v5789_v10  ;;  %v5857_v10 = vld [vmem:[%s7551_s1 + $0x5e8] sm:$0xff]  }
  0x7f   :  { %5204 = vmatpush3.bf16.msra.mxu0 %v5788_v9  ;;  %v5856_v9 = vld [vmem:[%s7551_s1 + $0x528] sm:$0xff]  }
  0x80   :  { %5233 = vmatprep.subr.bf16.mxu0 %v5794_v14  ;;  %v5861_v14 = vld [vmem:[%s7551_s1 + $0x5f0] sm:$0xff]  }
  0x81   :  { %5226 = vmatpush3.bf16.msra.mxu1 %v5793_v13  ;;  %v5860_v13 = vld [vmem:[%s7551_s1 + $0x530] sm:$0xff]  }
  0x82   :  { %3739 = vmatmul.mubr.bf16.vlgmr.msra.gmra.mrb[12].mxu0 %v5790_v11  ;;  %5255 = vmatprep.subr.bf16.mxu1 %v5799_v18  ;;  %v5858_v11 = vld [vmem:[%s7551_s1 + $0x5a8] sm:$0xff]   ;;  %v5865_v18 = vld [vmem:[%s7551_s1 + $0x5f8] sm:$0xff]  }
  0x83   :  { %5234 = vmatpush3.bf16.msra.mxu0 %v5798_v17  ;;  %3820 = vmatprep.mubr.bf16.mxu0 %v5830_v48  ;;  %v5864_v17 = vld [vmem:[%s7551_s1 + $0x538] sm:$0xff]   ;;  %v5897_v48 = vld [vmem:[%s7551_s1 + $0x670] sm:$0xff]  }
  0x84   :  { %3780 = vmatmul.mubr.bf16.vlgmr.msra.gmra.mrb[12].mxu1 %v5795_v15  ;;  %5235 = vmatprep.subr.bf16.mxu0 %v5801_v20  ;;  %v5862_v15 = vld [vmem:[%s7551_s1 + $0x5b0] sm:$0xff]  }
  0x85   :  { %5256 = vmatpush3.bf16.msra.mxu1 %v5800_v19  ;;  %3861 = vmatprep.mubr.bf16.mxu1 %v5835_v52  ;;  %v5866_v19 = vld [vmem:[%s7552_s0 + $0x50] ss:$196 sps:$4 sm:$0xff]   ;;  %v5901_v52 = vld [vmem:[%s7551_s1 + $0x678] sm:$0xff]  }
  0x86   :  { %5257 = vmatprep.subr.bf16.mxu1 %v5803_v22  ;;  %v5868_v20 = vld [vmem:[%s7552_s0 + $0x54] ss:$196 sps:$4 sm:$0xff]   ;;  %v5870_v22 = vld [vmem:[%s7551_s1 + $0x640] sm:$0xff]  }
  0x87   :  { %5236 = vmatpush3.bf16.msra.mxu0 %v5802_v21  ;;  %v5869_v21 = vld [vmem:[%s7551_s1 + $0x5b8] sm:$0xff]  }
  0x88   :  { %5237 = vmatprep.subr.bf16.mxu0 %v5805_v24  ;;  %v5873_v24 = vld [vmem:[%s7552_s0 + $0x5c] ss:$196 sps:$4 sm:$0xff]  }
  0x89   :  { %5258 = vmatpush3.bf16.msra.mxu1 %v5804_v23  ;;  %v5871_v23 = vld [vmem:[%s7552_s0 + $0x58] ss:$196 sps:$4 sm:$0xff]  }
  0x8a   :  { %5259 = vmatprep.subr.bf16.mxu1 %v5807_v26  ;;  %v5875_v26 = vld [vmem:[%s7551_s1 + $0x6c0] sm:$0xff]  }
  0x8b   :  { %5238 = vmatpush3.bf16.msra.mxu0 %v5806_v25  ;;  %v5874_v25 = vld [vmem:[%s7551_s1 + $0x600] sm:$0xff]  }
  0x8c   :  { %5239 = vmatprep.subr.bf16.mxu0 %v5809_v28  ;;  %v5877_v28 = vld [vmem:[%s7551_s1 + $0x648] sm:$0xff]  }
  0x8d   :  { %5260 = vmatpush3.bf16.msra.mxu1 %v5808_v27  ;;  %v5876_v27 = vld [vmem:[%s7551_s1 + $0x680] sm:$0xff]  }
  0x8e   :  { %5261 = vmatprep.subr.bf16.mxu1 %v5811_v30  ;;  %v5879_v30 = vld [vmem:[%s7551_s1 + $0x6c8] sm:$0xff]  }
  0x8f   :  { %5240 = vmatpush3.bf16.msra.mxu0 %v5810_v29  ;;  %v5878_v29 = vld [vmem:[%s7551_s1 + $0x608] sm:$0xff]  }
  0x90   :  { %5241 = vmatprep.subr.bf16.mxu0 %v5813_v32  ;;  %v5881_v32 = vld [vmem:[%s7551_s1 + $0x650] sm:$0xff]  }
  0x91   :  { %5262 = vmatpush3.bf16.msra.mxu1 %v5812_v31  ;;  %v5880_v31 = vld [vmem:[%s7551_s1 + $0x688] sm:$0xff]  }
  0x92   :  { %5263 = vmatprep.subr.bf16.mxu1 %v5815_v34  ;;  %v5883_v34 = vld [vmem:[%s7551_s1 + $0x6d0] sm:$0xff]  }
  0x93   :  { %5242 = vmatpush3.bf16.msra.mxu0 %v5814_v33  ;;  %v5882_v33 = vld [vmem:[%s7551_s1 + $0x610] sm:$0xff]  }
  0x94   :  { %5243 = vmatprep.subr.bf16.mxu0 %v5817_v36  ;;  %v5885_v36 = vld [vmem:[%s7551_s1 + $0x658] sm:$0xff]  }
  0x95   :  { %5264 = vmatpush3.bf16.msra.mxu1 %v5816_v35  ;;  %v5884_v35 = vld [vmem:[%s7551_s1 + $0x690] sm:$0xff]  }
  0x96   :  { %5265 = vmatprep.subr.bf16.mxu1 %v5819_v38  ;;  %v5887_v38 = vld [vmem:[%s7551_s1 + $0x6d8] sm:$0xff]  }
  0x97   :  { %5244 = vmatpush3.bf16.msra.mxu0 %v5818_v37  ;;  %v5886_v37 = vld [vmem:[%s7551_s1 + $0x618] sm:$0xff]  }
  0x98   :  { %5245 = vmatprep.subr.bf16.mxu0 %v5821_v40  ;;  %v5889_v40 = vld [vmem:[%s7551_s1 + $0x660] sm:$0xff]  }
  0x99   :  { %5266 = vmatpush3.bf16.msra.mxu1 %v5820_v39  ;;  %v5888_v39 = vld [vmem:[%s7551_s1 + $0x698] sm:$0xff]  }
  0x9a   :  { %5267 = vmatprep.subr.bf16.mxu1 %v5823_v42  ;;  %v5891_v42 = vld [vmem:[%s7551_s1 + $0x6e0] sm:$0xff]  }
  0x9b   :  { %5246 = vmatpush3.bf16.msra.mxu0 %v5822_v41  ;;  %v5890_v41 = vld [vmem:[%s7551_s1 + $0x620] sm:$0xff]  }
  0x9c   :  { %5247 = vmatprep.subr.bf16.mxu0 %v5825_v44  ;;  %v5893_v44 = vld [vmem:[%s7551_s1 + $0x668] sm:$0xff]  }
  0x9d   :  { %5268 = vmatpush3.bf16.msra.mxu1 %v5824_v43  ;;  %v5892_v43 = vld [vmem:[%s7551_s1 + $0x6a0] sm:$0xff]  }
  0x9e   :  { %5269 = vmatprep.subr.bf16.mxu1 %v5827_v46  ;;  %v5895_v46 = vld [vmem:[%s7551_s1 + $0x6e8] sm:$0xff]  }
  0x9f   :  { %5248 = vmatpush3.bf16.msra.mxu0 %v5826_v45  ;;  %v5894_v45 = vld [vmem:[%s7551_s1 + $0x628] sm:$0xff]  }
  0xa0   :  { %5277 = vmatprep.subr.bf16.mxu0 %v5832_v50  ;;  %v5899_v50 = vld [vmem:[%s7551_s1 + $0x6f0] sm:$0xff]  }
  0xa1   :  { %5270 = vmatpush3.bf16.msra.mxu1 %v5831_v49  ;;  %v5898_v49 = vld [vmem:[%s7551_s1 + $0x630] sm:$0xff]  }
  0xa2   :  { %3821 = vmatmul.mubr.bf16.vlgmr.msra.gmra.mrb[16].mxu0 %v5828_v47  ;;  %5299 = vmatprep.subr.bf16.mxu1 %v5837_v54  ;;  %v5896_v47 = vld [vmem:[%s7551_s1 + $0x6a8] sm:$0xff]   ;;  %v5903_v54 = vld [vmem:[%s7551_s1 + $0x6f8] sm:$0xff]  }
  0xa3   :  { %5278 = vmatpush3.bf16.msra.mxu0 %v5836_v53  ;;  %3902 = vmatprep.mubr.bf16.mxu0 %v5868_v20  ;;  %v5902_v53 = vld [vmem:[%s7551_s1 + $0x638] sm:$0xff]  }
  0xa4   :  { %3862 = vmatmul.mubr.bf16.vlgmr.msra.gmra.mrb[16].mxu1 %v5833_v51  ;;  %5279 = vmatprep.subr.bf16.mxu0 %v5839_v56  ;;  %v5900_v51 = vld [vmem:[%s7551_s1 + $0x6b0] sm:$0xff]   ;;  %v5906_v56 = vld [vmem:[%s7552_s0 + $0x64] ss:$196 sps:$4 sm:$0xff]   ;;  %v5923_v20 = vld [vmem:[%s7551_s1 + $0x758] sm:$0xff]  }
  0xa5   :  { %5300 = vmatpush3.bf16.msra.mxu1 %v5838_v55  ;;  %3943 = vmatprep.mubr.bf16.mxu1 %v5873_v24  ;;  %v5904_v55 = vld [vmem:[%s7552_s0 + $0x60] ss:$196 sps:$4 sm:$0xff]  }
  0xa6   :  { %5301 = vmatprep.subr.bf16.mxu1 %v5841_v58  ;;  %v5908_v58 = vld [vmem:[%s7551_s1 + $0x740] sm:$0xff]  }
  0xa7   :  { %5280 = vmatpush3.bf16.msra.mxu0 %v5840_v57  ;;  %v5907_v57 = vld [vmem:[%s7551_s1 + $0x6b8] sm:$0xff]   ;;  %v5927_v24 = vld [vmem:[%s7551_s1 + $0x760] sm:$0xff]  }
  0xa8   :  { %5281 = vmatprep.subr.bf16.mxu0 %v5843_v60  ;;  %v5911_v60 = vld [vmem:[%s7552_s0 + $0x6c] ss:$196 sps:$4 sm:$0xff]  }
  0xa9   :  { %5302 = vmatpush3.bf16.msra.mxu1 %v5842_v59  ;;  %v5909_v59 = vld [vmem:[%s7552_s0 + $0x68] ss:$196 sps:$4 sm:$0xff]  }
  0xaa   :  { %5303 = vmatprep.subr.bf16.mxu1 %v5845_v62  ;;  %v5913_v62 = vld [vmem:[%s7551_s1 + $0x7c0] sm:$0xff]  }
  0xab   :  { %5282 = vmatpush3.bf16.msra.mxu0 %v5844_v61  ;;  %v5912_v61 = vld [vmem:[%s7551_s1 + $0x700] sm:$0xff]  }
  0xac   :  { %5283 = vmatprep.subr.bf16.mxu0 %v5847_v0 }
  0xad   :  { %5304 = vmatpush3.bf16.msra.mxu1 %v5846_v63  ;;  %v5914_v63 = vld [vmem:[%s7551_s1 + $0x780] sm:$0xff]  }
  0xae   :  { %5305 = vmatprep.subr.bf16.mxu1 %v5849_v2 }
  0xaf   :  { %5284 = vmatpush3.bf16.msra.mxu0 %v5848_v1  ;;  %v5915_v1 = vld [vmem:[%s7551_s1 + $0x748] sm:$0xff]  }
  0xb0   :  { %5285 = vmatprep.subr.bf16.mxu0 %v5851_v4 }
  0xb1   :  { %5306 = vmatpush3.bf16.msra.mxu1 %v5850_v3  ;;  %v5916_v3 = vld [vmem:[%s7551_s1 + $0x708] sm:$0xff]  }
  0xb2   :  { %5307 = vmatprep.subr.bf16.mxu1 %v5853_v6  ;;  %v5917_v6 = vld [vmem:[%s7551_s1 + $0x7c8] sm:$0xff]  }
  0xb3   :  { %5286 = vmatpush3.bf16.msra.mxu0 %v5852_v5 }
  0xb4   :  { %5287 = vmatprep.subr.bf16.mxu0 %v5855_v8  ;;  %v5918_v8 = vld [vmem:[%s7551_s1 + $0x788] sm:$0xff]  }
  0xb5   :  { %5308 = vmatpush3.bf16.msra.mxu1 %v5854_v7 }
  0xb6   :  { %5309 = vmatprep.subr.bf16.mxu1 %v5857_v10  ;;  %v5919_v10 = vld [vmem:[%s7551_s1 + $0x750] sm:$0xff]  }
  0xb7   :  { %5288 = vmatpush3.bf16.msra.mxu0 %v5856_v9 }
  0xb8   :  { %5289 = vmatprep.subr.bf16.mxu0 %v5859_v12 }
  0xb9   :  { %5310 = vmatpush3.bf16.msra.mxu1 %v5858_v11 }
  0xba   :  { %5311 = vmatprep.subr.bf16.mxu1 %v5861_v14 }
  0xbb   :  { %5290 = vmatpush3.bf16.msra.mxu0 %v5860_v13  ;;  %v5920_v13 = vld [vmem:[%s7551_s1 + $0x710] sm:$0xff]  }
  0xbc   :  { %5291 = vmatprep.subr.bf16.mxu0 %v5863_v16  ;;  %v5921_v16 = vld [vmem:[%s7551_s1 + $0x7d0] sm:$0xff]  }
  0xbd   :  { %5312 = vmatpush3.bf16.msra.mxu1 %v5862_v15 }
  0xbe   :  { %5313 = vmatprep.subr.bf16.mxu1 %v5865_v18  ;;  %v5922_v18 = vld [vmem:[%s7551_s1 + $0x790] sm:$0xff]  }
  0xbf   :  { %5292 = vmatpush3.bf16.msra.mxu0 %v5864_v17 }
  0xc0   :  { %5321 = vmatprep.subr.bf16.mxu0 %v5870_v22  ;;  %v5925_v22 = vld [vmem:[%s7551_s1 + $0x7d8] sm:$0xff]  }
  0xc1   :  { %5314 = vmatpush3.bf16.msra.mxu1 %v5869_v21  ;;  %v5924_v21 = vld [vmem:[%s7551_s1 + $0x718] sm:$0xff]  }
  0xc2   :  { %3903 = vmatmul.mubr.bf16.vlgmr.msra.gmra.mrb[20].mxu0 %v5866_v19  ;;  %5343 = vmatprep.subr.bf16.mxu1 %v5875_v26  ;;  %v5929_v26 = vld [vmem:[%s7551_s1 + $0x7e0] sm:$0xff]  }
  0xc3   :  { %5322 = vmatpush3.bf16.msra.mxu0 %v5874_v25  ;;  %3984 = vmatprep.mubr.bf16.mxu0 %v5906_v56  ;;  %v5928_v25 = vld [vmem:[%s7551_s1 + $0x720] sm:$0xff]  }
  0xc4   :  { %3944 = vmatmul.mubr.bf16.vlgmr.msra.gmra.mrb[20].mxu1 %v5871_v23  ;;  %5323 = vmatprep.subr.bf16.mxu0 %v5877_v28  ;;  %v5926_v23 = vld [vmem:[%s7551_s1 + $0x798] sm:$0xff]   ;;  %v4606_v28 = vld [vmem:[%s7553_s2] ss:$0 sm:$0xff] }
  0xc5   :  { %5344 = vmatpush3.bf16.msra.mxu1 %v5876_v27  ;;  %4025 = vmatprep.mubr.bf16.mxu1 %v5911_v60  ;;  %v5930_v27 = vld [vmem:[%s7551_s1 + $0x7a0] sm:$0xff]   ;;  %v5955_v60 = vld [vmem:[%s7551_s1 + $0x8c8] sm:$0xff]  }
  0xc6   :  { %5345 = vmatprep.subr.bf16.mxu1 %v5879_v30  ;;  %v5931_v30 = vld [vmem:[%s7551_s1 + $0x768] sm:$0xff]  }
  0xc7   :  { %5324 = vmatpush3.bf16.msra.mxu0 %v5878_v29 }
  0xc8   :  { %5325 = vmatprep.subr.bf16.mxu0 %v5881_v32  ;;  %v5932_v32 = vld [vmem:[%s7551_s1 + $0x728] sm:$0xff]  }
  0xc9   :  { %5346 = vmatpush3.bf16.msra.mxu1 %v5880_v31 }
  0xca   :  { %5347 = vmatprep.subr.bf16.mxu1 %v5883_v34  ;;  %v5933_v34 = vld [vmem:[%s7551_s1 + $0x7e8] sm:$0xff]  }
  0xcb   :  { %5326 = vmatpush3.bf16.msra.mxu0 %v5882_v33 }
  0xcc   :  { %5327 = vmatprep.subr.bf16.mxu0 %v5885_v36  ;;  %v5934_v36 = vld [vmem:[%s7551_s1 + $0x7a8] sm:$0xff]  }
  0xcd   :  { %5348 = vmatpush3.bf16.msra.mxu1 %v5884_v35 }
  0xce   :  { %5349 = vmatprep.subr.bf16.mxu1 %v5887_v38  ;;  %v5936_v38 = vld [vmem:[%s7551_s1 + $0x730] sm:$0xff]  }
  0xcf   :  { %5328 = vmatpush3.bf16.msra.mxu0 %v5886_v37  ;;  %v5935_v37 = vld [vmem:[%s7551_s1 + $0x770] sm:$0xff]  }
  0xd0   :  { %5329 = vmatprep.subr.bf16.mxu0 %v5889_v40  ;;  %v5938_v40 = vld [vmem:[%s7551_s1 + $0x7b0] sm:$0xff]  }
  0xd1   :  { %5350 = vmatpush3.bf16.msra.mxu1 %v5888_v39  ;;  %v5937_v39 = vld [vmem:[%s7551_s1 + $0x7f0] sm:$0xff]  }
  0xd2   :  { %5351 = vmatprep.subr.bf16.mxu1 %v5891_v42  ;;  %v5940_v42 = vld [vmem:[%s7551_s1 + $0x738] sm:$0xff]  }
  0xd3   :  { %5330 = vmatpush3.bf16.msra.mxu0 %v5890_v41  ;;  %v5939_v41 = vld [vmem:[%s7551_s1 + $0x778] sm:$0xff]  }
  0xd4   :  { %5331 = vmatprep.subr.bf16.mxu0 %v5893_v44  ;;  %v5942_v44 = vld [vmem:[%s7552_s0 + $0x70] ss:$196 sps:$4 sm:$0xff]  }
  0xd5   :  { %5352 = vmatpush3.bf16.msra.mxu1 %v5892_v43  ;;  %v5941_v43 = vld [vmem:[%s7551_s1 + $0x7f8] sm:$0xff]  }
  0xd6   :  { %5353 = vmatprep.subr.bf16.mxu1 %v5895_v46  ;;  %v5945_v46 = vld [vmem:[%s7551_s1 + $0x7b8] sm:$0xff]  }
  0xd7   :  { %5332 = vmatpush3.bf16.msra.mxu0 %v5894_v45  ;;  %v5944_v45 = vld [vmem:[%s7552_s0 + $0x74] ss:$196 sps:$4 sm:$0xff]  }
  0xd8   :  { %5333 = vmatprep.subr.bf16.mxu0 %v5897_v48  ;;  %v5947_v48 = vld [vmem:[%s7552_s0 + $0x78] ss:$196 sps:$4 sm:$0xff]  }
  0xd9   :  { %5354 = vmatpush3.bf16.msra.mxu1 %v5896_v47  ;;  %v5946_v47 = vld [vmem:[%s7551_s1 + $0x840] sm:$0xff]  }
  0xda   :  { %5355 = vmatprep.subr.bf16.mxu1 %v5899_v50  ;;  %v5950_v50 = vld [vmem:[%s7551_s1 + $0x800] sm:$0xff]  }
  0xdb   :  { %5334 = vmatpush3.bf16.msra.mxu0 %v5898_v49  ;;  %v5949_v49 = vld [vmem:[%s7552_s0 + $0x7c] ss:$196 sps:$4 sm:$0xff]  }
  0xdc   :  { %5335 = vmatprep.subr.bf16.mxu0 %v5901_v52 }
  0xdd   :  { %5356 = vmatpush3.bf16.msra.mxu1 %v5900_v51  ;;  %v5951_v51 = vld [vmem:[%s7551_s1 + $0x8c0] sm:$0xff]  }
  0xde   :  { %5357 = vmatprep.subr.bf16.mxu1 %v5903_v54 }
  0xdf   :  { %5336 = vmatpush3.bf16.msra.mxu0 %v5902_v53  ;;  %v5952_v53 = vld [vmem:[%s7551_s1 + $0x880] sm:$0xff]  }
  0xe0   :  { %5365 = vmatprep.subr.bf16.mxu0 %v5908_v58  ;;  %v5954_v58 = vld [vmem:[%s7551_s1 + $0x808] sm:$0xff]  }
  0xe1   :  { %5358 = vmatpush3.bf16.msra.mxu1 %v5907_v57 }
  0xe2   :  { %3985 = vmatmul.mubr.bf16.vlgmr.msra.gmra.mrb[24].mxu0 %v5904_v55  ;;  %5387 = vmatprep.subr.bf16.mxu1 %v5913_v62  ;;  %v5953_v55 = vld [vmem:[%s7551_s1 + $0x848] sm:$0xff]  }
  0xe3   :  { %5366 = vmatpush3.bf16.msra.mxu0 %v5912_v61  ;;  %4066 = vmatprep.mubr.bf16.mxu0 %v5944_v45 }
  0xe4   :  { %4026 = vmatmul.mubr.bf16.vlgmr.msra.gmra.mrb[24].mxu1 %v5909_v59  ;;  %5367 = vmatprep.subr.bf16.mxu0 %v5915_v1 }
  0xe5   :  { %5388 = vmatpush3.bf16.msra.mxu1 %v5914_v63  ;;  %4107 = vmatprep.mubr.bf16.mxu1 %v5949_v49 }
  0xe6   :  { %5389 = vmatprep.subr.bf16.mxu1 %v5917_v6  ;;  %v5958_v6 = vld [vmem:[%s7551_s1 + $0x810] sm:$0xff]  }
  0xe7   :  { %5368 = vmatpush3.bf16.msra.mxu0 %v5916_v3 }
  0xe8   :  { %5369 = vmatprep.subr.bf16.mxu0 %v5919_v10 }
  0xe9   :  { %5390 = vmatpush3.bf16.msra.mxu1 %v5918_v8  ;;  %v5959_v8 = vld [vmem:[%s7551_s1 + $0x8d0] sm:$0xff]  }
  0xea   :  { %5391 = vmatprep.subr.bf16.mxu1 %v5921_v16  ;;  %v5964_v16 = vld [vmem:[%s7551_s1 + $0x898] sm:$0xff]  }
  0xeb   :  { %5370 = vmatpush3.bf16.msra.mxu0 %v5920_v13 }
  0xec   :  { %5371 = vmatprep.subr.bf16.mxu0 %v5923_v20  ;;  %v5968_v20 = vld [vmem:[%s7551_s1 + $0x8a0] sm:$0xff]  }
  0xed   :  { %5392 = vmatpush3.bf16.msra.mxu1 %v5922_v18  ;;  %v5966_v18 = vld [vmem:[%s7551_s1 + $0x820] sm:$0xff]  }
  0xee   :  { %5393 = vmatprep.subr.bf16.mxu1 %v5925_v22  ;;  %v5970_v22 = vld [vmem:[%s7551_s1 + $0x828] sm:$0xff]  }
  0xef   :  { %5372 = vmatpush3.bf16.msra.mxu0 %v5924_v21  ;;  %v5969_v21 = vld [vmem:[%s7551_s1 + $0x868] sm:$0xff]  }
  0xf0   :  { %5373 = vmatprep.subr.bf16.mxu0 %v5927_v24  ;;  %v5972_v24 = vld [vmem:[%s7551_s1 + $0x8a8] sm:$0xff]  }
  0xf1   :  { %5394 = vmatpush3.bf16.msra.mxu1 %v5926_v23  ;;  %v5971_v23 = vld [vmem:[%s7551_s1 + $0x8e8] sm:$0xff]  }
  0xf2   :  { %5395 = vmatprep.subr.bf16.mxu1 %v5929_v26  ;;  %v5974_v26 = vld [vmem:[%s7551_s1 + $0x830] sm:$0xff]  }
  0xf3   :  { %5374 = vmatpush3.bf16.msra.mxu0 %v5928_v25  ;;  %v5973_v25 = vld [vmem:[%s7551_s1 + $0x870] sm:$0xff]  }
  0xf4   :  { %5375 = vmatprep.subr.bf16.mxu0 %v5931_v30  ;;  %v5978_v30 = vld [vmem:[%s7551_s1 + $0x838] sm:$0xff]  }
  0xf5   :  { %v5073_v0 = vpop.f32.mrb[0].mxu0  ;;  %5396 = vmatpush3.bf16.msra.mxu1 %v5930_v27  ;;  %v5975_v27 = vld [vmem:[%s7551_s1 + $0x8f0] sm:$0xff]  }
  0xf6   :  { %v5074_v2 = vpop.f32.mrb[1].mxu0  ;;  %5397 = vmatprep.subr.bf16.mxu1 %v5933_v34  ;;  %v5983_v34 = vld [vmem:[%s7551_s1 + $0x8b8] sm:$0xff]  }
  0xf7   :  { %v5075_v4 = vadd.f32 %v5074_v2, %v5073_v0  ;;  %v5076_v5 = vpop.f32.mrb[2].mxu0  ;;  %v5095_v7 = vpop.f32.mrb[0].mxu1  ;;  %5376 = vmatpush3.bf16.msra.mxu0 %v5932_v32  ;;  %v5956_v0 = vld [vmem:[%s7551_s1 + $0x888] sm:$0xff]   ;;  %v5957_v2 = vld [vmem:[%s7551_s1 + $0x850] sm:$0xff]   ;;  %v5980_v32 = vld [vmem:[%s7552_s0 + $0x80] ss:$196 sps:$4 sm:$0xff]  }
  0xf8   :  { %v5077_v9 = vpop.f32.mrb[3].mxu0  ;;  %v5096_v12 = vpop.f32.mrb[1].mxu1  ;;  %5377 = vmatprep.subr.bf16.mxu0 %v5935_v37  ;;  %v5987_v37 = vld [vmem:[%s7552_s0 + $0x8c] ss:$196 sps:$4 sm:$0xff]  }
  0xf9   :  { %v5078_v11 = vadd.f32 %v5077_v9, %v5076_v5  ;;  %v5097_v14 = vadd.f32 %v5096_v12, %v5095_v7  ;;  %v5098_v15 = vpop.f32.mrb[2].mxu1  ;;  %v3495_v29 = vadd.f32 %v5075_v4, %v4606_v28  ;;  %5398 = vmatpush3.bf16.msra.mxu1 %v5934_v36  ;;  %v5961_v12 = vld [vmem:[%s7551_s1 + $0x858] sm:$0xff]   ;;  %v5985_v36 = vld [vmem:[%s7552_s0 + $0x88] ss:$196 sps:$4 sm:$0xff]  }
  0xfa   :  { %v5099_v17 = vpop.f32.mrb[3].mxu1  ;;  %5399 = vmatprep.subr.bf16.mxu1 %v5937_v39  ;;  %v5989_v39 = vld [vmem:[%s7551_s1 + $0x9c0] sm:$0xff]  }
  0xfb   :  { %v5100_v19 = vadd.f32 %v5099_v17, %v5098_v15  ;;  %v3498_v31 = vadd.f32 %v5078_v11, %v4606_v28  ;;  %v3536_v33 = vadd.f32 %v5097_v14, %v3495_v29  ;;  %5378 = vmatpush3.bf16.msra.mxu0 %v5936_v38  ;;  %v5960_v11 = vld [vmem:[%s7551_s1 + $0x890] sm:$0xff]   ;;  %v5962_v14 = vld [vmem:[%s7551_s1 + $0x818] sm:$0xff]   ;;  %v5965_v17 = vld [vmem:[%s7551_s1 + $0x860] sm:$0xff]  }
  0xfc   :  { %5379 = vmatprep.subr.bf16.mxu0 %v5939_v41  ;;  %v5963_v15 = vld [vmem:[%s7551_s1 + $0x8d8] sm:$0xff]   ;;  %v5976_v28 = vld [vmem:[%s7551_s1 + $0x8b0] sm:$0xff]   ;;  %v5988_v38 = vld [vmem:[%s7551_s1 + $0x900] sm:$0xff]  }
  0xfd   :  { %v3539_v35 = vadd.f32 %v5100_v19, %v3498_v31  ;;  %5400 = vmatpush3.bf16.msra.mxu1 %v5938_v40  ;;  %v5967_v19 = vld [vmem:[%s7551_s1 + $0x8e0] sm:$0xff]   ;;  %v5977_v29 = vld [vmem:[%s7551_s1 + $0x878] sm:$0xff]  }
  0xfe   :  { %5401 = vmatprep.subr.bf16.mxu1 %v5941_v43  ;;  %v5979_v31 = vld [vmem:[%s7551_s1 + $0x8f8] sm:$0xff]   ;;  %v5990_v41 = vld [vmem:[%s7551_s1 + $0x980] sm:$0xff]   ;;  %v5991_v43 = vld [vmem:[%s7551_s1 + $0x948] sm:$0xff]  }
  0xff   :  { %5380 = vmatpush3.bf16.msra.mxu0 %v5940_v42 }
 0x100   :  { %5409 = vmatprep.subr.bf16.mxu0 %v5946_v47 }
 0x101   :  { %5402 = vmatpush3.bf16.msra.mxu1 %v5945_v46  ;;  %v5992_v46 = vld [vmem:[%s7551_s1 + $0x908] sm:$0xff]  }
 0x102   :  { %4067 = vmatmul.mubr.bf16.vlgmr.msra.gmra.mrb[28].mxu0 %v5942_v44  ;;  %5431 = vmatprep.subr.bf16.mxu1 %v5951_v51  ;;  %v5994_v51 = vld [vmem:[%s7551_s1 + $0x988] sm:$0xff]  }
 0x103   :  { %5410 = vmatpush3.bf16.msra.mxu0 %v5950_v50 }
 0x104   :  { %4108 = vmatmul.mubr.bf16.vlgmr.msra.gmra.mrb[28].mxu1 %v5947_v48  ;;  %5411 = vmatprep.subr.bf16.mxu0 %v5953_v55  ;;  %v5993_v48 = vld [vmem:[%s7551_s1 + $0x9c8] sm:$0xff]  }
 0x105   :  { %5432 = vmatpush3.bf16.msra.mxu1 %v5952_v53  ;;  %4189 = vmatprep.mubr.bf16.mxu1 %v5987_v37  ;;  %v6032_v37 = vld [vmem:[%s7551_s1 + $0xa88] sm:$0xff]  }
 0x106   :  { %5433 = vmatprep.subr.bf16.mxu1 %v5955_v60  ;;  %v5997_v60 = vld [vmem:[%s7551_s1 + $0x9d0] sm:$0xff]  }
 0x107   :  { %5412 = vmatpush3.bf16.msra.mxu0 %v5954_v58 }
 0x108   :  { %5413 = vmatprep.subr.bf16.mxu0 %v5957_v2  ;;  %v6000_v2 = vld [vmem:[%s7551_s1 + $0x918] sm:$0xff]  }
 0x109   :  { %5434 = vmatpush3.bf16.msra.mxu1 %v5956_v0  ;;  %v5999_v0 = vld [vmem:[%s7551_s1 + $0x958] sm:$0xff]  }
 0x10a   :  { %5435 = vmatprep.subr.bf16.mxu1 %v5959_v8  ;;  %v6006_v8 = vld [vmem:[%s7551_s1 + $0x9a0] sm:$0xff]  }
 0x10b   :  { %5414 = vmatpush3.bf16.msra.mxu0 %v5958_v6  ;;  %v6004_v6 = vld [vmem:[%s7551_s1 + $0x920] sm:$0xff]  }
 0x10c   :  { %5415 = vmatprep.subr.bf16.mxu0 %v5961_v12  ;;  %v6010_v12 = vld [vmem:[%s7551_s1 + $0x9a8] sm:$0xff]  }
 0x10d   :  { %5436 = vmatpush3.bf16.msra.mxu1 %v5960_v11  ;;  %v6009_v11 = vld [vmem:[%s7551_s1 + $0x9e8] sm:$0xff]  }
 0x10e   :  { %5437 = vmatprep.subr.bf16.mxu1 %v5963_v15  ;;  %v6013_v15 = vld [vmem:[%s7551_s1 + $0x9f0] sm:$0xff]  }
 0x10f   :  { %5416 = vmatpush3.bf16.msra.mxu0 %v5962_v14  ;;  %v6012_v14 = vld [vmem:[%s7551_s1 + $0x930] sm:$0xff]  }
 0x110   :  { %5417 = vmatprep.subr.bf16.mxu0 %v5965_v17  ;;  %v6015_v17 = vld [vmem:[%s7551_s1 + $0x978] sm:$0xff]  }
 0x111   :  { %5438 = vmatpush3.bf16.msra.mxu1 %v5964_v16  ;;  %v6014_v16 = vld [vmem:[%s7551_s1 + $0x9b0] sm:$0xff]  }
 0x112   :  { %5439 = vmatprep.subr.bf16.mxu1 %v5967_v19  ;;  %v6017_v19 = vld [vmem:[%s7551_s1 + $0x9f8] sm:$0xff]  }
 0x113   :  { %5418 = vmatpush3.bf16.msra.mxu0 %v5966_v18  ;;  %v6016_v18 = vld [vmem:[%s7551_s1 + $0x938] sm:$0xff]  }
 0x114   :  { %5419 = vmatprep.subr.bf16.mxu0 %v5969_v21  ;;  %v6020_v21 = vld [vmem:[%s7552_s0 + $0x94] ss:$196 sps:$4 sm:$0xff]  }
 0x115   :  { %v5117_v52 = vpop.f32.mrb[4].mxu0  ;;  %5440 = vmatpush3.bf16.msra.mxu1 %v5968_v20  ;;  %v6018_v20 = vld [vmem:[%s7552_s0 + $0x90] ss:$196 sps:$4 sm:$0xff]  }
 0x116   :  { %v5118_v54 = vpop.f32.mrb[5].mxu0  ;;  %5441 = vmatprep.subr.bf16.mxu1 %v5971_v23  ;;  %v6022_v23 = vld [vmem:[%s7551_s1 + $0xa40] sm:$0xff]  }
 0x117   :  { %v5119_v56 = vadd.f32 %v5118_v54, %v5117_v52  ;;  %v5120_v57 = vpop.f32.mrb[6].mxu0  ;;  %v5139_v62 = vpop.f32.mrb[4].mxu1  ;;  %5420 = vmatpush3.bf16.msra.mxu0 %v5970_v22  ;;  %v5995_v54 = vld [vmem:[%s7551_s1 + $0x950] sm:$0xff]   ;;  %v6021_v22 = vld [vmem:[%s7551_s1 + $0x9b8] sm:$0xff]  }
 0x118   :  { %v5121_v59 = vpop.f32.mrb[7].mxu0  ;;  %v5140_v1 = vpop.f32.mrb[5].mxu1  ;;  %5421 = vmatprep.subr.bf16.mxu0 %v5973_v25  ;;  %v6025_v25 = vld [vmem:[%s7552_s0 + $0x9c] ss:$196 sps:$4 sm:$0xff]  }
 0x119   :  { %v3577_v61 = vadd.f32 %v5119_v56, %v3536_v33  ;;  %v5122_v63 = vadd.f32 %v5121_v59, %v5120_v57  ;;  %v5141_v4 = vadd.f32 %v5140_v1, %v5139_v62  ;;  %v5142_v5 = vpop.f32.mrb[6].mxu1  ;;  %5442 = vmatpush3.bf16.msra.mxu1 %v5972_v24  ;;  %v5982_v33 = vld [vmem:[%s7552_s0 + $0x84] ss:$196 sps:$4 sm:$0xff]   ;;  %v5996_v57 = vld [vmem:[%s7551_s1 + $0x910] sm:$0xff]   ;;  %v6023_v24 = vld [vmem:[%s7552_s0 + $0x98] ss:$196 sps:$4 sm:$0xff]  }
 0x11a   :  { %v5143_v7 = vpop.f32.mrb[7].mxu1  ;;  %5443 = vmatprep.subr.bf16.mxu1 %v5975_v27  ;;  %4148 = vmatprep.mubr.bf16.mxu0 %v5982_v33  ;;  %v6027_v27 = vld [vmem:[%s7551_s1 + $0xac0] sm:$0xff]  }
 0x11b   :  { %v3580_v3 = vadd.f32 %v5122_v63, %v3539_v35  ;;  %v7050_v9 = vadd.f32 %v5141_v4, %v3577_v61  ;;  %v5144_v10 = vadd.f32 %v5143_v7, %v5142_v5  ;;  %5422 = vmatpush3.bf16.msra.mxu0 %v5974_v26  ;;  %v5984_v35 = vld [vmem:[%s7551_s1 + $0x940] sm:$0xff]   ;;  %v5998_v63 = vld [vmem:[%s7551_s1 + $0x990] sm:$0xff]   ;;  %v6002_v4 = vld [vmem:[%s7551_s1 + $0x998] sm:$0xff]  }
 0x11c   :  { %5423 = vmatprep.subr.bf16.mxu0 %v5977_v29  ;;  %v6003_v5 = vld [vmem:[%s7551_s1 + $0x960] sm:$0xff]  }
 0x11d   :  { %v7058_v13 = vadd.f32 %v5144_v10, %v3580_v3  ;;  %5444 = vmatpush3.bf16.msra.mxu1 %v5976_v28  ;;  %v6001_v3 = vld [vmem:[%s7551_s1 + $0x9d8] sm:$0xff]   ;;  %v6005_v7 = vld [vmem:[%s7551_s1 + $0x9e0] sm:$0xff]   ;;  %v6008_v10 = vld [vmem:[%s7551_s1 + $0x928] sm:$0xff]  }
 0x11e   :  { %5445 = vmatprep.subr.bf16.mxu1 %v5979_v31  ;;  %v6026_v26 = vld [vmem:[%s7551_s1 + $0xa00] sm:$0xff]  }
 0x11f   :  { %5424 = vmatpush3.bf16.msra.mxu0 %v5978_v30  ;;  %v6028_v28 = vld [vmem:[%s7551_s1 + $0xa80] sm:$0xff]   ;;  %v6029_v30 = vld [vmem:[%s7551_s1 + $0xa48] sm:$0xff]  }
 0x120   :  { %5453 = vmatprep.subr.bf16.mxu0 %v5984_v35  ;;  %v6031_v35 = vld [vmem:[%s7551_s1 + $0xac8] sm:$0xff]  }
 0x121   :  { %5446 = vmatpush3.bf16.msra.mxu1 %v5983_v34 }
 0x122   :  { %4149 = vmatmul.mubr.bf16.vlgmr.msra.gmra.mrb[32].mxu0 %v5980_v32  ;;  %5475 = vmatprep.subr.bf16.mxu1 %v5989_v39  ;;  %v6030_v32 = vld [vmem:[%s7551_s1 + $0xa08] sm:$0xff]  }
 0x123   :  { %5454 = vmatpush3.bf16.msra.mxu0 %v5988_v38  ;;  %4230 = vmatprep.mubr.bf16.mxu0 %v6020_v21 }
 0x124   :  { %4190 = vmatmul.mubr.bf16.vlgmr.msra.gmra.mrb[32].mxu1 %v5985_v36  ;;  %5455 = vmatprep.subr.bf16.mxu0 %v5991_v43  ;;  %v6034_v43 = vld [vmem:[%s7551_s1 + $0xa10] sm:$0xff]  }
 0x125   :  { %5476 = vmatpush3.bf16.msra.mxu1 %v5990_v41  ;;  %4271 = vmatprep.mubr.bf16.mxu1 %v6025_v25 }
 0x126   :  { %5477 = vmatprep.subr.bf16.mxu1 %v5993_v48 }
 0x127   :  { %5456 = vmatpush3.bf16.msra.mxu0 %v5992_v46  ;;  %v6035_v46 = vld [vmem:[%s7551_s1 + $0xad0] sm:$0xff]  }
 0x128   :  { %5457 = vmatprep.subr.bf16.mxu0 %v5995_v54 }
 0x129   :  { %5478 = vmatpush3.bf16.msra.mxu1 %v5994_v51 }
 0x12a   :  { %5479 = vmatprep.subr.bf16.mxu1 %v5997_v60  ;;  %v6044_v60 = vld [vmem:[%s7551_s1 + $0xaa0] sm:$0xff]  }
 0x12b   :  { %5458 = vmatpush3.bf16.msra.mxu0 %v5996_v57  ;;  %v6041_v57 = vld [vmem:[%s7551_s1 + $0xa60] sm:$0xff]  }
 0x12c   :  { %5459 = vmatprep.subr.bf16.mxu0 %v5999_v0  ;;  %v6048_v0 = vld [vmem:[%s7551_s1 + $0xaa8] sm:$0xff]  }
 0x12d   :  { %5480 = vmatpush3.bf16.msra.mxu1 %v5998_v63  ;;  %v6047_v63 = vld [vmem:[%s7551_s1 + $0xae8] sm:$0xff]  }
 0x12e   :  { %5481 = vmatprep.subr.bf16.mxu1 %v6001_v3  ;;  %v6051_v3 = vld [vmem:[%s7551_s1 + $0xaf0] sm:$0xff]  }
 0x12f   :  { %5460 = vmatpush3.bf16.msra.mxu0 %v6000_v2  ;;  %v6050_v2 = vld [vmem:[%s7551_s1 + $0xa30] sm:$0xff]  }
 0x130   :  { %5461 = vmatprep.subr.bf16.mxu0 %v6003_v5  ;;  %v6053_v5 = vld [vmem:[%s7551_s1 + $0xa78] sm:$0xff]  }
 0x131   :  { %5482 = vmatpush3.bf16.msra.mxu1 %v6002_v4  ;;  %v6052_v4 = vld [vmem:[%s7551_s1 + $0xab0] sm:$0xff]  }
 0x132   :  { %5483 = vmatprep.subr.bf16.mxu1 %v6005_v7  ;;  %v6055_v7 = vld [vmem:[%s7551_s1 + $0xaf8] sm:$0xff]  }
 0x133   :  { %5462 = vmatpush3.bf16.msra.mxu0 %v6004_v6  ;;  %v6054_v6 = vld [vmem:[%s7551_s1 + $0xa38] sm:$0xff]  }
 0x135   :  { %v5161_v40 = vpop.f32.mrb[8].mxu0  ;;  %5484 = vmatpush3.bf16.msra.mxu1 %v6006_v8  ;;  %v6056_v8 = vld [vmem:[%s7552_s0 + $0xa0] ss:$196 sps:$4 sm:$0xff]  }
 0x136   :  { %v5162_v42 = vpop.f32.mrb[9].mxu0  ;;  %5485 = vmatprep.subr.bf16.mxu1 %v6009_v11  ;;  %v6060_v11 = vld [vmem:[%s7551_s1 + $0xb40] sm:$0xff]  }
 0x137   :  { %v5163_v44 = vadd.f32 %v5162_v42, %v5161_v40  ;;  %v5164_v45 = vpop.f32.mrb[10].mxu0  ;;  %v5183_v47 = vpop.f32.mrb[8].mxu1  ;;  %v6033_v40 = vld [vmem:[%s7551_s1 + $0xa50] sm:$0xff]  }
 0x138   :  { %v5165_v50 = vpop.f32.mrb[11].mxu0  ;;  %v5184_v53 = vpop.f32.mrb[9].mxu1 }
 0x139   :  { %v3659_v49 = vadd.f32 %v5163_v44, %v7050_v9  ;;  %v5166_v52 = vadd.f32 %v5165_v50, %v5164_v45  ;;  %v5185_v55 = vadd.f32 %v5184_v53, %v5183_v47  ;;  %v5186_v56 = vpop.f32.mrb[10].mxu1  ;;  %v6007_v9 = vld [vmem:[%s7551_s1 + $0x968] sm:$0xff]   ;;  %5486 = vmatpush3.bf16.msra.mxu1 %v6010_v12  ;;  %v6038_v53 = vld [vmem:[%s7551_s1 + $0xa18] sm:$0xff]  }
 0x13a   :  { %v5187_v59 = vpop.f32.mrb[11].mxu1  ;;  %5463 = vmatprep.subr.bf16.mxu0 %v6007_v9  ;;  %5487 = vmatprep.subr.bf16.mxu1 %v6013_v15  ;;  %v6058_v9 = vld [vmem:[%s7552_s0 + $0xa4] ss:$196 sps:$4 sm:$0xff]  }
 0x13b   :  { %v3662_v58 = vadd.f32 %v5166_v52, %v7058_v13  ;;  %v7164_v61 = vadd.f32 %v5185_v55, %v3659_v49  ;;  %v5188_v62 = vadd.f32 %v5187_v59, %v5186_v56  ;;  %5464 = vmatpush3.bf16.msra.mxu0 %v6008_v10  ;;  %v6011_v13 = vld [vmem:[%s7551_s1 + $0x970] sm:$0xff]   ;;  %v6037_v52 = vld [vmem:[%s7551_s1 + $0xa58] sm:$0xff]   ;;  %v6043_v59 = vld [vmem:[%s7551_s1 + $0xae0] sm:$0xff]  }
 0x13c   :  { %5465 = vmatprep.subr.bf16.mxu0 %v6011_v13  ;;  %v6036_v49 = vld [vmem:[%s7551_s1 + $0xa90] sm:$0xff]   ;;  %v6039_v55 = vld [vmem:[%s7551_s1 + $0xad8] sm:$0xff]   ;;  %v6061_v12 = vld [vmem:[%s7552_s0 + $0xa8] ss:$196 sps:$4 sm:$0xff]  }
 0x13d   :  { %v7172_v1 = vadd.f32 %v5188_v62, %v3662_v58  ;;  %5488 = vmatpush3.bf16.msra.mxu1 %v6014_v16  ;;  %v6040_v56 = vld [vmem:[%s7551_s1 + $0xa98] sm:$0xff]   ;;  %v6042_v58 = vld [vmem:[%s7551_s1 + $0xa20] sm:$0xff]   ;;  %v6046_v62 = vld [vmem:[%s7551_s1 + $0xa28] sm:$0xff]  }
 0x13e   :  { %5489 = vmatprep.subr.bf16.mxu1 %v6017_v19  ;;  %v6059_v10 = vld [vmem:[%s7551_s1 + $0xab8] sm:$0xff]   ;;  %v6063_v13 = vld [vmem:[%s7552_s0 + $0xac] ss:$196 sps:$4 sm:$0xff]   ;;  %v6065_v15 = vld [vmem:[%s7551_s1 + $0xbc0] sm:$0xff]  }
 0x13f   :  { %5466 = vmatpush3.bf16.msra.mxu0 %v6012_v14  ;;  %v6064_v14 = vld [vmem:[%s7551_s1 + $0xb00] sm:$0xff]   ;;  %v6067_v19 = vld [vmem:[%s7551_s1 + $0xb48] sm:$0xff]  }
 0x140   :  { %5467 = vmatprep.subr.bf16.mxu0 %v6015_v17  ;;  %v6066_v17 = vld [vmem:[%s7551_s1 + $0xb80] sm:$0xff]  }
 0x141   :  { %5490 = vmatpush3.bf16.msra.mxu1 %v6021_v22  ;;  %v6068_v22 = vld [vmem:[%s7551_s1 + $0xb08] sm:$0xff]  }
 0x142   :  { %5519 = vmatprep.subr.bf16.mxu1 %v6027_v27 }
 0x143   :  { %5468 = vmatpush3.bf16.msra.mxu0 %v6016_v18 }
 0x144   :  { %5497 = vmatprep.subr.bf16.mxu0 %v6022_v23  ;;  %4272 = vmatmul.mubr.bf16.vlgmr.msra.gmra.mrb[36].mxu1 %v6023_v24  ;;  %v6069_v24 = vld [vmem:[%s7551_s1 + $0xbc8] sm:$0xff]  }
 0x145   :  { %5520 = vmatpush3.bf16.msra.mxu1 %v6028_v28  ;;  %4353 = vmatprep.mubr.bf16.mxu1 %v6063_v13  ;;  %v6070_v28 = vld [vmem:[%s7551_s1 + $0xb88] sm:$0xff]  }
 0x146   :  { %4231 = vmatmul.mubr.bf16.vlgmr.msra.gmra.mrb[36].mxu0 %v6018_v20  ;;  %5521 = vmatprep.subr.bf16.mxu1 %v6031_v35 }
 0x147   :  { %5498 = vmatpush3.bf16.msra.mxu0 %v6026_v26  ;;  %4312 = vmatprep.mubr.bf16.mxu0 %v6058_v9 }
 0x148   :  { %5499 = vmatprep.subr.bf16.mxu0 %v6029_v30  ;;  %v6071_v30 = vld [vmem:[%s7551_s1 + $0xb50] sm:$0xff]  }
 0x149   :  { %5522 = vmatpush3.bf16.msra.mxu1 %v6032_v37 }
 0x14a   :  { %5523 = vmatprep.subr.bf16.mxu1 %v6035_v46  ;;  %v6080_v46 = vld [vmem:[%s7551_s1 + $0xb20] sm:$0xff]  }
 0x14b   :  { %5500 = vmatpush3.bf16.msra.mxu0 %v6030_v32 }
 0x14c   :  { %5501 = vmatprep.subr.bf16.mxu0 %v6033_v40  ;;  %v6075_v40 = vld [vmem:[%s7551_s1 + $0xb58] sm:$0xff]  }
 0x14d   :  { %5524 = vmatpush3.bf16.msra.mxu1 %v6036_v49  ;;  %v6083_v49 = vld [vmem:[%s7551_s1 + $0xb68] sm:$0xff]  }
 0x14e   :  { %5525 = vmatprep.subr.bf16.mxu1 %v6039_v55  ;;  %v6089_v55 = vld [vmem:[%s7551_s1 + $0xbf0] sm:$0xff]  }
 0x14f   :  { %5502 = vmatpush3.bf16.msra.mxu0 %v6034_v43  ;;  %v6077_v43 = vld [vmem:[%s7551_s1 + $0xbd8] sm:$0xff]  }
 0x150   :  { %5503 = vmatprep.subr.bf16.mxu0 %v6037_v52  ;;  %v6086_v52 = vld [vmem:[%s7551_s1 + $0xba8] sm:$0xff]  }
 0x151   :  { %5526 = vmatpush3.bf16.msra.mxu1 %v6040_v56  ;;  %v6090_v56 = vld [vmem:[%s7551_s1 + $0xbb0] sm:$0xff]  }
 0x152   :  { %5527 = vmatprep.subr.bf16.mxu1 %v6043_v59  ;;  %v6093_v59 = vld [vmem:[%s7551_s1 + $0xbf8] sm:$0xff]  }
 0x153   :  { %5504 = vmatpush3.bf16.msra.mxu0 %v6038_v53  ;;  %v6087_v53 = vld [vmem:[%s7551_s1 + $0xb70] sm:$0xff]  }
 0x154   :  { %5505 = vmatprep.subr.bf16.mxu0 %v6041_v57  ;;  %v6091_v57 = vld [vmem:[%s7551_s1 + $0xb78] sm:$0xff]  }
 0x155   :  { %v5205_v29 = vpop.f32.mrb[12].mxu0  ;;  %5528 = vmatpush3.bf16.msra.mxu1 %v6044_v60  ;;  %v6094_v60 = vld [vmem:[%s7552_s0 + $0xb0] ss:$196 sps:$4 sm:$0xff]  }
 0x156   :  { %v5206_v31 = vpop.f32.mrb[13].mxu0  ;;  %5529 = vmatprep.subr.bf16.mxu1 %v6047_v63  ;;  %v6118_v63 = vmov 0.0  }
 0x157   :  { %v5207_v33 = vadd.f32 %v5206_v31, %v5205_v29  ;;  %v5208_v34 = vpop.f32.mrb[14].mxu0  ;;  %v5227_v36 = vpop.f32.mrb[12].mxu1  ;;  %5506 = vmatpush3.bf16.msra.mxu0 %v6042_v58  ;;  %v6092_v58 = vld [vmem:[%s7551_s1 + $0xb38] sm:$0xff]  }
 0x158   :  { %v5209_v39 = vpop.f32.mrb[15].mxu0  ;;  %v5228_v42 = vpop.f32.mrb[13].mxu1 }
 0x159   :  { %v3741_v38 = vadd.f32 %v5207_v33, %v7164_v61  ;;  %v5210_v41 = vadd.f32 %v5209_v39, %v5208_v34  ;;  %v5229_v44 = vadd.f32 %v5228_v42, %v5227_v36  ;;  %v5230_v45 = vpop.f32.mrb[14].mxu1  ;;  %v6045_v61 = vld [vmem:[%s7551_s1 + $0xa68] sm:$0xff]   ;;  %5530 = vmatpush3.bf16.msra.mxu1 %v6048_v0  ;;  %v6072_v34 = vld [vmem:[%s7551_s1 + $0xb10] sm:$0xff]   ;;  %v6076_v42 = vld [vmem:[%s7551_s1 + $0xb18] sm:$0xff]  }
 0x15a   :  { %v5231_v48 = vpop.f32.mrb[15].mxu1  ;;  %5507 = vmatprep.subr.bf16.mxu0 %v6045_v61  ;;  %5531 = vmatprep.subr.bf16.mxu1 %v6051_v3  ;;  %v6073_v36 = vld [vmem:[%s7551_s1 + $0xbd0] sm:$0xff]   ;;  %v6098_v0 = vld [vmem:[%s7552_s0 + $0xb8] ss:$196 sps:$4 sm:$0xff]   ;;  %v6102_v3 = vld [vmem:[%s7551_s1 + $0xc08] sm:$0xff]  }
 0x15b   :  { %v3744_v47 = vadd.f32 %v5210_v41, %v7172_v1  ;;  %v7281_v50 = vadd.f32 %v5229_v44, %v3741_v38  ;;  %v5232_v51 = vadd.f32 %v5231_v48, %v5230_v45  ;;  %5508 = vmatpush3.bf16.msra.mxu0 %v6046_v62  ;;  %v6049_v1 = vld [vmem:[%s7551_s1 + $0xa70] sm:$0xff]   ;;  %v6078_v44 = vld [vmem:[%s7551_s1 + $0xb98] sm:$0xff]   ;;  %v6079_v45 = vld [vmem:[%s7551_s1 + $0xb60] sm:$0xff]  }
 0x15c   :  { %5509 = vmatprep.subr.bf16.mxu0 %v6049_v1  ;;  %v6074_v39 = vld [vmem:[%s7551_s1 + $0xb90] sm:$0xff]   ;;  %v6082_v48 = vld [vmem:[%s7551_s1 + $0xba0] sm:$0xff]   ;;  %v6097_v62 = vld [vmem:[%s7551_s1 + $0xbb8] sm:$0xff]  }
 0x15d   :  { %v7289_v54 = vadd.f32 %v5232_v51, %v3744_v47  ;;  %5532 = vmatpush3.bf16.msra.mxu1 %v6052_v4  ;;  %v6081_v47 = vld [vmem:[%s7551_s1 + $0xbe0] sm:$0xff]   ;;  %v6085_v51 = vld [vmem:[%s7551_s1 + $0xbe8] sm:$0xff]   ;;  %v6096_v61 = vld [vmem:[%s7552_s0 + $0xb4] ss:$196 sps:$4 sm:$0xff]  }
 0x15e   :  { %5533 = vmatprep.subr.bf16.mxu1 %v6055_v7  ;;  %v6100_v1 = vld [vmem:[%s7552_s0 + $0xbc] ss:$196 sps:$4 sm:$0xff]  }
 0x15f   :  { %5510 = vmatpush3.bf16.msra.mxu0 %v6050_v2  ;;  %v6101_v2 = vld [vmem:[%s7551_s1 + $0xc00] sm:$0xff]  }
 0x160   :  { %5511 = vmatprep.subr.bf16.mxu0 %v6053_v5 }
 0x161   :  { %5534 = vmatpush3.bf16.msra.mxu1 %v6059_v10  ;;  %v6103_v10 = vld [vmem:[%s7551_s1 + $0xc10] sm:$0xff]  }
 0x162   :  { %5563 = vmatprep.subr.bf16.mxu1 %v6065_v15 }
 0x163   :  { %5512 = vmatpush3.bf16.msra.mxu0 %v6054_v6 }
 0x164   :  { %5541 = vmatprep.subr.bf16.mxu0 %v6060_v11  ;;  %4354 = vmatmul.mubr.bf16.vlgmr.msra.gmra.mrb[40].mxu1 %v6061_v12 }
 0x165   :  { %5564 = vmatpush3.bf16.msra.mxu1 %v6066_v17  ;;  %4435 = vmatprep.mubr.bf16.mxu1 %v6100_v1 }
 0x166   :  { %4313 = vmatmul.mubr.bf16.vlgmr.msra.gmra.mrb[40].mxu0 %v6056_v8  ;;  %5565 = vmatprep.subr.bf16.mxu1 %v6069_v24  ;;  %v6107_v24 = vld [vmem:[%s7551_s1 + $0xc30] sm:$0xff]  }
 0x167   :  { %5542 = vmatpush3.bf16.msra.mxu0 %v6064_v14  ;;  %4394 = vmatprep.mubr.bf16.mxu0 %v6096_v61  ;;  %v6112_v61 = vld [vmem:[%s7554_s3 + $0x10] sm:$0xff]  }
 0x168   :  { %5543 = vmatprep.subr.bf16.mxu0 %v6067_v19 }
 0x169   :  { %5566 = vmatpush3.bf16.msra.mxu1 %v6070_v28 }
 0x16a   :  { %5567 = vmatprep.subr.bf16.mxu1 %v6073_v36 }
 0x16b   :  { %5544 = vmatpush3.bf16.msra.mxu0 %v6068_v22  ;;  %v6105_v22 = vld [vmem:[%s7551_s1 + $0xc20] sm:$0xff]  }
 0x16c   :  { %5545 = vmatprep.subr.bf16.mxu0 %v6071_v30 }
 0x16d   :  { %5568 = vmatpush3.bf16.msra.mxu1 %v6074_v39 }
 0x16e   :  { %5569 = vmatprep.subr.bf16.mxu1 %v6077_v43 }
 0x16f   :  { %5546 = vmatpush3.bf16.msra.mxu0 %v6072_v34 }
 0x170   :  { %5547 = vmatprep.subr.bf16.mxu0 %v6075_v40 }
 0x171   :  { %5570 = vmatpush3.bf16.msra.mxu1 %v6078_v44 }
 0x172   :  { %5571 = vmatprep.subr.bf16.mxu1 %v6081_v47 }
 0x173   :  { %5548 = vmatpush3.bf16.msra.mxu0 %v6076_v42 }
 0x174   :  { %5549 = vmatprep.subr.bf16.mxu0 %v6079_v45 }
 0x175   :  { %v5249_v16 = vpop.f32.mrb[16].mxu0  ;;  %5572 = vmatpush3.bf16.msra.mxu1 %v6082_v48 }
 0x176   :  { %v5250_v18 = vpop.f32.mrb[17].mxu0  ;;  %5573 = vmatprep.subr.bf16.mxu1 %v6085_v51 }
 0x177   :  { %v5251_v20 = vadd.f32 %v5250_v18, %v5249_v16  ;;  %v5252_v21 = vpop.f32.mrb[18].mxu0  ;;  %v5271_v26 = vpop.f32.mrb[16].mxu1  ;;  %5550 = vmatpush3.bf16.msra.mxu0 %v6080_v46 }
 0x178   :  { %v5253_v23 = vpop.f32.mrb[19].mxu0  ;;  %v5272_v29 = vpop.f32.mrb[17].mxu1  ;;  %5551 = vmatprep.subr.bf16.mxu0 %v6083_v49 }
 0x179   :  { %v3823_v25 = vadd.f32 %v5251_v20, %v7281_v50  ;;  %v5254_v27 = vadd.f32 %v5253_v23, %v5252_v21  ;;  %v5273_v32 = vadd.f32 %v5272_v29, %v5271_v26  ;;  %v5274_v33 = vpop.f32.mrb[18].mxu1  ;;  %v6084_v50 = vld [vmem:[%s7551_s1 + $0xb28] sm:$0xff]   ;;  %5574 = vmatpush3.bf16.msra.mxu1 %v6086_v52  ;;  %v6104_v20 = vld [vmem:[%s7551_s1 + $0xc18] sm:$0xff]   ;;  %v6109_v26 = vld [vmem:[%s7552_s0 + $0xc0] ss:$196 sps:$4 sm:$0xff]  }
 0x17a   :  { %v5275_v35 = vpop.f32.mrb[19].mxu1  ;;  %5575 = vmatprep.subr.bf16.mxu1 %v6089_v55  ;;  %v6106_v23 = vld [vmem:[%s7551_s1 + $0xc28] sm:$0xff]  }
 0x17b   :  { %v3826_v31 = vadd.f32 %v5254_v27, %v7289_v54  ;;  %v7392_v37 = vadd.f32 %v5273_v32, %v3823_v25  ;;  %v5276_v38 = vadd.f32 %v5275_v35, %v5274_v33  ;;  %5552 = vmatpush3.bf16.msra.mxu0 %v6084_v50  ;;  %v6088_v54 = vld [vmem:[%s7551_s1 + $0xb30] sm:$0xff]   ;;  %v6108_v25 = vld [vmem:[%s7551_s1 + $0xc38] sm:$0xff]  }
 0x17c   :  { %5553 = vmatprep.subr.bf16.mxu0 %v6087_v53 }
 0x17d   :  { %v7400_v41 = vadd.f32 %v5276_v38, %v3826_v31  ;;  %5576 = vmatpush3.bf16.msra.mxu1 %v6090_v56 }
 0x17e   :  { %5577 = vmatprep.subr.bf16.mxu1 %v6093_v59  ;;  %v6110_v59 = vld [vmem:[%s7554_s3] sm:$0xff]  }
 0x17f   :  { %5554 = vmatpush3.bf16.msra.mxu0 %v6088_v54 }
 0x180   :  { %5555 = vmatprep.subr.bf16.mxu0 %v6091_v57 }
 0x181   :  { %5578 = vmatpush3.bf16.msra.mxu1 %v6097_v62  ;;  %v6113_v62 = vld [vmem:[%s7554_s3 + $0x18] sm:$0xff]  }
 0x182   :  { %5623 = vmatprep.subr.bf16.mxu1 %v6118_v63 }
 0x183   :  { %5556 = vmatpush3.bf16.msra.mxu0 %v6092_v58 }
 0x184   :  { %5603 = vmatprep.subr.bf16.mxu0 %v6118_v63  ;;  %4436 = vmatmul.mubr.bf16.vlgmr.msra.gmra.mrb[44].mxu1 %v6098_v0  ;;  %v6114_v0 = vld [vmem:[%s7554_s3 + $0x20] sm:$0xff]  }
 0x185   :  { %5639 = vmatprep.mubr.msk.bf16.mxu1 %vm6119_vm0, %v6118_v63  ;;  %5624 = vmatpush3.bf16.msra.mxu1 %v6110_v59 }
 0x186   :  { %4395 = vmatmul.mubr.bf16.vlgmr.msra.gmra.mrb[44].mxu0 %v6094_v60  ;;  %v6111_v60 = vld [vmem:[%s7554_s3 + $0x8] sm:$0xff]   ;;  %5625 = vmatprep.subr.bf16.mxu1 %v6118_v63 }
 0x187   :  { %5619 = vmatprep.mubr.msk.bf16.mxu0 %vm6119_vm0, %v6118_v63  ;;  %5604 = vmatpush3.bf16.msra.mxu0 %v6101_v2 }
 0x188   :  { %5605 = vmatprep.subr.bf16.mxu0 %v6118_v63 }
 0x189   :  { %5626 = vmatpush3.bf16.msra.mxu1 %v6111_v60 }
 0x18a   :  { %5627 = vmatprep.subr.bf16.mxu1 %v6118_v63 }
 0x18b   :  { %5606 = vmatpush3.bf16.msra.mxu0 %v6102_v3 }
 0x18c   :  { %5607 = vmatprep.subr.bf16.mxu0 %v6118_v63 }
 0x18d   :  { %5628 = vmatpush3.bf16.msra.mxu1 %v6112_v61 }
 0x18e   :  { %5629 = vmatprep.subr.bf16.mxu1 %v6118_v63 }
 0x18f   :  { %5608 = vmatpush3.bf16.msra.mxu0 %v6103_v10 }
 0x190   :  { %5609 = vmatprep.subr.bf16.mxu0 %v6118_v63 }
 0x191   :  { %5630 = vmatpush3.bf16.msra.mxu1 %v6113_v62 }
 0x192   :  { %5631 = vmatprep.subr.bf16.mxu1 %v6118_v63 }
 0x193   :  { %5610 = vmatpush3.bf16.msra.mxu0 %v6104_v20 }
 0x194   :  { %5611 = vmatprep.subr.bf16.mxu0 %v6118_v63 }
 0x195   :  { %v5293_v4 = vpop.f32.mrb[20].mxu0  ;;  %5632 = vmatpush3.bf16.msra.mxu1 %v6114_v0 }
 0x196   :  { %v5294_v5 = vpop.f32.mrb[21].mxu0  ;;  %5633 = vmatprep.subr.bf16.mxu1 %v6118_v63 }
 0x197   :  { %v5295_v6 = vadd.f32 %v5294_v5, %v5293_v4  ;;  %v5296_v7 = vpop.f32.mrb[22].mxu0  ;;  %v5315_v8 = vpop.f32.mrb[20].mxu1  ;;  %5612 = vmatpush3.bf16.msra.mxu0 %v6105_v22  ;;  %v6115_v5 = vld [vmem:[%s7554_s3 + $0x28] sm:$0xff]  }
 0x198   :  { %v5297_v9 = vpop.f32.mrb[23].mxu0  ;;  %v5316_v13 = vpop.f32.mrb[21].mxu1  ;;  %5613 = vmatprep.subr.bf16.mxu0 %v6118_v63 }
 0x199   :  { %v3905_v11 = vadd.f32 %v5295_v6, %v7392_v37  ;;  %v5298_v12 = vadd.f32 %v5297_v9, %v5296_v7  ;;  %v5317_v14 = vadd.f32 %v5316_v13, %v5315_v8  ;;  %v5318_v15 = vpop.f32.mrb[22].mxu1  ;;  %5634 = vmatpush3.bf16.msra.mxu1 %v6115_v5 }
 0x19a   :  { %v5319_v17 = vpop.f32.mrb[23].mxu1  ;;  %5635 = vmatprep.subr.bf16.mxu1 %v6118_v63 }
 0x19b   :  { %v3908_v16 = vadd.f32 %v5298_v12, %v7400_v41  ;;  %v3946_v18 = vadd.f32 %v5317_v14, %v3905_v11  ;;  %v5320_v19 = vadd.f32 %v5319_v17, %v5318_v15  ;;  %5614 = vmatpush3.bf16.msra.mxu0 %v6106_v23 }
 0x19c   :  { %5615 = vmatprep.subr.bf16.mxu0 %v6118_v63 }
 0x19d   :  { %v3949_v21 = vadd.f32 %v5320_v19, %v3908_v16  ;;  %v6117_v19 = vld [vmem:[%s7554_s3 + $0x38] sm:$0xff]  }
 0x19f   :  { %5616 = vmatpush3.bf16.msra.mxu0 %v6107_v24 }
 0x1a0   :  { %5617 = vmatprep.subr.bf16.mxu0 %v6118_v63 }
 0x1a3   :  { %5618 = vmatpush3.bf16.msra.mxu0 %v6108_v25 }
 0x1a6   :  { %5620 = vmatmul.mubr.bf16.vlgmr.msra.gmra.mrb[48].mxu0 %v6109_v26 }
 0x1b5   :  { %v5337_v27 = vpop.f32.mrb[24].mxu0 }
 0x1b6   :  { %v5338_v28 = vpop.f32.mrb[25].mxu0 }
 0x1b7   :  { %v5339_v29 = vadd.f32 %v5338_v28, %v5337_v27  ;;  %v5340_v30 = vpop.f32.mrb[26].mxu0  ;;  %v5359_v31 = vpop.f32.mrb[24].mxu1 }
 0x1b8   :  { %v5341_v32 = vpop.f32.mrb[27].mxu0  ;;  %v5360_v35 = vpop.f32.mrb[25].mxu1 }
 0x1b9   :  { %v3987_v33 = vadd.f32 %v5339_v29, %v3946_v18  ;;  %v5342_v34 = vadd.f32 %v5341_v32, %v5340_v30  ;;  %v5361_v36 = vadd.f32 %v5360_v35, %v5359_v31  ;;  %v5362_v37 = vpop.f32.mrb[26].mxu1  ;;  %v6116_v18 = vld [vmem:[%s7554_s3 + $0x30] sm:$0xff]  }
 0x1ba   :  { %v5363_v39 = vpop.f32.mrb[27].mxu1  ;;  %5636 = vmatpush3.bf16.msra.mxu1 %v6116_v18 }
 0x1bb   :  { %v3990_v38 = vadd.f32 %v5342_v34, %v3949_v21  ;;  %v4028_v40 = vadd.f32 %v5361_v36, %v3987_v33  ;;  %v5364_v41 = vadd.f32 %v5363_v39, %v5362_v37  ;;  %5637 = vmatprep.subr.bf16.mxu1 %v6118_v63 }
 0x1bd   :  { %v4031_v42 = vadd.f32 %v5364_v41, %v3990_v38 }
 0x1be   :  { %5638 = vmatpush3.bf16.msra.mxu1 %v6117_v19 }
 0x1d5   :  { %v5381_v43 = vpop.f32.mrb[28].mxu0 }
 0x1d6   :  { %v5382_v44 = vpop.f32.mrb[29].mxu0 }
 0x1d7   :  { %v5383_v45 = vadd.f32 %v5382_v44, %v5381_v43  ;;  %v5384_v46 = vpop.f32.mrb[30].mxu0  ;;  %v5403_v47 = vpop.f32.mrb[28].mxu1 }
 0x1d8   :  { %v5385_v48 = vpop.f32.mrb[31].mxu0  ;;  %v5404_v51 = vpop.f32.mrb[29].mxu1 }
 0x1d9   :  { %v4069_v49 = vadd.f32 %v5383_v45, %v4028_v40  ;;  %v5386_v50 = vadd.f32 %v5385_v48, %v5384_v46  ;;  %v5405_v52 = vadd.f32 %v5404_v51, %v5403_v47  ;;  %v5406_v53 = vpop.f32.mrb[30].mxu1 }
 0x1da   :  { %v5407_v55 = vpop.f32.mrb[31].mxu1 }
 0x1db   :  { %v4072_v54 = vadd.f32 %v5386_v50, %v4031_v42  ;;  %v4110_v56 = vadd.f32 %v5405_v52, %v4069_v49  ;;  %v5408_v57 = vadd.f32 %v5407_v55, %v5406_v53 }
 0x1dd   :  { %v4113_v58 = vadd.f32 %v5408_v57, %v4072_v54 }
 0x1f5   :  { %v5425_v1 = vpop.f32.mrb[32].mxu0 }
 0x1f6   :  { %v5426_v2 = vpop.f32.mrb[33].mxu0 }
 0x1f7   :  { %v5427_v3 = vadd.f32 %v5426_v2, %v5425_v1  ;;  %v5428_v4 = vpop.f32.mrb[34].mxu0  ;;  %v5447_v8 = vpop.f32.mrb[32].mxu1 }
 0x1f8   :  { %v5429_v6 = vpop.f32.mrb[35].mxu0  ;;  %v5448_v10 = vpop.f32.mrb[33].mxu1 }
 0x1f9   :  { %v4151_v7 = vadd.f32 %v5427_v3, %v4110_v56  ;;  %v5430_v9 = vadd.f32 %v5429_v6, %v5428_v4  ;;  %v5449_v12 = vadd.f32 %v5448_v10, %v5447_v8  ;;  %v5450_v13 = vpop.f32.mrb[34].mxu1 }
 0x1fa   :  { %v5451_v14 = vpop.f32.mrb[35].mxu1 }
 0x1fb   :  { %v4154_v11 = vadd.f32 %v5430_v9, %v4113_v58  ;;  %v4192_v15 = vadd.f32 %v5449_v12, %v4151_v7  ;;  %v5452_v16 = vadd.f32 %v5451_v14, %v5450_v13  ;;  %v5048_v13 = vld [vmem:[%s7555_s4] ss:$0 sm:$0xff] }
 0x1fd   :  { %v4195_v17 = vadd.f32 %v5452_v16, %v4154_v11 }
 0x217   :  { %v5491_v24 = vpop.f32.mrb[36].mxu1 }
 0x218   :  { %v5492_v28 = vpop.f32.mrb[37].mxu1 }
 0x219   :  { %v5469_v20 = vpop.f32.mrb[36].mxu0  ;;  %v5493_v29 = vadd.f32 %v5492_v28, %v5491_v24  ;;  %v5494_v30 = vpop.f32.mrb[38].mxu1 }
 0x21a   :  { %v5470_v21 = vpop.f32.mrb[37].mxu0  ;;  %v5495_v32 = vpop.f32.mrb[39].mxu1 }
 0x21b   :  { %v5471_v22 = vadd.f32 %v5470_v21, %v5469_v20  ;;  %v5472_v23 = vpop.f32.mrb[38].mxu0  ;;  %v5496_v63 = vadd.f32 %v5495_v32, %v5494_v30 }
 0x21c   :  { %v5473_v25 = vpop.f32.mrb[39].mxu0 }
 0x21d   :  { %v4233_v26 = vadd.f32 %v5471_v22, %v4192_v15  ;;  %v5474_v27 = vadd.f32 %v5473_v25, %v5472_v23 }
 0x21f   :  { %v4236_v31 = vadd.f32 %v5474_v27, %v4195_v17  ;;  %v4274_v33 = vadd.f32 %v5493_v29, %v4233_v26 }
 0x221   :  { %v4277_v34 = vadd.f32 %v5496_v63, %v4236_v31 }
 0x237   :  { %v5535_v39 = vpop.f32.mrb[40].mxu1 }
 0x238   :  { %v5536_v43 = vpop.f32.mrb[41].mxu1 }
 0x239   :  { %v5513_v35 = vpop.f32.mrb[40].mxu0  ;;  %v5537_v44 = vadd.f32 %v5536_v43, %v5535_v39  ;;  %v5538_v45 = vpop.f32.mrb[42].mxu1 }
 0x23a   :  { %v5514_v36 = vpop.f32.mrb[41].mxu0  ;;  %v5539_v47 = vpop.f32.mrb[43].mxu1 }
 0x23b   :  { %v5515_v37 = vadd.f32 %v5514_v36, %v5513_v35  ;;  %v5516_v38 = vpop.f32.mrb[42].mxu0  ;;  %v5540_v49 = vadd.f32 %v5539_v47, %v5538_v45 }
 0x23c   :  { %v5517_v40 = vpop.f32.mrb[43].mxu0 }
 0x23d   :  { %v4315_v41 = vadd.f32 %v5515_v37, %v4274_v33  ;;  %v5518_v42 = vadd.f32 %v5517_v40, %v5516_v38 }
 0x23f   :  { %v4318_v46 = vadd.f32 %v5518_v42, %v4277_v34  ;;  %v4356_v48 = vadd.f32 %v5537_v44, %v4315_v41 }
 0x241   :  { %v4359_v50 = vadd.f32 %v5540_v49, %v4318_v46 }
 0x257   :  { %v5579_v55 = vpop.f32.mrb[44].mxu1 }
 0x258   :  { %v5580_v59 = vpop.f32.mrb[45].mxu1 }
 0x259   :  { %v5557_v51 = vpop.f32.mrb[44].mxu0  ;;  %v5581_v60 = vadd.f32 %v5580_v59, %v5579_v55  ;;  %v5582_v61 = vpop.f32.mrb[46].mxu1 }
 0x25a   :  { %v5558_v52 = vpop.f32.mrb[45].mxu0  ;;  %v5583_v0 = vpop.f32.mrb[47].mxu1 }
 0x25b   :  { %v5559_v53 = vadd.f32 %v5558_v52, %v5557_v51  ;;  %v5560_v54 = vpop.f32.mrb[46].mxu0  ;;  %v5584_v1 = vadd.f32 %v5583_v0, %v5582_v61 }
 0x25c   :  { %v5561_v56 = vpop.f32.mrb[47].mxu0 }
 0x25d   :  { %v4397_v57 = vadd.f32 %v5559_v53, %v4356_v48  ;;  %v5562_v58 = vadd.f32 %v5561_v56, %v5560_v54 }
 0x25f   :  { %v4400_v62 = vadd.f32 %v5562_v58, %v4359_v50  ;;  %v4438_v2 = vadd.f32 %v5581_v60, %v4397_v57 }
 0x261   :  { %v4441_v3 = vadd.f32 %v5584_v1, %v4400_v62 }
 0x279   :  { %v4478_v4 = vpop.f32.mrb[48].mxu0 }
 0x27a   :  { %v4479_v5 = vadd.f32 %v4478_v4, %v4438_v2  ;;  %v5621_v6 = vpop.f32.mrb[49].mxu0 }
 0x27b   :  { %v4481_v7 = vpop.f32.mrb[50].mxu0 }
 0x27c   :  { %v4482_v8 = vadd.f32 %v4481_v7, %v4441_v3  ;;  %v5622_v9 = vpop.f32.mrb[51].mxu0  ;;  %v4485_v10 = vmax.f32 %v4479_v5, 0.0 }
 0x27e   :  { %v4486_v11 = vmax.f32 %v4482_v8, 0.0 }
 0x280   :  { %v4487_v12 = vpack.c.bf16 %v4486_v11, %v4485_v10 }
 0x282   :  { %5640 = vmatmul.mubr.bf16.vlgmr.msra.gmra.mrb[48].mxu1 %v4487_v12 }
 0x355   :  { %v4593_v14 = vpop.f32.mrb[48].mxu1 }
 0x356   :  { %v4594_v15 = vadd.f32 %v5048_v13, %v4593_v14  ;;  %v5641_v16 = vpop.f32.mrb[49].mxu1 }
 0x357   :  { %v4596_v17 = vpop.f32.mrb[50].mxu1 }
 0x358   :  { %4600 = vst [vmem:[%s7556_s5] sm:$0xff] %v4594_v15  ;;  %v4597_v18 = vadd.f32 %v5048_v13, %v4596_v17  ;;  %v5642_v19 = vpop.f32.mrb[51].mxu1 }
 0x35a   :  { %4601 = vst [vmem:[%s7556_s5 + $0x8] sm:$0xff] %v4597_v18 }

</bundles_post_ra>
